<compile_context>
chip_gen: v5e
topology: v5e:2x2
jax: 0.10.0
libtpu: 0.0.40
codegen_flags: <defaults>
</compile_context>

<pallas_src>
import functools
import math

import jax
import jax.numpy as jnp
from jax import lax
from jax.experimental import pallas as pl
from jax.experimental.pallas import tpu as pltpu


# ---------------------------------------------------------------------------
# Helpers
# ---------------------------------------------------------------------------
def _round_up(x: int, m: int) -> int:
    return ((x + m - 1) // m) * m


def _pad_to(x, shape, dtype):
    """Zero-pad a 2-D array to `shape` and cast to `dtype`."""
    out = jnp.zeros(shape, dtype)
    return out.at[: x.shape[0], : x.shape[1]].set(x.astype(dtype))


# ---------------------------------------------------------------------------
# Generic tiled matmul kernel:  act(a @ b + bias)
#   grid = (M//tm, K//tk), contraction axis last, f32 VMEM accumulator.
# ---------------------------------------------------------------------------
def _make_matmul_kernel(leaky_alpha):
    def kernel(a_ref, b_ref, bias_ref, o_ref, acc_ref):
        k = pl.program_id(1)

        @pl.when(k == 0)
        def _init():
            acc_ref[...] = jnp.zeros_like(acc_ref)

        acc_ref[...] += jnp.dot(a_ref[...], b_ref[...],
                                preferred_element_type=jnp.float32)

        @pl.when(k == pl.num_programs(1) - 1)
        def _finalize():
            out = acc_ref[...] + bias_ref[...]
            if leaky_alpha is not None:
                out = jnp.where(out > 0, out, leaky_alpha * out)
            o_ref[...] = out.astype(o_ref.dtype)

    return kernel


def _tiled_matmul(a, b, bias, *, leaky_alpha=None, out_dtype, tm, tk):
    """act(a @ b + bias) with (tm x tk) tiles and an f32 accumulator."""
    M, K = a.shape
    K2, N = b.shape
    out_dtype = jnp.dtype(out_dtype)
    assert K == K2 and M % tm == 0 and K % tk == 0 and N % 128 == 0

    grid = (M // tm, K // tk)
    kernel = _make_matmul_kernel(leaky_alpha)

    # VMEM footprint: double-buffered tiles + resident f32 accumulator.
    need = (2 * (tm * tk * a.dtype.itemsize
                 + tk * N * b.dtype.itemsize
                 + N * bias.dtype.itemsize
                 + tm * N * out_dtype.itemsize)
            + tm * N * 4)
    vmem_limit = int(min(max(2 * need, 8 * 1024 * 1024), 64 * 1024 * 1024))

    cost = pl.CostEstimate(
        flops=2 * M * K * N,
        transcendentals=0,
        bytes_accessed=(M * K * a.dtype.itemsize
                        + (M // tm) * K * N * b.dtype.itemsize
                        + M * N * out_dtype.itemsize),
    )

    return pl.pallas_call(
        kernel,
        out_shape=jax.ShapeDtypeStruct((M, N), out_dtype),
        grid_spec=pltpu.PrefetchScalarGridSpec(
            num_scalar_prefetch=0,
            grid=grid,
            in_specs=[
                pl.BlockSpec((tm, tk), lambda i, k: (i, k)),   # a tile
                pl.BlockSpec((tk, N), lambda i, k: (k, 0)),    # b tile
                pl.BlockSpec((1, N), lambda i, k: (0, 0)),     # bias (f32)
            ],
            out_specs=pl.BlockSpec((tm, N), lambda i, k: (i, 0)),
            scratch_shapes=[pltpu.VMEM((tm, N), jnp.float32)],
        ),
        compiler_params=pltpu.CompilerParams(
            dimension_semantics=("parallel", "arbitrary"),
            vmem_limit_bytes=vmem_limit,
        ),
        cost_estimate=cost,
    )(a, b, bias)


# ---------------------------------------------------------------------------
# Union-linear + per-element KL kernel (one per path).
#   mean   = ho_mean   @ Wm_ho + fea @ Wm_fea + bm
#   logstd = ho_logstd @ Ws_ho + fea @ Ws_fea + bs     (consumed in-kernel)
#   kl[i,j] masked to 0 on padded rows/cols so the wrapper can just sum().
# ---------------------------------------------------------------------------
_SOFTPLUS_ONE = math.log1p(math.e)               # softplus(1.0)
_LOG_S2 = 0.1 + 0.9 * _SOFTPLUS_ONE              # log sigma_2 (logsigma_2 == 1)
_S2_SQ = math.exp(2.0 * _LOG_S2)


def _make_union_kernel(n_rows, n_cols, tm):
    def kernel(ho_m_ref, ho_s_ref, fea_ref,
               wm_ho_ref, wm_fea_ref, bm_ref,
               ws_ho_ref, ws_fea_ref, bs_ref,
               mean_ref, kl_ref):
        fea = fea_ref[...]
        mean = (jnp.dot(ho_m_ref[...], wm_ho_ref[...],
                        preferred_element_type=jnp.float32)
                + jnp.dot(fea, wm_fea_ref[...],
                          preferred_element_type=jnp.float32)
                + bm_ref[...])
        logstd = (jnp.dot(ho_s_ref[...], ws_ho_ref[...],
                          preferred_element_type=jnp.float32)
                  + jnp.dot(fea, ws_fea_ref[...],
                            preferred_element_type=jnp.float32)
                  + bs_ref[...])

        # Eval-mode reparameterization: sampled_z == mean.
        mean_ref[...] = mean

        # KL( N(mean, s1) || N(0, s2) ), s1 = exp(0.1 + 0.9*softplus(logstd)).
        softplus = jnp.maximum(logstd, 0.0) + jnp.log(1.0 + jnp.exp(-jnp.abs(logstd)))
        log_s1 = 0.1 + 0.9 * softplus
        kl = ((_LOG_S2 - log_s1)
              + (jnp.exp(2.0 * log_s1) + mean * mean) * (0.5 / _S2_SQ)
              - 0.5)

        rows = pl.program_id(0) * tm + lax.broadcasted_iota(jnp.int32, kl.shape, 0)
        cols = lax.broadcasted_iota(jnp.int32, kl.shape, 1)
        valid = (rows < n_rows) & (cols < n_cols)
        kl_ref[...] = jnp.where(valid, kl, 0.0)

    return kernel


def _union_kld(ho_m, ho_s, fea, wm_ho, wm_fea, bm, ws_ho, ws_fea, bs,
               *, n_rows, n_cols, tm):
    M, Fp = ho_m.shape
    assert M % tm == 0 and Fp % 128 == 0
    grid = (M // tm,)
    kernel = _make_union_kernel(n_rows, n_cols, tm)

    row = lambda i: (i, 0)
    full = lambda i: (0, 0)
    itm = ho_m.dtype.itemsize

    need = 2 * (3 * tm * Fp * itm + 4 * Fp * Fp * itm + 2 * Fp * 4 + 2 * tm * Fp * 4)
    vmem_limit = int(min(max(2 * need, 8 * 1024 * 1024), 64 * 1024 * 1024))
    cost = pl.CostEstimate(
        flops=8 * M * Fp * Fp,
        transcendentals=3 * M * Fp,
        bytes_accessed=3 * M * Fp * itm + 4 * Fp * Fp * itm + 2 * M * Fp * 4,
    )

    return pl.pallas_call(
        kernel,
        out_shape=(jax.ShapeDtypeStruct((M, Fp), jnp.float32),   # mean (== output)
                   jax.ShapeDtypeStruct((M, Fp), jnp.float32)),  # masked per-element KL
        grid_spec=pltpu.PrefetchScalarGridSpec(
            num_scalar_prefetch=0,
            grid=grid,
            in_specs=[
                pl.BlockSpec((tm, Fp), row),   # ho_mean
                pl.BlockSpec((tm, Fp), row),   # ho_logstd
                pl.BlockSpec((tm, Fp), row),   # fea
                pl.BlockSpec((Fp, Fp), full),  # Wm_ho
                pl.BlockSpec((Fp, Fp), full),  # Wm_fea
                pl.BlockSpec((1, Fp), full),   # bm
                pl.BlockSpec((Fp, Fp), full),  # Ws_ho
                pl.BlockSpec((Fp, Fp), full),  # Ws_fea
                pl.BlockSpec((1, Fp), full),   # bs
            ],
            out_specs=(pl.BlockSpec((tm, Fp), row),
                       pl.BlockSpec((tm, Fp), row)),
        ),
        compiler_params=pltpu.CompilerParams(
            dimension_semantics=("parallel",),
            vmem_limit_bytes=vmem_limit,
        ),
        cost_estimate=cost,
    )(ho_m, ho_s, fea, wm_ho, wm_fea, bm, ws_ho, ws_fea, bs)


# ---------------------------------------------------------------------------
# LastLayer_single.forward (eval mode)
# ---------------------------------------------------------------------------
def last_layer_single_forward(ufea, vfea, UV_adj, VU_adj, params, *,
                              alpha=0.2, compute_dtype=jnp.bfloat16, row_tile=512):
    """Returns (user, item, kld_loss).

    Linear weights in `params` are stored pre-transposed as [in_features, out_features];
    GCN weights as [in, out] (torch GraphConvolution orientation); biases as [1, out].
    `compute_dtype` is the MXU operand dtype (accumulation is always f32).
    `row_tile` is the row/contraction tile (re-derive per generation; the footprint at
    512 is only a few MiB, well inside v7x's 64 MiB VMEM).
    """
    U, F = ufea.shape
    I = vfea.shape[0]
    cd = jnp.dtype(compute_dtype)

    Fp = _round_up(F, 128)
    Hp = _round_up(params["w1"].shape[1], 128)
    Up = _round_up(U, row_tile)
    Ip = _round_up(I, row_tile)

    # --- zero-pad / cast inputs (lane-dense layout, bf16 MXU operands) ---
    ufea_p = _pad_to(ufea, (Up, Fp), cd)
    vfea_p = _pad_to(vfea, (Ip, Fp), cd)
    UV_p = _pad_to(UV_adj, (Up, Ip), cd)
    VU_p = _pad_to(VU_adj, (Ip, Up), cd)

    w1_p = _pad_to(params["w1"], (Fp, Hp), cd)
    w2_p = _pad_to(params["w2"], (Fp, Hp), cd)
    b1_p = _pad_to(params["b1"], (1, Hp), jnp.float32)
    b2_p = _pad_to(params["b2"], (1, Hp), jnp.float32)

    # Fuse the mean/logstd GCN heads column-wise so each adjacency is streamed once.
    w3_p = jnp.concatenate([_pad_to(params["w3_mean"], (Hp, Fp), cd),
                            _pad_to(params["w3_logstd"], (Hp, Fp), cd)], axis=1)
    b3_p = jnp.concatenate([_pad_to(params["b3_mean"], (1, Fp), jnp.float32),
                            _pad_to(params["b3_logstd"], (1, Fp), jnp.float32)], axis=1)
    w4_p = jnp.concatenate([_pad_to(params["w4_mean"], (Hp, Fp), cd),
                            _pad_to(params["w4_logstd"], (Hp, Fp), cd)], axis=1)
    b4_p = jnp.concatenate([_pad_to(params["b4_mean"], (1, Fp), jnp.float32),
                            _pad_to(params["b4_logstd"], (1, Fp), jnp.float32)], axis=1)

    # Union linears pre-split host-side: cat(ho, fea) @ W == ho @ W[:F] + fea @ W[F:].
    def split_union(w):
        return (_pad_to(w[:F, :], (Fp, Fp), cd), _pad_to(w[F:, :], (Fp, Fp), cd))

    wum_ho, wum_fea = split_union(params["wu_mean"])
    wus_ho, wus_fea = split_union(params["wu_logstd"])
    wim_ho, wim_fea = split_union(params["wi_mean"])
    wis_ho, wis_fea = split_union(params["wi_logstd"])
    bum = _pad_to(params["bu_mean"], (1, Fp), jnp.float32)
    bus = _pad_to(params["bu_logstd"], (1, Fp), jnp.float32)
    bim = _pad_to(params["bi_mean"], (1, Fp), jnp.float32)
    bis = _pad_to(params["bi_logstd"], (1, Fp), jnp.float32)

    zb_h = jnp.zeros((1, Hp), jnp.float32)
    zb_2f = jnp.zeros((1, 2 * Fp), jnp.float32)

    # --- user path: gc1 -> fused gc3_mean/gc3_logstd ---
    s1 = _tiled_matmul(ufea_p, w1_p, zb_h, out_dtype=cd, tm=row_tile, tk=Fp)
    u_ho = _tiled_matmul(VU_p, s1, b1_p, leaky_alpha=alpha, out_dtype=cd,
                         tm=row_tile, tk=row_tile)                       # [Ip, Hp]
    s3 = _tiled_matmul(u_ho, w3_p, zb_2f, out_dtype=cd, tm=row_tile, tk=Hp)
    u_ms = _tiled_matmul(UV_p, s3, b3_p, leaky_alpha=alpha, out_dtype=cd,
                         tm=row_tile, tk=row_tile)                       # [Up, 2Fp]

    # --- item path: gc2 -> fused gc4_mean/gc4_logstd ---
    s2 = _tiled_matmul(vfea_p, w2_p, zb_h, out_dtype=cd, tm=row_tile, tk=Fp)
    i_ho = _tiled_matmul(UV_p, s2, b2_p, leaky_alpha=alpha, out_dtype=cd,
                         tm=row_tile, tk=row_tile)                       # [Up, Hp]
    s4 = _tiled_matmul(i_ho, w4_p, zb_2f, out_dtype=cd, tm=row_tile, tk=Hp)
    i_ms = _tiled_matmul(VU_p, s4, b4_p, leaky_alpha=alpha, out_dtype=cd,
                         tm=row_tile, tk=row_tile)                       # [Ip, 2Fp]

    # Split the fused [mean | logstd] columns (wrapper-side layout plumbing).
    u_ho_m, u_ho_s = u_ms[:, :Fp], u_ms[:, Fp:]
    i_ho_m, i_ho_s = i_ms[:, :Fp], i_ms[:, Fp:]

    user_mean_p, user_kl_p = _union_kld(u_ho_m, u_ho_s, ufea_p,
                                        wum_ho, wum_fea, bum, wus_ho, wus_fea, bus,
                                        n_rows=U, n_cols=F, tm=row_tile)
    item_mean_p, item_kl_p = _union_kld(i_ho_m, i_ho_s, vfea_p,
                                        wim_ho, wim_fea, bim, wis_ho, wis_fea, bis,
                                        n_rows=I, n_cols=F, tm=row_tile)

    user = user_mean_p[:U, :F]
    item = item_mean_p[:I, :F]
    # kl.mean(dim=0).sum(): padded rows/cols were masked to 0 in-kernel.
    kld_loss = user_kl_p.sum() / U + item_kl_p.sum() / I
    return user, item, kld_loss


# ---------------------------------------------------------------------------
# Pure-JAX reference (mirrors the PyTorch eval-mode forward)
# ---------------------------------------------------------------------------
def _reference(ufea, vfea, UV_adj, VU_adj, p, alpha):
    def gcn(x, adj, w, b):
        o = adj @ (x @ w) + b
        return jnp.where(o > 0, o, alpha * o)

    def kld(mu, logstd):
        log_s1 = 0.1 + 0.9 * jnp.logaddexp(logstd, 0.0)
        log_s2 = 0.1 + 0.9 * jnp.logaddexp(1.0, 0.0)
        kl = (log_s2 - log_s1) + (jnp.exp(2 * log_s1) + mu ** 2) / (2 * jnp.exp(2 * log_s2)) - 0.5
        return kl.mean(axis=0).sum()

    u_ho = gcn(ufea, VU_adj, p["w1"], p["b1"])
    u_m = gcn(u_ho, UV_adj, p["w3_mean"], p["b3_mean"])
    u_s = gcn(u_ho, UV_adj, p["w3_logstd"], p["b3_logstd"])
    user_mean = jnp.concatenate([u_m, ufea], 1) @ p["wu_mean"] + p["bu_mean"]
    user_logstd = jnp.concatenate([u_s, ufea], 1) @ p["wu_logstd"] + p["bu_logstd"]

    i_ho = gcn(vfea, UV_adj, p["w2"], p["b2"])
    i_m = gcn(i_ho, VU_adj, p["w4_mean"], p["b4_mean"])
    i_s = gcn(i_ho, VU_adj, p["w4_logstd"], p["b4_logstd"])
    item_mean = jnp.concatenate([i_m, vfea], 1) @ p["wi_mean"] + p["bi_mean"]
    item_logstd = jnp.concatenate([i_s, vfea], 1) @ p["wi_logstd"] + p["bi_logstd"]

    kld_total = kld(user_mean, user_logstd) + kld(item_mean, item_logstd)
    return user_mean, item_mean, kld_total


if __name__ == "__main__":
    n_user, n_item = 64, 48
    feature_dim, hidden_dim = 32, 16
    leaky = 0.2

    key = jax.random.PRNGKey(0)
    ks = jax.random.split(key, 32)

    ufea = jax.random.normal(ks[0], (n_user, feature_dim), jnp.float32)
    vfea = jax.random.normal(ks[1], (n_item, feature_dim), jnp.float32)
    # Dense row-normalized-ish bipartite adjacencies (torch.spmm densified).
    UV_adj = (jax.random.uniform(ks[2], (n_user, n_item)) < 0.2).astype(jnp.float32) / n_item
    VU_adj = (jax.random.uniform(ks[3], (n_item, n_user)) < 0.2).astype(jnp.float32) / n_user

    def u(k, shape, s=0.1):
        return jax.random.uniform(k, shape, jnp.float32, -s, s)

    F, H = feature_dim, hidden_dim
    params = {
        "w1": u(ks[4], (F, H)), "b1": u(ks[5], (1, H)),
        "w2": u(ks[6], (F, H)), "b2": u(ks[7], (1, H)),
        "w3_mean": u(ks[8], (H, F)), "b3_mean": u(ks[9], (1, F)),
        "w3_logstd": u(ks[10], (H, F)), "b3_logstd": u(ks[11], (1, F)),
        "w4_mean": u(ks[12], (H, F)), "b4_mean": u(ks[13], (1, F)),
        "w4_logstd": u(ks[14], (H, F)), "b4_logstd": u(ks[15], (1, F)),
        # union linears stored pre-transposed [2F, F]
        "wu_mean": u(ks[16], (2 * F, F)), "bu_mean": u(ks[17], (1, F)),
        "wu_logstd": u(ks[18], (2 * F, F)), "bu_logstd": u(ks[19], (1, F)),
        "wi_mean": u(ks[20], (2 * F, F)), "bi_mean": u(ks[21], (1, F)),
        "wi_logstd": u(ks[22], (2 * F, F)), "bi_logstd": u(ks[23], (1, F)),
    }

    ref_user, ref_item, ref_kld = _reference(ufea, vfea, UV_adj, VU_adj, params, leaky)

    # f32 path: validates the tiling / padding / fusion math exactly.
    fwd_f32 = jax.jit(functools.partial(last_layer_single_forward, alpha=leaky,
                                        compute_dtype=jnp.float32, row_tile=256))
    user32, item32, kld32 = fwd_f32(ufea, vfea, UV_adj, VU_adj, params)
    jax.block_until_ready((user32, item32, kld32))
    assert user32.shape == (n_user, feature_dim) and item32.shape == (n_item, feature_dim)
    assert jnp.allclose(user32, ref_user, atol=1e-4, rtol=1e-4)
    assert jnp.allclose(item32, ref_item, atol=1e-4, rtol=1e-4)
    assert jnp.allclose(kld32, ref_kld, atol=1e-3, rtol=1e-3)

    # bf16 MXU-operand path (f32 accumulation): the production configuration.
    fwd_bf16 = jax.jit(functools.partial(last_layer_single_forward, alpha=leaky,
                                         compute_dtype=jnp.bfloat16, row_tile=256))
    user16, item16, kld16 = fwd_bf16(ufea, vfea, UV_adj, VU_adj, params)
    jax.block_until_ready((user16, item16, kld16))
    assert jnp.allclose(user16, ref_user, atol=5e-2, rtol=5e-2)
    assert jnp.allclose(item16, ref_item, atol=5e-2, rtol=5e-2)
    assert jnp.allclose(kld16, ref_kld, atol=5e-2, rtol=5e-2)

    print("KERNEL_OK")
</pallas_src>

<mosaic_0001>
module attributes {stable_mosaic.version = 11 : i64} {
  func.func @kernel(%arg0: i32, %arg1: i32, %arg2: memref<256x128xf32, #tpu.memory_space<vmem>>, %arg3: memref<128x128xf32, #tpu.memory_space<vmem>>, %arg4: memref<1x128xf32, #tpu.memory_space<vmem>>, %arg5: memref<256x128xf32, #tpu.memory_space<vmem>>, %arg6: memref<256x128xf32, #tpu.memory_space<vmem>>) attributes {dimension_semantics = [#tpu.dimension_semantics<parallel>, #tpu.dimension_semantics<arbitrary>], iteration_bounds = array<i64: 1, 1>, scalar_prefetch = 0 : i64, scratch_operands = 1 : i64, tpu.core_type = #tpu.core_type<tc>, window_params = [{transform_indices = @transform_0, window_bounds = array<i64: 256, 128>}, {transform_indices = @transform_1, window_bounds = array<i64: 128, 128>}, {pipeline_mode = #tpu.pipeline_mode<synchronous>, transform_indices = @transform_2, window_bounds = array<i64: 1, 128>}, {transform_indices = @transform_3, window_bounds = array<i64: 256, 128>}]} {
    %c0_i32 = arith.constant 0 : i32
    %0 = arith.cmpi eq, %arg1, %c0_i32 : i32
    %1 = arith.extui %0 : i1 to i32
    %c0_i32_0 = arith.constant 0 : i32
    %2 = arith.cmpi ne, %1, %c0_i32_0 : i32
    scf.if %2 {
      %cst_10 = arith.constant 0.000000e+00 : f32
      %12 = vector.broadcast %cst_10 : f32 to vector<256x128xf32>
      %c0_11 = arith.constant 0 : index
      %c0_12 = arith.constant 0 : index
      %13 = vector.load %arg6[%c0_11, %c0_12] : memref<256x128xf32, #tpu.memory_space<vmem>>, vector<256x128xf32>
      tpu.vector_store %arg6[%c0_11, %c0_12], %12 {strides = array<i32>} : memref<256x128xf32, #tpu.memory_space<vmem>>, vector<256x128xf32>,
    } else {
    }
    %c0 = arith.constant 0 : index
    %c0_1 = arith.constant 0 : index
    %3 = vector.load %arg6[%c0, %c0_1] : memref<256x128xf32, #tpu.memory_space<vmem>>, vector<256x128xf32>
    %c0_2 = arith.constant 0 : index
    %c0_3 = arith.constant 0 : index
    %4 = vector.load %arg2[%c0_2, %c0_3] : memref<256x128xf32, #tpu.memory_space<vmem>>, vector<256x128xf32>
    %c0_4 = arith.constant 0 : index
    %c0_5 = arith.constant 0 : index
    %5 = vector.load %arg3[%c0_4, %c0_5] : memref<128x128xf32, #tpu.memory_space<vmem>>, vector<128x128xf32>
    %cst = arith.constant dense<0.000000e+00> : vector<256x128xf32>
    %6 = tpu.matmul %4, %5, %cst {dimension_numbers = #tpu.dot_dimension_numbers<[1], [0], [0], [1], [0, 0, 1, 1], [], []>} : vector<256x128xf32>, vector<128x128xf32>, vector<256x128xf32> -> vector<256x128xf32>
    %7 = arith.addf %3, %6 : vector<256x128xf32>
    %c0_6 = arith.constant 0 : index
    %c0_7 = arith.constant 0 : index
    %8 = vector.load %arg6[%c0_6, %c0_7] : memref<256x128xf32, #tpu.memory_space<vmem>>, vector<256x128xf32>
    tpu.vector_store %arg6[%c0_6, %c0_7], %7 {strides = array<i32>} : memref<256x128xf32, #tpu.memory_space<vmem>>, vector<256x128xf32>,
    %c0_i32_8 = arith.constant 0 : i32
    %9 = arith.cmpi eq, %arg1, %c0_i32_8 : i32
    %10 = arith.extui %9 : i1 to i32
    %c0_i32_9 = arith.constant 0 : i32
    %11 = arith.cmpi ne, %10, %c0_i32_9 : i32
    scf.if %11 {
      %c0_10 = arith.constant 0 : index
      %c0_11 = arith.constant 0 : index
      %12 = vector.load %arg6[%c0_10, %c0_11] : memref<256x128xf32, #tpu.memory_space<vmem>>, vector<256x128xf32>
      %c0_12 = arith.constant 0 : index
      %c0_13 = arith.constant 0 : index
      %13 = vector.load %arg4[%c0_12, %c0_13] : memref<1x128xf32, #tpu.memory_space<vmem>>, vector<1x128xf32>
      %14 = vector.broadcast %13 : vector<1x128xf32> to vector<256x128xf32>
      %15 = arith.addf %12, %14 : vector<256x128xf32>
      %c0_14 = arith.constant 0 : index
      %c0_15 = arith.constant 0 : index
      %16 = vector.load %arg5[%c0_14, %c0_15] : memref<256x128xf32, #tpu.memory_space<vmem>>, vector<256x128xf32>
      tpu.vector_store %arg5[%c0_14, %c0_15], %15 {strides = array<i32>} : memref<256x128xf32, #tpu.memory_space<vmem>>, vector<256x128xf32>,
    } else {
    }
    return
  }
  func.func @transform_0(%arg0: i32, %arg1: i32) -> (i32, i32) {
    %c0_i32 = arith.constant 0 : i32
    return %arg0, %arg1 : i32, i32
  }
  func.func @transform_1(%arg0: i32, %arg1: i32) -> (i32, i32) {
    %c0_i32 = arith.constant 0 : i32
    %c0_i32_0 = arith.constant 0 : i32
    return %arg1, %c0_i32 : i32, i32
  }
  func.func @transform_2(%arg0: i32, %arg1: i32) -> (i32, i32) {
    %c0_i32 = arith.constant 0 : i32
    %c0_i32_0 = arith.constant 0 : i32
    %c0_i32_1 = arith.constant 0 : i32
    return %c0_i32, %c0_i32_0 : i32, i32
  }
  func.func @transform_3(%arg0: i32, %arg1: i32) -> (i32, i32) {
    %c0_i32 = arith.constant 0 : i32
    %c0_i32_0 = arith.constant 0 : i32
    return %arg0, %c0_i32 : i32, i32
  }
}

module attributes {stable_mosaic.version = 11 : i64} {
  func.func @kernel(%arg0: i32, %arg1: i32, %arg2: memref<256x256xf32, #tpu.memory_space<vmem>>, %arg3: memref<256x128xf32, #tpu.memory_space<vmem>>, %arg4: memref<1x128xf32, #tpu.memory_space<vmem>>, %arg5: memref<256x128xf32, #tpu.memory_space<vmem>>, %arg6: memref<256x128xf32, #tpu.memory_space<vmem>>) attributes {dimension_semantics = [#tpu.dimension_semantics<parallel>, #tpu.dimension_semantics<arbitrary>], iteration_bounds = array<i64: 1, 1>, scalar_prefetch = 0 : i64, scratch_operands = 1 : i64, tpu.core_type = #tpu.core_type<tc>, window_params = [{transform_indices = @transform_0, window_bounds = array<i64: 256, 256>}, {transform_indices = @transform_1, window_bounds = array<i64: 256, 128>}, {pipeline_mode = #tpu.pipeline_mode<synchronous>, transform_indices = @transform_2, window_bounds = array<i64: 1, 128>}, {transform_indices = @transform_3, window_bounds = array<i64: 256, 128>}]} {
    %c0_i32 = arith.constant 0 : i32
    %0 = arith.cmpi eq, %arg1, %c0_i32 : i32
    %1 = arith.extui %0 : i1 to i32
    %c0_i32_0 = arith.constant 0 : i32
    %2 = arith.cmpi ne, %1, %c0_i32_0 : i32
    scf.if %2 {
      %cst_10 = arith.constant 0.000000e+00 : f32
      %12 = vector.broadcast %cst_10 : f32 to vector<256x128xf32>
      %c0_11 = arith.constant 0 : index
      %c0_12 = arith.constant 0 : index
      %13 = vector.load %arg6[%c0_11, %c0_12] : memref<256x128xf32, #tpu.memory_space<vmem>>, vector<256x128xf32>
      tpu.vector_store %arg6[%c0_11, %c0_12], %12 {strides = array<i32>} : memref<256x128xf32, #tpu.memory_space<vmem>>, vector<256x128xf32>,
    } else {
    }
    %c0 = arith.constant 0 : index
    %c0_1 = arith.constant 0 : index
    %3 = vector.load %arg6[%c0, %c0_1] : memref<256x128xf32, #tpu.memory_space<vmem>>, vector<256x128xf32>
    %c0_2 = arith.constant 0 : index
    %c0_3 = arith.constant 0 : index
    %4 = vector.load %arg2[%c0_2, %c0_3] : memref<256x256xf32, #tpu.memory_space<vmem>>, vector<256x256xf32>
    %c0_4 = arith.constant 0 : index
    %c0_5 = arith.constant 0 : index
    %5 = vector.load %arg3[%c0_4, %c0_5] : memref<256x128xf32, #tpu.memory_space<vmem>>, vector<256x128xf32>
    %cst = arith.constant dense<0.000000e+00> : vector<256x128xf32>
    %6 = tpu.matmul %4, %5, %cst {dimension_numbers = #tpu.dot_dimension_numbers<[1], [0], [0], [1], [0, 0, 1, 1], [], []>} : vector<256x256xf32>, vector<256x128xf32>, vector<256x128xf32> -> vector<256x128xf32>
    %7 = arith.addf %3, %6 : vector<256x128xf32>
    %c0_6 = arith.constant 0 : index
    %c0_7 = arith.constant 0 : index
    %8 = vector.load %arg6[%c0_6, %c0_7] : memref<256x128xf32, #tpu.memory_space<vmem>>, vector<256x128xf32>
    tpu.vector_store %arg6[%c0_6, %c0_7], %7 {strides = array<i32>} : memref<256x128xf32, #tpu.memory_space<vmem>>, vector<256x128xf32>,
    %c0_i32_8 = arith.constant 0 : i32
    %9 = arith.cmpi eq, %arg1, %c0_i32_8 : i32
    %10 = arith.extui %9 : i1 to i32
    %c0_i32_9 = arith.constant 0 : i32
    %11 = arith.cmpi ne, %10, %c0_i32_9 : i32
    scf.if %11 {
      %c0_10 = arith.constant 0 : index
      %c0_11 = arith.constant 0 : index
      %12 = vector.load %arg6[%c0_10, %c0_11] : memref<256x128xf32, #tpu.memory_space<vmem>>, vector<256x128xf32>
      %c0_12 = arith.constant 0 : index
      %c0_13 = arith.constant 0 : index
      %13 = vector.load %arg4[%c0_12, %c0_13] : memref<1x128xf32, #tpu.memory_space<vmem>>, vector<1x128xf32>
      %14 = vector.broadcast %13 : vector<1x128xf32> to vector<256x128xf32>
      %15 = arith.addf %12, %14 : vector<256x128xf32>
      %cst_14 = arith.constant 0.000000e+00 : f32
      %16 = vector.broadcast %cst_14 : f32 to vector<256x128xf32>
      %17 = arith.cmpf ogt, %15, %16 : vector<256x128xf32>
      %cst_15 = arith.constant 2.000000e-01 : f32
      %18 = vector.broadcast %cst_15 : f32 to vector<256x128xf32>
      %19 = arith.mulf %18, %15 : vector<256x128xf32>
      %20 = arith.select %17, %15, %19 : vector<256x128xi1>, vector<256x128xf32>
      %c0_16 = arith.constant 0 : index
      %c0_17 = arith.constant 0 : index
      %21 = vector.load %arg5[%c0_16, %c0_17] : memref<256x128xf32, #tpu.memory_space<vmem>>, vector<256x128xf32>
      tpu.vector_store %arg5[%c0_16, %c0_17], %20 {strides = array<i32>} : memref<256x128xf32, #tpu.memory_space<vmem>>, vector<256x128xf32>,
    } else {
    }
    return
  }
  func.func @transform_0(%arg0: i32, %arg1: i32) -> (i32, i32) {
    %c0_i32 = arith.constant 0 : i32
    return %arg0, %arg1 : i32, i32
  }
  func.func @transform_1(%arg0: i32, %arg1: i32) -> (i32, i32) {
    %c0_i32 = arith.constant 0 : i32
    %c0_i32_0 = arith.constant 0 : i32
    return %arg1, %c0_i32 : i32, i32
  }
  func.func @transform_2(%arg0: i32, %arg1: i32) -> (i32, i32) {
    %c0_i32 = arith.constant 0 : i32
    %c0_i32_0 = arith.constant 0 : i32
    %c0_i32_1 = arith.constant 0 : i32
    return %c0_i32, %c0_i32_0 : i32, i32
  }
  func.func @transform_3(%arg0: i32, %arg1: i32) -> (i32, i32) {
    %c0_i32 = arith.constant 0 : i32
    %c0_i32_0 = arith.constant 0 : i32
    return %arg0, %c0_i32 : i32, i32
  }
}

module attributes {stable_mosaic.version = 11 : i64} {
  func.func @kernel(%arg0: i32, %arg1: i32, %arg2: memref<256x128xf32, #tpu.memory_space<vmem>>, %arg3: memref<128x256xf32, #tpu.memory_space<vmem>>, %arg4: memref<1x256xf32, #tpu.memory_space<vmem>>, %arg5: memref<256x256xf32, #tpu.memory_space<vmem>>, %arg6: memref<256x256xf32, #tpu.memory_space<vmem>>) attributes {dimension_semantics = [#tpu.dimension_semantics<parallel>, #tpu.dimension_semantics<arbitrary>], iteration_bounds = array<i64: 1, 1>, scalar_prefetch = 0 : i64, scratch_operands = 1 : i64, tpu.core_type = #tpu.core_type<tc>, window_params = [{transform_indices = @transform_0, window_bounds = array<i64: 256, 128>}, {transform_indices = @transform_1, window_bounds = array<i64: 128, 256>}, {pipeline_mode = #tpu.pipeline_mode<synchronous>, transform_indices = @transform_2, window_bounds = array<i64: 1, 256>}, {transform_indices = @transform_3, window_bounds = array<i64: 256, 256>}]} {
    %c0_i32 = arith.constant 0 : i32
    %0 = arith.cmpi eq, %arg1, %c0_i32 : i32
    %1 = arith.extui %0 : i1 to i32
    %c0_i32_0 = arith.constant 0 : i32
    %2 = arith.cmpi ne, %1, %c0_i32_0 : i32
    scf.if %2 {
      %cst_10 = arith.constant 0.000000e+00 : f32
      %12 = vector.broadcast %cst_10 : f32 to vector<256x256xf32>
      %c0_11 = arith.constant 0 : index
      %c0_12 = arith.constant 0 : index
      %13 = vector.load %arg6[%c0_11, %c0_12] : memref<256x256xf32, #tpu.memory_space<vmem>>, vector<256x256xf32>
      tpu.vector_store %arg6[%c0_11, %c0_12], %12 {strides = array<i32>} : memref<256x256xf32, #tpu.memory_space<vmem>>, vector<256x256xf32>,
    } else {
    }
    %c0 = arith.constant 0 : index
    %c0_1 = arith.constant 0 : index
    %3 = vector.load %arg6[%c0, %c0_1] : memref<256x256xf32, #tpu.memory_space<vmem>>, vector<256x256xf32>
    %c0_2 = arith.constant 0 : index
    %c0_3 = arith.constant 0 : index
    %4 = vector.load %arg2[%c0_2, %c0_3] : memref<256x128xf32, #tpu.memory_space<vmem>>, vector<256x128xf32>
    %c0_4 = arith.constant 0 : index
    %c0_5 = arith.constant 0 : index
    %5 = vector.load %arg3[%c0_4, %c0_5] : memref<128x256xf32, #tpu.memory_space<vmem>>, vector<128x256xf32>
    %cst = arith.constant dense<0.000000e+00> : vector<256x256xf32>
    %6 = tpu.matmul %4, %5, %cst {dimension_numbers = #tpu.dot_dimension_numbers<[1], [0], [0], [1], [0, 0, 1, 1], [], []>} : vector<256x128xf32>, vector<128x256xf32>, vector<256x256xf32> -> vector<256x256xf32>
    %7 = arith.addf %3, %6 : vector<256x256xf32>
    %c0_6 = arith.constant 0 : index
    %c0_7 = arith.constant 0 : index
    %8 = vector.load %arg6[%c0_6, %c0_7] : memref<256x256xf32, #tpu.memory_space<vmem>>, vector<256x256xf32>
    tpu.vector_store %arg6[%c0_6, %c0_7], %7 {strides = array<i32>} : memref<256x256xf32, #tpu.memory_space<vmem>>, vector<256x256xf32>,
    %c0_i32_8 = arith.constant 0 : i32
    %9 = arith.cmpi eq, %arg1, %c0_i32_8 : i32
    %10 = arith.extui %9 : i1 to i32
    %c0_i32_9 = arith.constant 0 : i32
    %11 = arith.cmpi ne, %10, %c0_i32_9 : i32
    scf.if %11 {
      %c0_10 = arith.constant 0 : index
      %c0_11 = arith.constant 0 : index
      %12 = vector.load %arg6[%c0_10, %c0_11] : memref<256x256xf32, #tpu.memory_space<vmem>>, vector<256x256xf32>
      %c0_12 = arith.constant 0 : index
      %c0_13 = arith.constant 0 : index
      %13 = vector.load %arg4[%c0_12, %c0_13] : memref<1x256xf32, #tpu.memory_space<vmem>>, vector<1x256xf32>
      %14 = vector.broadcast %13 : vector<1x256xf32> to vector<256x256xf32>
      %15 = arith.addf %12, %14 : vector<256x256xf32>
      %c0_14 = arith.constant 0 : index
      %c0_15 = arith.constant 0 : index
      %16 = vector.load %arg5[%c0_14, %c0_15] : memref<256x256xf32, #tpu.memory_space<vmem>>, vector<256x256xf32>
      tpu.vector_store %arg5[%c0_14, %c0_15], %15 {strides = array<i32>} : memref<256x256xf32, #tpu.memory_space<vmem>>, vector<256x256xf32>,
    } else {
    }
    return
  }
  func.func @transform_0(%arg0: i32, %arg1: i32) -> (i32, i32) {
    %c0_i32 = arith.constant 0 : i32
    return %arg0, %arg1 : i32, i32
  }
  func.func @transform_1(%arg0: i32, %arg1: i32) -> (i32, i32) {
    %c0_i32 = arith.constant 0 : i32
    %c0_i32_0 = arith.constant 0 : i32
    return %arg1, %c0_i32 : i32, i32
  }
  func.func @transform_2(%arg0: i32, %arg1: i32) -> (i32, i32) {
    %c0_i32 = arith.constant 0 : i32
    %c0_i32_0 = arith.constant 0 : i32
    %c0_i32_1 = arith.constant 0 : i32
    return %c0_i32, %c0_i32_0 : i32, i32
  }
  func.func @transform_3(%arg0: i32, %arg1: i32) -> (i32, i32) {
    %c0_i32 = arith.constant 0 : i32
    %c0_i32_0 = arith.constant 0 : i32
    return %arg0, %c0_i32 : i32, i32
  }
}

module attributes {stable_mosaic.version = 11 : i64} {
  func.func @kernel(%arg0: i32, %arg1: i32, %arg2: memref<256x256xf32, #tpu.memory_space<vmem>>, %arg3: memref<256x256xf32, #tpu.memory_space<vmem>>, %arg4: memref<1x256xf32, #tpu.memory_space<vmem>>, %arg5: memref<256x256xf32, #tpu.memory_space<vmem>>, %arg6: memref<256x256xf32, #tpu.memory_space<vmem>>) attributes {dimension_semantics = [#tpu.dimension_semantics<parallel>, #tpu.dimension_semantics<arbitrary>], iteration_bounds = array<i64: 1, 1>, scalar_prefetch = 0 : i64, scratch_operands = 1 : i64, tpu.core_type = #tpu.core_type<tc>, window_params = [{transform_indices = @transform_0, window_bounds = array<i64: 256, 256>}, {transform_indices = @transform_1, window_bounds = array<i64: 256, 256>}, {pipeline_mode = #tpu.pipeline_mode<synchronous>, transform_indices = @transform_2, window_bounds = array<i64: 1, 256>}, {transform_indices = @transform_3, window_bounds = array<i64: 256, 256>}]} {
    %c0_i32 = arith.constant 0 : i32
    %0 = arith.cmpi eq, %arg1, %c0_i32 : i32
    %1 = arith.extui %0 : i1 to i32
    %c0_i32_0 = arith.constant 0 : i32
    %2 = arith.cmpi ne, %1, %c0_i32_0 : i32
    scf.if %2 {
      %cst_10 = arith.constant 0.000000e+00 : f32
      %12 = vector.broadcast %cst_10 : f32 to vector<256x256xf32>
      %c0_11 = arith.constant 0 : index
      %c0_12 = arith.constant 0 : index
      %13 = vector.load %arg6[%c0_11, %c0_12] : memref<256x256xf32, #tpu.memory_space<vmem>>, vector<256x256xf32>
      tpu.vector_store %arg6[%c0_11, %c0_12], %12 {strides = array<i32>} : memref<256x256xf32, #tpu.memory_space<vmem>>, vector<256x256xf32>,
    } else {
    }
    %c0 = arith.constant 0 : index
    %c0_1 = arith.constant 0 : index
    %3 = vector.load %arg6[%c0, %c0_1] : memref<256x256xf32, #tpu.memory_space<vmem>>, vector<256x256xf32>
    %c0_2 = arith.constant 0 : index
    %c0_3 = arith.constant 0 : index
    %4 = vector.load %arg2[%c0_2, %c0_3] : memref<256x256xf32, #tpu.memory_space<vmem>>, vector<256x256xf32>
    %c0_4 = arith.constant 0 : index
    %c0_5 = arith.constant 0 : index
    %5 = vector.load %arg3[%c0_4, %c0_5] : memref<256x256xf32, #tpu.memory_space<vmem>>, vector<256x256xf32>
    %cst = arith.constant dense<0.000000e+00> : vector<256x256xf32>
    %6 = tpu.matmul %4, %5, %cst {dimension_numbers = #tpu.dot_dimension_numbers<[1], [0], [0], [1], [0, 0, 1, 1], [], []>} : vector<256x256xf32>, vector<256x256xf32>, vector<256x256xf32> -> vector<256x256xf32>
    %7 = arith.addf %3, %6 : vector<256x256xf32>
    %c0_6 = arith.constant 0 : index
    %c0_7 = arith.constant 0 : index
    %8 = vector.load %arg6[%c0_6, %c0_7] : memref<256x256xf32, #tpu.memory_space<vmem>>, vector<256x256xf32>
    tpu.vector_store %arg6[%c0_6, %c0_7], %7 {strides = array<i32>} : memref<256x256xf32, #tpu.memory_space<vmem>>, vector<256x256xf32>,
    %c0_i32_8 = arith.constant 0 : i32
    %9 = arith.cmpi eq, %arg1, %c0_i32_8 : i32
    %10 = arith.extui %9 : i1 to i32
    %c0_i32_9 = arith.constant 0 : i32
    %11 = arith.cmpi ne, %10, %c0_i32_9 : i32
    scf.if %11 {
      %c0_10 = arith.constant 0 : index
      %c0_11 = arith.constant 0 : index
      %12 = vector.load %arg6[%c0_10, %c0_11] : memref<256x256xf32, #tpu.memory_space<vmem>>, vector<256x256xf32>
      %c0_12 = arith.constant 0 : index
      %c0_13 = arith.constant 0 : index
      %13 = vector.load %arg4[%c0_12, %c0_13] : memref<1x256xf32, #tpu.memory_space<vmem>>, vector<1x256xf32>
      %14 = vector.broadcast %13 : vector<1x256xf32> to vector<256x256xf32>
      %15 = arith.addf %12, %14 : vector<256x256xf32>
      %cst_14 = arith.constant 0.000000e+00 : f32
      %16 = vector.broadcast %cst_14 : f32 to vector<256x256xf32>
      %17 = arith.cmpf ogt, %15, %16 : vector<256x256xf32>
      %cst_15 = arith.constant 2.000000e-01 : f32
      %18 = vector.broadcast %cst_15 : f32 to vector<256x256xf32>
      %19 = arith.mulf %18, %15 : vector<256x256xf32>
      %20 = arith.select %17, %15, %19 : vector<256x256xi1>, vector<256x256xf32>
      %c0_16 = arith.constant 0 : index
      %c0_17 = arith.constant 0 : index
      %21 = vector.load %arg5[%c0_16, %c0_17] : memref<256x256xf32, #tpu.memory_space<vmem>>, vector<256x256xf32>
      tpu.vector_store %arg5[%c0_16, %c0_17], %20 {strides = array<i32>} : memref<256x256xf32, #tpu.memory_space<vmem>>, vector<256x256xf32>,
    } else {
    }
    return
  }
  func.func @transform_0(%arg0: i32, %arg1: i32) -> (i32, i32) {
    %c0_i32 = arith.constant 0 : i32
    return %arg0, %arg1 : i32, i32
  }
  func.func @transform_1(%arg0: i32, %arg1: i32) -> (i32, i32) {
    %c0_i32 = arith.constant 0 : i32
    %c0_i32_0 = arith.constant 0 : i32
    return %arg1, %c0_i32 : i32, i32
  }
  func.func @transform_2(%arg0: i32, %arg1: i32) -> (i32, i32) {
    %c0_i32 = arith.constant 0 : i32
    %c0_i32_0 = arith.constant 0 : i32
    %c0_i32_1 = arith.constant 0 : i32
    return %c0_i32, %c0_i32_0 : i32, i32
  }
  func.func @transform_3(%arg0: i32, %arg1: i32) -> (i32, i32) {
    %c0_i32 = arith.constant 0 : i32
    %c0_i32_0 = arith.constant 0 : i32
    return %arg0, %c0_i32 : i32, i32
  }
}

module attributes {stable_mosaic.version = 11 : i64} {
  func.func @kernel(%arg0: i32, %arg1: memref<256x128xf32, #tpu.memory_space<vmem>>, %arg2: memref<256x128xf32, #tpu.memory_space<vmem>>, %arg3: memref<256x128xf32, #tpu.memory_space<vmem>>, %arg4: memref<128x128xf32, #tpu.memory_space<vmem>>, %arg5: memref<128x128xf32, #tpu.memory_space<vmem>>, %arg6: memref<1x128xf32, #tpu.memory_space<vmem>>, %arg7: memref<128x128xf32, #tpu.memory_space<vmem>>, %arg8: memref<128x128xf32, #tpu.memory_space<vmem>>, %arg9: memref<1x128xf32, #tpu.memory_space<vmem>>, %arg10: memref<256x128xf32, #tpu.memory_space<vmem>>, %arg11: memref<256x128xf32, #tpu.memory_space<vmem>>) attributes {dimension_semantics = [#tpu.dimension_semantics<parallel>], iteration_bounds = array<i64: 1>, scalar_prefetch = 0 : i64, scratch_operands = 0 : i64, tpu.core_type = #tpu.core_type<tc>, window_params = [{transform_indices = @transform_0, window_bounds = array<i64: 256, 128>}, {transform_indices = @transform_1, window_bounds = array<i64: 256, 128>}, {transform_indices = @transform_2, window_bounds = array<i64: 256, 128>}, {pipeline_mode = #tpu.pipeline_mode<synchronous>, transform_indices = @transform_3, window_bounds = array<i64: 128, 128>}, {pipeline_mode = #tpu.pipeline_mode<synchronous>, transform_indices = @transform_4, window_bounds = array<i64: 128, 128>}, {pipeline_mode = #tpu.pipeline_mode<synchronous>, transform_indices = @transform_5, window_bounds = array<i64: 1, 128>}, {pipeline_mode = #tpu.pipeline_mode<synchronous>, transform_indices = @transform_6, window_bounds = array<i64: 128, 128>}, {pipeline_mode = #tpu.pipeline_mode<synchronous>, transform_indices = @transform_7, window_bounds = array<i64: 128, 128>}, {pipeline_mode = #tpu.pipeline_mode<synchronous>, transform_indices = @transform_8, window_bounds = array<i64: 1, 128>}, {transform_indices = @transform_9, window_bounds = array<i64: 256, 128>}, {transform_indices = @transform_10, window_bounds = array<i64: 256, 128>}]} {
    %c0 = arith.constant 0 : index
    %c0_0 = arith.constant 0 : index
    %0 = vector.load %arg3[%c0, %c0_0] : memref<256x128xf32, #tpu.memory_space<vmem>>, vector<256x128xf32>
    %c0_1 = arith.constant 0 : index
    %c0_2 = arith.constant 0 : index
    %1 = vector.load %arg1[%c0_1, %c0_2] : memref<256x128xf32, #tpu.memory_space<vmem>>, vector<256x128xf32>
    %c0_3 = arith.constant 0 : index
    %c0_4 = arith.constant 0 : index
    %2 = vector.load %arg4[%c0_3, %c0_4] : memref<128x128xf32, #tpu.memory_space<vmem>>, vector<128x128xf32>
    %cst = arith.constant dense<0.000000e+00> : vector<256x128xf32>
    %3 = tpu.matmul %1, %2, %cst {dimension_numbers = #tpu.dot_dimension_numbers<[1], [0], [0], [1], [0, 0, 1, 1], [], []>} : vector<256x128xf32>, vector<128x128xf32>, vector<256x128xf32> -> vector<256x128xf32>
    %c0_5 = arith.constant 0 : index
    %c0_6 = arith.constant 0 : index
    %4 = vector.load %arg5[%c0_5, %c0_6] : memref<128x128xf32, #tpu.memory_space<vmem>>, vector<128x128xf32>
    %cst_7 = arith.constant dense<0.000000e+00> : vector<256x128xf32>
    %5 = tpu.matmul %0, %4, %cst_7 {dimension_numbers = #tpu.dot_dimension_numbers<[1], [0], [0], [1], [0, 0, 1, 1], [], []>} : vector<256x128xf32>, vector<128x128xf32>, vector<256x128xf32> -> vector<256x128xf32>
    %6 = arith.addf %3, %5 : vector<256x128xf32>
    %c0_8 = arith.constant 0 : index
    %c0_9 = arith.constant 0 : index
    %7 = vector.load %arg6[%c0_8, %c0_9] : memref<1x128xf32, #tpu.memory_space<vmem>>, vector<1x128xf32>
    %8 = vector.broadcast %7 : vector<1x128xf32> to vector<256x128xf32>
    %9 = arith.addf %6, %8 : vector<256x128xf32>
    %c0_10 = arith.constant 0 : index
    %c0_11 = arith.constant 0 : index
    %10 = vector.load %arg2[%c0_10, %c0_11] : memref<256x128xf32, #tpu.memory_space<vmem>>, vector<256x128xf32>
    %c0_12 = arith.constant 0 : index
    %c0_13 = arith.constant 0 : index
    %11 = vector.load %arg7[%c0_12, %c0_13] : memref<128x128xf32, #tpu.memory_space<vmem>>, vector<128x128xf32>
    %cst_14 = arith.constant dense<0.000000e+00> : vector<256x128xf32>
    %12 = tpu.matmul %10, %11, %cst_14 {dimension_numbers = #tpu.dot_dimension_numbers<[1], [0], [0], [1], [0, 0, 1, 1], [], []>} : vector<256x128xf32>, vector<128x128xf32>, vector<256x128xf32> -> vector<256x128xf32>
    %c0_15 = arith.constant 0 : index
    %c0_16 = arith.constant 0 : index
    %13 = vector.load %arg8[%c0_15, %c0_16] : memref<128x128xf32, #tpu.memory_space<vmem>>, vector<128x128xf32>
    %cst_17 = arith.constant dense<0.000000e+00> : vector<256x128xf32>
    %14 = tpu.matmul %0, %13, %cst_17 {dimension_numbers = #tpu.dot_dimension_numbers<[1], [0], [0], [1], [0, 0, 1, 1], [], []>} : vector<256x128xf32>, vector<128x128xf32>, vector<256x128xf32> -> vector<256x128xf32>
    %15 = arith.addf %12, %14 : vector<256x128xf32>
    %c0_18 = arith.constant 0 : index
    %c0_19 = arith.constant 0 : index
    %16 = vector.load %arg9[%c0_18, %c0_19] : memref<1x128xf32, #tpu.memory_space<vmem>>, vector<1x128xf32>
    %17 = vector.broadcast %16 : vector<1x128xf32> to vector<256x128xf32>
    %18 = arith.addf %15, %17 : vector<256x128xf32>
    %c0_20 = arith.constant 0 : index
    %c0_21 = arith.constant 0 : index
    %19 = vector.load %arg10[%c0_20, %c0_21] : memref<256x128xf32, #tpu.memory_space<vmem>>, vector<256x128xf32>
    tpu.vector_store %arg10[%c0_20, %c0_21], %9 {strides = array<i32>} : memref<256x128xf32, #tpu.memory_space<vmem>>, vector<256x128xf32>,
    %cst_22 = arith.constant 0.000000e+00 : f32
    %20 = vector.broadcast %cst_22 : f32 to vector<256x128xf32>
    %21 = arith.maximumf %18, %20 : vector<256x128xf32>
    %22 = math.absf %18 : vector<256x128xf32>
    %cst_23 = arith.constant 0.000000e+00 : f32
    %23 = vector.broadcast %cst_23 : f32 to vector<256x128xf32>
    %24 = arith.subf %23, %22 : vector<256x128xf32>
    %25 = math.exp %24 : vector<256x128xf32>
    %cst_24 = arith.constant 1.000000e+00 : f32
    %26 = vector.broadcast %cst_24 : f32 to vector<256x128xf32>
    %27 = arith.addf %26, %25 : vector<256x128xf32>
    %28 = math.log %27 : vector<256x128xf32>
    %29 = arith.addf %21, %28 : vector<256x128xf32>
    %cst_25 = arith.constant 0.899999976 : f32
    %30 = vector.broadcast %cst_25 : f32 to vector<256x128xf32>
    %31 = arith.mulf %30, %29 : vector<256x128xf32>
    %cst_26 = arith.constant 1.000000e-01 : f32
    %32 = vector.broadcast %cst_26 : f32 to vector<256x128xf32>
    %33 = arith.addf %32, %31 : vector<256x128xf32>
    %cst_27 = arith.constant 1.28193557 : f32
    %34 = vector.broadcast %cst_27 : f32 to vector<256x128xf32>
    %35 = arith.subf %34, %33 : vector<256x128xf32>
    %cst_28 = arith.constant 2.000000e+00 : f32
    %36 = vector.broadcast %cst_28 : f32 to vector<256x128xf32>
    %37 = arith.mulf %36, %33 : vector<256x128xf32>
    %38 = math.exp %37 : vector<256x128xf32>
    %39 = arith.mulf %9, %9 : vector<256x128xf32>
    %40 = arith.addf %38, %39 : vector<256x128xf32>
    %cst_29 = arith.constant 0.0385030359 : f32
    %41 = vector.broadcast %cst_29 : f32 to vector<256x128xf32>
    %42 = arith.mulf %40, %41 : vector<256x128xf32>
    %43 = arith.addf %35, %42 : vector<256x128xf32>
    %cst_30 = arith.constant 5.000000e-01 : f32
    %44 = vector.broadcast %cst_30 : f32 to vector<256x128xf32>
    %45 = arith.subf %43, %44 : vector<256x128xf32>
    %c256_i32 = arith.constant 256 : i32
    %46 = arith.muli %arg0, %c256_i32 : i32
    %47 = tpu.iota {dimensions = array<i32: 0>} : vector<256x128xi32>
    %48 = vector.broadcast %46 : i32 to vector<256x128xi32>
    %49 = arith.addi %48, %47 : vector<256x128xi32>
    %50 = tpu.iota {dimensions = array<i32: 1>} : vector<256x128xi32>
    %c48_i32 = arith.constant 48 : i32
    %51 = vector.broadcast %c48_i32 : i32 to vector<256x128xi32>
    %52 = arith.cmpi slt, %49, %51 : vector<256x128xi32>
    %c32_i32 = arith.constant 32 : i32
    %53 = vector.broadcast %c32_i32 : i32 to vector<256x128xi32>
    %54 = arith.cmpi slt, %50, %53 : vector<256x128xi32>
    %55 = arith.andi %52, %54 : vector<256x128xi1>
    %cst_31 = arith.constant 0.000000e+00 : f32
    %56 = vector.broadcast %cst_31 : f32 to vector<256x128xf32>
    %57 = arith.select %55, %45, %56 : vector<256x128xi1>, vector<256x128xf32>
    %c0_32 = arith.constant 0 : index
    %c0_33 = arith.constant 0 : index
    %58 = vector.load %arg11[%c0_32, %c0_33] : memref<256x128xf32, #tpu.memory_space<vmem>>, vector<256x128xf32>
    tpu.vector_store %arg11[%c0_32, %c0_33], %57 {strides = array<i32>} : memref<256x128xf32, #tpu.memory_space<vmem>>, vector<256x128xf32>,
    return
  }
  func.func @transform_0(%arg0: i32) -> (i32, i32) {
    %c0_i32 = arith.constant 0 : i32
    %c0_i32_0 = arith.constant 0 : i32
    return %arg0, %c0_i32 : i32, i32
  }
  func.func @transform_1(%arg0: i32) -> (i32, i32) {
    %c0_i32 = arith.constant 0 : i32
    %c0_i32_0 = arith.constant 0 : i32
    return %arg0, %c0_i32 : i32, i32
  }
  func.func @transform_2(%arg0: i32) -> (i32, i32) {
    %c0_i32 = arith.constant 0 : i32
    %c0_i32_0 = arith.constant 0 : i32
    return %arg0, %c0_i32 : i32, i32
  }
  func.func @transform_3(%arg0: i32) -> (i32, i32) {
    %c0_i32 = arith.constant 0 : i32
    %c0_i32_0 = arith.constant 0 : i32
    %c0_i32_1 = arith.constant 0 : i32
    return %c0_i32, %c0_i32_0 : i32, i32
  }
  func.func @transform_4(%arg0: i32) -> (i32, i32) {
    %c0_i32 = arith.constant 0 : i32
    %c0_i32_0 = arith.constant 0 : i32
    %c0_i32_1 = arith.constant 0 : i32
    return %c0_i32, %c0_i32_0 : i32, i32
  }
  func.func @transform_5(%arg0: i32) -> (i32, i32) {
    %c0_i32 = arith.constant 0 : i32
    %c0_i32_0 = arith.constant 0 : i32
    %c0_i32_1 = arith.constant 0 : i32
    return %c0_i32, %c0_i32_0 : i32, i32
  }
  func.func @transform_6(%arg0: i32) -> (i32, i32) {
    %c0_i32 = arith.constant 0 : i32
    %c0_i32_0 = arith.constant 0 : i32
    %c0_i32_1 = arith.constant 0 : i32
    return %c0_i32, %c0_i32_0 : i32, i32
  }
  func.func @transform_7(%arg0: i32) -> (i32, i32) {
    %c0_i32 = arith.constant 0 : i32
    %c0_i32_0 = arith.constant 0 : i32
    %c0_i32_1 = arith.constant 0 : i32
    return %c0_i32, %c0_i32_0 : i32, i32
  }
  func.func @transform_8(%arg0: i32) -> (i32, i32) {
    %c0_i32 = arith.constant 0 : i32
    %c0_i32_0 = arith.constant 0 : i32
    %c0_i32_1 = arith.constant 0 : i32
    return %c0_i32, %c0_i32_0 : i32, i32
  }
  func.func @transform_9(%arg0: i32) -> (i32, i32) {
    %c0_i32 = arith.constant 0 : i32
    %c0_i32_0 = arith.constant 0 : i32
    return %arg0, %c0_i32 : i32, i32
  }
  func.func @transform_10(%arg0: i32) -> (i32, i32) {
    %c0_i32 = arith.constant 0 : i32
    %c0_i32_0 = arith.constant 0 : i32
    return %arg0, %c0_i32 : i32, i32
  }
}

module attributes {stable_mosaic.version = 11 : i64} {
  func.func @kernel(%arg0: i32, %arg1: memref<256x128xf32, #tpu.memory_space<vmem>>, %arg2: memref<256x128xf32, #tpu.memory_space<vmem>>, %arg3: memref<256x128xf32, #tpu.memory_space<vmem>>, %arg4: memref<128x128xf32, #tpu.memory_space<vmem>>, %arg5: memref<128x128xf32, #tpu.memory_space<vmem>>, %arg6: memref<1x128xf32, #tpu.memory_space<vmem>>, %arg7: memref<128x128xf32, #tpu.memory_space<vmem>>, %arg8: memref<128x128xf32, #tpu.memory_space<vmem>>, %arg9: memref<1x128xf32, #tpu.memory_space<vmem>>, %arg10: memref<256x128xf32, #tpu.memory_space<vmem>>, %arg11: memref<256x128xf32, #tpu.memory_space<vmem>>) attributes {dimension_semantics = [#tpu.dimension_semantics<parallel>], iteration_bounds = array<i64: 1>, scalar_prefetch = 0 : i64, scratch_operands = 0 : i64, tpu.core_type = #tpu.core_type<tc>, window_params = [{transform_indices = @transform_0, window_bounds = array<i64: 256, 128>}, {transform_indices = @transform_1, window_bounds = array<i64: 256, 128>}, {transform_indices = @transform_2, window_bounds = array<i64: 256, 128>}, {pipeline_mode = #tpu.pipeline_mode<synchronous>, transform_indices = @transform_3, window_bounds = array<i64: 128, 128>}, {pipeline_mode = #tpu.pipeline_mode<synchronous>, transform_indices = @transform_4, window_bounds = array<i64: 128, 128>}, {pipeline_mode = #tpu.pipeline_mode<synchronous>, transform_indices = @transform_5, window_bounds = array<i64: 1, 128>}, {pipeline_mode = #tpu.pipeline_mode<synchronous>, transform_indices = @transform_6, window_bounds = array<i64: 128, 128>}, {pipeline_mode = #tpu.pipeline_mode<synchronous>, transform_indices = @transform_7, window_bounds = array<i64: 128, 128>}, {pipeline_mode = #tpu.pipeline_mode<synchronous>, transform_indices = @transform_8, window_bounds = array<i64: 1, 128>}, {transform_indices = @transform_9, window_bounds = array<i64: 256, 128>}, {transform_indices = @transform_10, window_bounds = array<i64: 256, 128>}]} {
    %c0 = arith.constant 0 : index
    %c0_0 = arith.constant 0 : index
    %0 = vector.load %arg3[%c0, %c0_0] : memref<256x128xf32, #tpu.memory_space<vmem>>, vector<256x128xf32>
    %c0_1 = arith.constant 0 : index
    %c0_2 = arith.constant 0 : index
    %1 = vector.load %arg1[%c0_1, %c0_2] : memref<256x128xf32, #tpu.memory_space<vmem>>, vector<256x128xf32>
    %c0_3 = arith.constant 0 : index
    %c0_4 = arith.constant 0 : index
    %2 = vector.load %arg4[%c0_3, %c0_4] : memref<128x128xf32, #tpu.memory_space<vmem>>, vector<128x128xf32>
    %cst = arith.constant dense<0.000000e+00> : vector<256x128xf32>
    %3 = tpu.matmul %1, %2, %cst {dimension_numbers = #tpu.dot_dimension_numbers<[1], [0], [0], [1], [0, 0, 1, 1], [], []>} : vector<256x128xf32>, vector<128x128xf32>, vector<256x128xf32> -> vector<256x128xf32>
    %c0_5 = arith.constant 0 : index
    %c0_6 = arith.constant 0 : index
    %4 = vector.load %arg5[%c0_5, %c0_6] : memref<128x128xf32, #tpu.memory_space<vmem>>, vector<128x128xf32>
    %cst_7 = arith.constant dense<0.000000e+00> : vector<256x128xf32>
    %5 = tpu.matmul %0, %4, %cst_7 {dimension_numbers = #tpu.dot_dimension_numbers<[1], [0], [0], [1], [0, 0, 1, 1], [], []>} : vector<256x128xf32>, vector<128x128xf32>, vector<256x128xf32> -> vector<256x128xf32>
    %6 = arith.addf %3, %5 : vector<256x128xf32>
    %c0_8 = arith.constant 0 : index
    %c0_9 = arith.constant 0 : index
    %7 = vector.load %arg6[%c0_8, %c0_9] : memref<1x128xf32, #tpu.memory_space<vmem>>, vector<1x128xf32>
    %8 = vector.broadcast %7 : vector<1x128xf32> to vector<256x128xf32>
    %9 = arith.addf %6, %8 : vector<256x128xf32>
    %c0_10 = arith.constant 0 : index
    %c0_11 = arith.constant 0 : index
    %10 = vector.load %arg2[%c0_10, %c0_11] : memref<256x128xf32, #tpu.memory_space<vmem>>, vector<256x128xf32>
    %c0_12 = arith.constant 0 : index
    %c0_13 = arith.constant 0 : index
    %11 = vector.load %arg7[%c0_12, %c0_13] : memref<128x128xf32, #tpu.memory_space<vmem>>, vector<128x128xf32>
    %cst_14 = arith.constant dense<0.000000e+00> : vector<256x128xf32>
    %12 = tpu.matmul %10, %11, %cst_14 {dimension_numbers = #tpu.dot_dimension_numbers<[1], [0], [0], [1], [0, 0, 1, 1], [], []>} : vector<256x128xf32>, vector<128x128xf32>, vector<256x128xf32> -> vector<256x128xf32>
    %c0_15 = arith.constant 0 : index
    %c0_16 = arith.constant 0 : index
    %13 = vector.load %arg8[%c0_15, %c0_16] : memref<128x128xf32, #tpu.memory_space<vmem>>, vector<128x128xf32>
    %cst_17 = arith.constant dense<0.000000e+00> : vector<256x128xf32>
    %14 = tpu.matmul %0, %13, %cst_17 {dimension_numbers = #tpu.dot_dimension_numbers<[1], [0], [0], [1], [0, 0, 1, 1], [], []>} : vector<256x128xf32>, vector<128x128xf32>, vector<256x128xf32> -> vector<256x128xf32>
    %15 = arith.addf %12, %14 : vector<256x128xf32>
    %c0_18 = arith.constant 0 : index
    %c0_19 = arith.constant 0 : index
    %16 = vector.load %arg9[%c0_18, %c0_19] : memref<1x128xf32, #tpu.memory_space<vmem>>, vector<1x128xf32>
    %17 = vector.broadcast %16 : vector<1x128xf32> to vector<256x128xf32>
    %18 = arith.addf %15, %17 : vector<256x128xf32>
    %c0_20 = arith.constant 0 : index
    %c0_21 = arith.constant 0 : index
    %19 = vector.load %arg10[%c0_20, %c0_21] : memref<256x128xf32, #tpu.memory_space<vmem>>, vector<256x128xf32>
    tpu.vector_store %arg10[%c0_20, %c0_21], %9 {strides = array<i32>} : memref<256x128xf32, #tpu.memory_space<vmem>>, vector<256x128xf32>,
    %cst_22 = arith.constant 0.000000e+00 : f32
    %20 = vector.broadcast %cst_22 : f32 to vector<256x128xf32>
    %21 = arith.maximumf %18, %20 : vector<256x128xf32>
    %22 = math.absf %18 : vector<256x128xf32>
    %cst_23 = arith.constant 0.000000e+00 : f32
    %23 = vector.broadcast %cst_23 : f32 to vector<256x128xf32>
    %24 = arith.subf %23, %22 : vector<256x128xf32>
    %25 = math.exp %24 : vector<256x128xf32>
    %cst_24 = arith.constant 1.000000e+00 : f32
    %26 = vector.broadcast %cst_24 : f32 to vector<256x128xf32>
    %27 = arith.addf %26, %25 : vector<256x128xf32>
    %28 = math.log %27 : vector<256x128xf32>
    %29 = arith.addf %21, %28 : vector<256x128xf32>
    %cst_25 = arith.constant 0.899999976 : f32
    %30 = vector.broadcast %cst_25 : f32 to vector<256x128xf32>
    %31 = arith.mulf %30, %29 : vector<256x128xf32>
    %cst_26 = arith.constant 1.000000e-01 : f32
    %32 = vector.broadcast %cst_26 : f32 to vector<256x128xf32>
    %33 = arith.addf %32, %31 : vector<256x128xf32>
    %cst_27 = arith.constant 1.28193557 : f32
    %34 = vector.broadcast %cst_27 : f32 to vector<256x128xf32>
    %35 = arith.subf %34, %33 : vector<256x128xf32>
    %cst_28 = arith.constant 2.000000e+00 : f32
    %36 = vector.broadcast %cst_28 : f32 to vector<256x128xf32>
    %37 = arith.mulf %36, %33 : vector<256x128xf32>
    %38 = math.exp %37 : vector<256x128xf32>
    %39 = arith.mulf %9, %9 : vector<256x128xf32>
    %40 = arith.addf %38, %39 : vector<256x128xf32>
    %cst_29 = arith.constant 0.0385030359 : f32
    %41 = vector.broadcast %cst_29 : f32 to vector<256x128xf32>
    %42 = arith.mulf %40, %41 : vector<256x128xf32>
    %43 = arith.addf %35, %42 : vector<256x128xf32>
    %cst_30 = arith.constant 5.000000e-01 : f32
    %44 = vector.broadcast %cst_30 : f32 to vector<256x128xf32>
    %45 = arith.subf %43, %44 : vector<256x128xf32>
    %c256_i32 = arith.constant 256 : i32
    %46 = arith.muli %arg0, %c256_i32 : i32
    %47 = tpu.iota {dimensions = array<i32: 0>} : vector<256x128xi32>
    %48 = vector.broadcast %46 : i32 to vector<256x128xi32>
    %49 = arith.addi %48, %47 : vector<256x128xi32>
    %50 = tpu.iota {dimensions = array<i32: 1>} : vector<256x128xi32>
    %c64_i32 = arith.constant 64 : i32
    %51 = vector.broadcast %c64_i32 : i32 to vector<256x128xi32>
    %52 = arith.cmpi slt, %49, %51 : vector<256x128xi32>
    %c32_i32 = arith.constant 32 : i32
    %53 = vector.broadcast %c32_i32 : i32 to vector<256x128xi32>
    %54 = arith.cmpi slt, %50, %53 : vector<256x128xi32>
    %55 = arith.andi %52, %54 : vector<256x128xi1>
    %cst_31 = arith.constant 0.000000e+00 : f32
    %56 = vector.broadcast %cst_31 : f32 to vector<256x128xf32>
    %57 = arith.select %55, %45, %56 : vector<256x128xi1>, vector<256x128xf32>
    %c0_32 = arith.constant 0 : index
    %c0_33 = arith.constant 0 : index
    %58 = vector.load %arg11[%c0_32, %c0_33] : memref<256x128xf32, #tpu.memory_space<vmem>>, vector<256x128xf32>
    tpu.vector_store %arg11[%c0_32, %c0_33], %57 {strides = array<i32>} : memref<256x128xf32, #tpu.memory_space<vmem>>, vector<256x128xf32>,
    return
  }
  func.func @transform_0(%arg0: i32) -> (i32, i32) {
    %c0_i32 = arith.constant 0 : i32
    %c0_i32_0 = arith.constant 0 : i32
    return %arg0, %c0_i32 : i32, i32
  }
  func.func @transform_1(%arg0: i32) -> (i32, i32) {
    %c0_i32 = arith.constant 0 : i32
    %c0_i32_0 = arith.constant 0 : i32
    return %arg0, %c0_i32 : i32, i32
  }
  func.func @transform_2(%arg0: i32) -> (i32, i32) {
    %c0_i32 = arith.constant 0 : i32
    %c0_i32_0 = arith.constant 0 : i32
    return %arg0, %c0_i32 : i32, i32
  }
  func.func @transform_3(%arg0: i32) -> (i32, i32) {
    %c0_i32 = arith.constant 0 : i32
    %c0_i32_0 = arith.constant 0 : i32
    %c0_i32_1 = arith.constant 0 : i32
    return %c0_i32, %c0_i32_0 : i32, i32
  }
  func.func @transform_4(%arg0: i32) -> (i32, i32) {
    %c0_i32 = arith.constant 0 : i32
    %c0_i32_0 = arith.constant 0 : i32
    %c0_i32_1 = arith.constant 0 : i32
    return %c0_i32, %c0_i32_0 : i32, i32
  }
  func.func @transform_5(%arg0: i32) -> (i32, i32) {
    %c0_i32 = arith.constant 0 : i32
    %c0_i32_0 = arith.constant 0 : i32
    %c0_i32_1 = arith.constant 0 : i32
    return %c0_i32, %c0_i32_0 : i32, i32
  }
  func.func @transform_6(%arg0: i32) -> (i32, i32) {
    %c0_i32 = arith.constant 0 : i32
    %c0_i32_0 = arith.constant 0 : i32
    %c0_i32_1 = arith.constant 0 : i32
    return %c0_i32, %c0_i32_0 : i32, i32
  }
  func.func @transform_7(%arg0: i32) -> (i32, i32) {
    %c0_i32 = arith.constant 0 : i32
    %c0_i32_0 = arith.constant 0 : i32
    %c0_i32_1 = arith.constant 0 : i32
    return %c0_i32, %c0_i32_0 : i32, i32
  }
  func.func @transform_8(%arg0: i32) -> (i32, i32) {
    %c0_i32 = arith.constant 0 : i32
    %c0_i32_0 = arith.constant 0 : i32
    %c0_i32_1 = arith.constant 0 : i32
    return %c0_i32, %c0_i32_0 : i32, i32
  }
  func.func @transform_9(%arg0: i32) -> (i32, i32) {
    %c0_i32 = arith.constant 0 : i32
    %c0_i32_0 = arith.constant 0 : i32
    return %arg0, %c0_i32 : i32, i32
  }
  func.func @transform_10(%arg0: i32) -> (i32, i32) {
    %c0_i32 = arith.constant 0 : i32
    %c0_i32_0 = arith.constant 0 : i32
    return %arg0, %c0_i32 : i32, i32
  }
}

</mosaic_0001>

<bundles_post_ra>
// kernel: last_layer_single_forward.14
= control target key start
LH: loop header
LB: loop body
LE: loop exit
PB: predicated region body
PF: predicated region fallthrough
CT: control target
= control target key end

     0   :  { %s760_s1 = inlined_call_operand.vmem [shape: f32[128,128], index: 1, kind: input, shape index: {}]   ;;  %s761_s2 = inlined_call_operand.vmem [shape: f32[1,128], index: 2, kind: input, shape index: {}]   ;;  %s762_s0 = inlined_call_operand.vmem [shape: f32[256,128], index: 0, kind: input, shape index: {}]   ;;  %s763_s3 = inlined_call_operand.vmem [shape: f32[256,128], index: 3, kind: output, shape index: {}]  }
   0x1   :  { %v129_v0 = vld [vmem:[%s760_s1 + $0x78] sm:$0xff]  ;;  %v128_v1 = vld [vmem:[%s760_s1 + $0x70] sm:$0xff]  ;;  %v127_v2 = vld [vmem:[%s760_s1 + $0x68] sm:$0xff] }
   0x2   :  { %415 = vmatpush.msra.mxu2 %v129_v0  ;;  %416 = vmatpush.msra.mxu3 %v129_v0  ;;  %v126_v3 = vld [vmem:[%s760_s1 + $0x60] sm:$0xff]  ;;  %v125_v4 = vld [vmem:[%s760_s1 + $0x58] sm:$0xff]  ;;  %v124_v5 = vld [vmem:[%s760_s1 + $0x50] sm:$0xff] }
   0x3   :  { %130 = vmatpush.msra.mxu0 %v129_v0  ;;  %414 = vmatpush.msra.mxu1 %v129_v0  ;;  %v123_v6 = vld [vmem:[%s760_s1 + $0x48] sm:$0xff]  ;;  %v122_v7 = vld [vmem:[%s760_s1 + $0x40] sm:$0xff]  ;;  %v121_v8 = vld [vmem:[%s760_s1 + $0x38] sm:$0xff] }
   0x4   :  { %418 = vmatpush.msra.mxu2 %v128_v1  ;;  %419 = vmatpush.msra.mxu3 %v128_v1  ;;  %v120_v9 = vld [vmem:[%s760_s1 + $0x30] sm:$0xff]  ;;  %v119_v10 = vld [vmem:[%s760_s1 + $0x28] sm:$0xff]  ;;  %v118_v11 = vld [vmem:[%s760_s1 + $0x20] sm:$0xff] }
   0x5   :  { %131 = vmatpush.msra.mxu0 %v128_v1  ;;  %417 = vmatpush.msra.mxu1 %v128_v1  ;;  %v117_v12 = vld [vmem:[%s760_s1 + $0x18] sm:$0xff]  ;;  %v116_v13 = vld [vmem:[%s760_s1 + $0x10] sm:$0xff]  ;;  %v115_v14 = vld [vmem:[%s760_s1 + $0x8] sm:$0xff] }
   0x6   :  { %421 = vmatpush.msra.mxu2 %v127_v2  ;;  %422 = vmatpush.msra.mxu3 %v127_v2  ;;  %v114_v15 = vld [vmem:[%s760_s1] sm:$0xff]  ;;  %v99_v20 = vld [vmem:[%s762_s0 + $0x88] sm:$0xff]  ;;  %v100_v24 = vld [vmem:[%s762_s0 + $0x90] sm:$0xff] }
   0x7   :  { %132 = vmatpush.msra.mxu0 %v127_v2  ;;  %420 = vmatpush.msra.mxu1 %v127_v2  ;;  %v98_v16 = vld [vmem:[%s762_s0 + $0x80] sm:$0xff]  ;;  %v107_v21 = vld [vmem:[%s762_s0 + $0xc8] sm:$0xff]  ;;  %v108_v25 = vld [vmem:[%s762_s0 + $0xd0] sm:$0xff] }
   0x8   :  { %424 = vmatpush.msra.mxu2 %v126_v3  ;;  %425 = vmatpush.msra.mxu3 %v126_v3  ;;  %v106_v17 = vld [vmem:[%s762_s0 + $0xc0] sm:$0xff]  ;;  %v83_v22 = vld [vmem:[%s762_s0 + $0x8] sm:$0xff]  ;;  %v84_v26 = vld [vmem:[%s762_s0 + $0x10] sm:$0xff] }
   0x9   :  { %133 = vmatpush.msra.mxu0 %v126_v3  ;;  %423 = vmatpush.msra.mxu1 %v126_v3  ;;  %v82_v18 = vld [vmem:[%s762_s0] sm:$0xff]  ;;  %v91_v23 = vld [vmem:[%s762_s0 + $0x48] sm:$0xff]  ;;  %v92_v27 = vld [vmem:[%s762_s0 + $0x50] sm:$0xff] }
   0xa   :  { %427 = vmatpush.msra.mxu2 %v125_v4  ;;  %428 = vmatpush.msra.mxu3 %v125_v4  ;;  %v90_v19 = vld [vmem:[%s762_s0 + $0x40] sm:$0xff]  ;;  %v101_v28 = vld [vmem:[%s762_s0 + $0x98] sm:$0xff]  ;;  %v103_v36 = vld [vmem:[%s762_s0 + $0xa8] sm:$0xff] }
   0xb   :  { %134 = vmatpush.msra.mxu0 %v125_v4  ;;  %426 = vmatpush.msra.mxu1 %v125_v4  ;;  %v109_v29 = vld [vmem:[%s762_s0 + $0xd8] sm:$0xff]  ;;  %v102_v32 = vld [vmem:[%s762_s0 + $0xa0] sm:$0xff]  ;;  %v111_v37 = vld [vmem:[%s762_s0 + $0xe8] sm:$0xff] }
   0xc   :  { %430 = vmatpush.msra.mxu2 %v124_v5  ;;  %431 = vmatpush.msra.mxu3 %v124_v5  ;;  %v85_v30 = vld [vmem:[%s762_s0 + $0x18] sm:$0xff]  ;;  %v110_v33 = vld [vmem:[%s762_s0 + $0xe0] sm:$0xff]  ;;  %v87_v38 = vld [vmem:[%s762_s0 + $0x28] sm:$0xff] }
   0xd   :  { %135 = vmatpush.msra.mxu0 %v124_v5  ;;  %429 = vmatpush.msra.mxu1 %v124_v5  ;;  %v93_v31 = vld [vmem:[%s762_s0 + $0x58] sm:$0xff]  ;;  %v86_v34 = vld [vmem:[%s762_s0 + $0x20] sm:$0xff]  ;;  %v95_v39 = vld [vmem:[%s762_s0 + $0x68] sm:$0xff] }
   0xe   :  { %433 = vmatpush.msra.mxu2 %v123_v6  ;;  %434 = vmatpush.msra.mxu3 %v123_v6  ;;  %v94_v35 = vld [vmem:[%s762_s0 + $0x60] sm:$0xff]  ;;  %v104_v40 = vld [vmem:[%s762_s0 + $0xb0] sm:$0xff]  ;;  %v105_v44 = vld [vmem:[%s762_s0 + $0xb8] sm:$0xff] }
   0xf   :  { %136 = vmatpush.msra.mxu0 %v123_v6  ;;  %432 = vmatpush.msra.mxu1 %v123_v6  ;;  %v112_v41 = vld [vmem:[%s762_s0 + $0xf0] sm:$0xff]  ;;  %v113_v45 = vld [vmem:[%s762_s0 + $0xf8] sm:$0xff]  ;;  %v630_v48 = vld [vmem:[%s761_s2] ss:$0 sm:$0xff] }
  0x10   :  { %436 = vmatpush.msra.mxu2 %v122_v7  ;;  %437 = vmatpush.msra.mxu3 %v122_v7  ;;  %v88_v42 = vld [vmem:[%s762_s0 + $0x30] sm:$0xff]  ;;  %v89_v46 = vld [vmem:[%s762_s0 + $0x38] sm:$0xff] }
  0x11   :  { %137 = vmatpush.msra.mxu0 %v122_v7  ;;  %435 = vmatpush.msra.mxu1 %v122_v7  ;;  %v96_v43 = vld [vmem:[%s762_s0 + $0x70] sm:$0xff]  ;;  %v97_v47 = vld [vmem:[%s762_s0 + $0x78] sm:$0xff] }
  0x12   :  { %439 = vmatpush.msra.mxu2 %v121_v8  ;;  %440 = vmatpush.msra.mxu3 %v121_v8 }
  0x13   :  { %138 = vmatpush.msra.mxu0 %v121_v8  ;;  %438 = vmatpush.msra.mxu1 %v121_v8 }
  0x14   :  { %442 = vmatpush.msra.mxu2 %v120_v9  ;;  %443 = vmatpush.msra.mxu3 %v120_v9 }
  0x15   :  { %139 = vmatpush.msra.mxu0 %v120_v9  ;;  %441 = vmatpush.msra.mxu1 %v120_v9 }
  0x16   :  { %445 = vmatpush.msra.mxu2 %v119_v10  ;;  %446 = vmatpush.msra.mxu3 %v119_v10 }
  0x17   :  { %140 = vmatpush.msra.mxu0 %v119_v10  ;;  %444 = vmatpush.msra.mxu1 %v119_v10 }
  0x18   :  { %448 = vmatpush.msra.mxu2 %v118_v11  ;;  %449 = vmatpush.msra.mxu3 %v118_v11 }
  0x19   :  { %141 = vmatpush.msra.mxu0 %v118_v11  ;;  %447 = vmatpush.msra.mxu1 %v118_v11 }
  0x1a   :  { %451 = vmatpush.msra.mxu2 %v117_v12  ;;  %452 = vmatpush.msra.mxu3 %v117_v12 }
  0x1b   :  { %142 = vmatpush.msra.mxu0 %v117_v12  ;;  %450 = vmatpush.msra.mxu1 %v117_v12 }
  0x1c   :  { %454 = vmatpush.msra.mxu2 %v116_v13  ;;  %455 = vmatpush.msra.mxu3 %v116_v13 }
  0x1d   :  { %143 = vmatpush.msra.mxu0 %v116_v13  ;;  %453 = vmatpush.msra.mxu1 %v116_v13 }
  0x1e   :  { %457 = vmatpush.msra.mxu2 %v115_v14  ;;  %458 = vmatpush.msra.mxu3 %v115_v14 }
  0x1f   :  { %144 = vmatpush.msra.mxu0 %v115_v14  ;;  %456 = vmatpush.msra.mxu1 %v115_v14 }
  0x20   :  { %460 = vmatpush.msra.mxu2 %v114_v15  ;;  %461 = vmatpush.msra.mxu3 %v114_v15 }
  0x21   :  { %194 = vmatmul.f32.vlgmr.msra.gmra.mxu2 %v98_v16  ;;  %218 = vmatmul.f32.vlgmr.msra.gmra.mxu3 %v106_v17 }
  0x22   :  { %145 = vmatpush.msra.mxu0 %v114_v15  ;;  %459 = vmatpush.msra.mxu1 %v114_v15 }
  0x23   :  { %146 = vmatmul.f32.vlgmr.msra.gmra.mxu0 %v82_v18  ;;  %170 = vmatmul.f32.vlgmr.msra.gmra.mxu1 %v90_v19 }
  0x29   :  { %197 = vmatmul.f32.gmra.mxu2 %v99_v20  ;;  %221 = vmatmul.f32.gmra.mxu3 %v107_v21 }
  0x2b   :  { %149 = vmatmul.f32.gmra.mxu0 %v83_v22  ;;  %173 = vmatmul.f32.gmra.mxu1 %v91_v23 }
  0x31   :  { %200 = vmatmul.f32.gmra.mxu2 %v100_v24  ;;  %224 = vmatmul.f32.gmra.mxu3 %v108_v25 }
  0x33   :  { %152 = vmatmul.f32.gmra.mxu0 %v84_v26  ;;  %176 = vmatmul.f32.gmra.mxu1 %v92_v27 }
  0x39   :  { %203 = vmatmul.f32.gmra.mxu2 %v101_v28  ;;  %227 = vmatmul.f32.gmra.mxu3 %v109_v29 }
  0x3b   :  { %155 = vmatmul.f32.gmra.mxu0 %v85_v30  ;;  %179 = vmatmul.f32.gmra.mxu1 %v93_v31 }
  0x41   :  { %206 = vmatmul.f32.gmra.mxu2 %v102_v32  ;;  %230 = vmatmul.f32.gmra.mxu3 %v110_v33 }
  0x43   :  { %158 = vmatmul.f32.gmra.mxu0 %v86_v34  ;;  %182 = vmatmul.f32.gmra.mxu1 %v94_v35 }
  0x49   :  { %209 = vmatmul.f32.gmra.mxu2 %v103_v36  ;;  %233 = vmatmul.f32.gmra.mxu3 %v111_v37 }
  0x4b   :  { %161 = vmatmul.f32.gmra.mxu0 %v87_v38  ;;  %185 = vmatmul.f32.gmra.mxu1 %v95_v39 }
  0x51   :  { %212 = vmatmul.f32.gmra.mxu2 %v104_v40  ;;  %236 = vmatmul.f32.gmra.mxu3 %v112_v41 }
  0x53   :  { %164 = vmatmul.f32.gmra.mxu0 %v88_v42  ;;  %188 = vmatmul.f32.gmra.mxu1 %v96_v43 }
  0x59   :  { %215 = vmatmul.f32.gmra.mxu2 %v105_v44  ;;  %239 = vmatmul.f32.gmra.mxu3 %v113_v45 }
  0x5b   :  { %167 = vmatmul.f32.gmra.mxu0 %v89_v46  ;;  %191 = vmatmul.f32.gmra.mxu1 %v97_v47 }
  0xa0   :  { %v147_v49 = vpop.f32.mrf.mxu0  ;;  %v171_v50 = vpop.f32.mrf.mxu1 }
  0xa1   :  { %v346_v51 = vadd.f32 %v630_v48, %v147_v49  ;;  %v354_v52 = vadd.f32 %v630_v48, %v171_v50 }
  0xa3   :  { %378 = vst [vmem:[%s763_s3] sm:$0xff] %v346_v51 }
  0xa4   :  { %386 = vst [vmem:[%s763_s3 + $0x40] sm:$0xff] %v354_v52  ;;  %v195_v53 = vpop.f32.mrf.mxu2  ;;  %v219_v54 = vpop.f32.mrf.mxu3 }
  0xa5   :  { %v362_v55 = vadd.f32 %v630_v48, %v195_v53  ;;  %v370_v56 = vadd.f32 %v630_v48, %v219_v54 }
  0xa7   :  { %394 = vst [vmem:[%s763_s3 + $0x80] sm:$0xff] %v362_v55 }
  0xa8   :  { %402 = vst [vmem:[%s763_s3 + $0xc0] sm:$0xff] %v370_v56  ;;  %v150_v57 = vpop.f32.mrf.mxu0  ;;  %v174_v58 = vpop.f32.mrf.mxu1 }
  0xa9   :  { %v347_v59 = vadd.f32 %v630_v48, %v150_v57  ;;  %v355_v60 = vadd.f32 %v630_v48, %v174_v58 }
  0xab   :  { %379 = vst [vmem:[%s763_s3 + $0x8] sm:$0xff] %v347_v59 }
  0xac   :  { %387 = vst [vmem:[%s763_s3 + $0x48] sm:$0xff] %v355_v60  ;;  %v198_v61 = vpop.f32.mrf.mxu2  ;;  %v222_v62 = vpop.f32.mrf.mxu3 }
  0xad   :  { %v363_v63 = vadd.f32 %v630_v48, %v198_v61  ;;  %v371_v0 = vadd.f32 %v630_v48, %v222_v62 }
  0xaf   :  { %395 = vst [vmem:[%s763_s3 + $0x88] sm:$0xff] %v363_v63 }
  0xb0   :  { %403 = vst [vmem:[%s763_s3 + $0xc8] sm:$0xff] %v371_v0  ;;  %v153_v1 = vpop.f32.mrf.mxu0  ;;  %v177_v2 = vpop.f32.mrf.mxu1 }
  0xb1   :  { %v348_v3 = vadd.f32 %v630_v48, %v153_v1  ;;  %v356_v4 = vadd.f32 %v630_v48, %v177_v2 }
  0xb3   :  { %380 = vst [vmem:[%s763_s3 + $0x10] sm:$0xff] %v348_v3 }
  0xb4   :  { %388 = vst [vmem:[%s763_s3 + $0x50] sm:$0xff] %v356_v4  ;;  %v201_v5 = vpop.f32.mrf.mxu2  ;;  %v225_v6 = vpop.f32.mrf.mxu3 }
  0xb5   :  { %v364_v7 = vadd.f32 %v630_v48, %v201_v5  ;;  %v372_v8 = vadd.f32 %v630_v48, %v225_v6 }
  0xb7   :  { %396 = vst [vmem:[%s763_s3 + $0x90] sm:$0xff] %v364_v7 }
  0xb8   :  { %404 = vst [vmem:[%s763_s3 + $0xd0] sm:$0xff] %v372_v8  ;;  %v156_v9 = vpop.f32.mrf.mxu0  ;;  %v180_v10 = vpop.f32.mrf.mxu1 }
  0xb9   :  { %v349_v11 = vadd.f32 %v630_v48, %v156_v9  ;;  %v357_v12 = vadd.f32 %v630_v48, %v180_v10 }
  0xbb   :  { %381 = vst [vmem:[%s763_s3 + $0x18] sm:$0xff] %v349_v11 }
  0xbc   :  { %389 = vst [vmem:[%s763_s3 + $0x58] sm:$0xff] %v357_v12  ;;  %v204_v13 = vpop.f32.mrf.mxu2  ;;  %v228_v14 = vpop.f32.mrf.mxu3 }
  0xbd   :  { %v365_v15 = vadd.f32 %v630_v48, %v204_v13  ;;  %v373_v16 = vadd.f32 %v630_v48, %v228_v14 }
  0xbf   :  { %397 = vst [vmem:[%s763_s3 + $0x98] sm:$0xff] %v365_v15 }
  0xc0   :  { %405 = vst [vmem:[%s763_s3 + $0xd8] sm:$0xff] %v373_v16  ;;  %v159_v17 = vpop.f32.mrf.mxu0  ;;  %v183_v18 = vpop.f32.mrf.mxu1 }
  0xc1   :  { %v350_v19 = vadd.f32 %v630_v48, %v159_v17  ;;  %v358_v20 = vadd.f32 %v630_v48, %v183_v18 }
  0xc3   :  { %382 = vst [vmem:[%s763_s3 + $0x20] sm:$0xff] %v350_v19 }
  0xc4   :  { %390 = vst [vmem:[%s763_s3 + $0x60] sm:$0xff] %v358_v20  ;;  %v207_v21 = vpop.f32.mrf.mxu2  ;;  %v231_v22 = vpop.f32.mrf.mxu3 }
  0xc5   :  { %v366_v23 = vadd.f32 %v630_v48, %v207_v21  ;;  %v374_v24 = vadd.f32 %v630_v48, %v231_v22 }
  0xc7   :  { %398 = vst [vmem:[%s763_s3 + $0xa0] sm:$0xff] %v366_v23 }
  0xc8   :  { %406 = vst [vmem:[%s763_s3 + $0xe0] sm:$0xff] %v374_v24  ;;  %v162_v25 = vpop.f32.mrf.mxu0  ;;  %v186_v26 = vpop.f32.mrf.mxu1 }
  0xc9   :  { %v351_v27 = vadd.f32 %v630_v48, %v162_v25  ;;  %v359_v28 = vadd.f32 %v630_v48, %v186_v26 }
  0xcb   :  { %383 = vst [vmem:[%s763_s3 + $0x28] sm:$0xff] %v351_v27 }
  0xcc   :  { %391 = vst [vmem:[%s763_s3 + $0x68] sm:$0xff] %v359_v28  ;;  %v210_v29 = vpop.f32.mrf.mxu2  ;;  %v234_v30 = vpop.f32.mrf.mxu3 }
  0xcd   :  { %v367_v31 = vadd.f32 %v630_v48, %v210_v29  ;;  %v375_v32 = vadd.f32 %v630_v48, %v234_v30 }
  0xcf   :  { %399 = vst [vmem:[%s763_s3 + $0xa8] sm:$0xff] %v367_v31 }
  0xd0   :  { %407 = vst [vmem:[%s763_s3 + $0xe8] sm:$0xff] %v375_v32  ;;  %v165_v33 = vpop.f32.mrf.mxu0  ;;  %v189_v34 = vpop.f32.mrf.mxu1 }
  0xd1   :  { %v352_v35 = vadd.f32 %v630_v48, %v165_v33  ;;  %v360_v36 = vadd.f32 %v630_v48, %v189_v34 }
  0xd3   :  { %384 = vst [vmem:[%s763_s3 + $0x30] sm:$0xff] %v352_v35 }
  0xd4   :  { %392 = vst [vmem:[%s763_s3 + $0x70] sm:$0xff] %v360_v36  ;;  %v213_v37 = vpop.f32.mrf.mxu2  ;;  %v237_v38 = vpop.f32.mrf.mxu3 }
  0xd5   :  { %v368_v39 = vadd.f32 %v630_v48, %v213_v37  ;;  %v376_v40 = vadd.f32 %v630_v48, %v237_v38 }
  0xd7   :  { %400 = vst [vmem:[%s763_s3 + $0xb0] sm:$0xff] %v368_v39 }
  0xd8   :  { %408 = vst [vmem:[%s763_s3 + $0xf0] sm:$0xff] %v376_v40  ;;  %v168_v41 = vpop.f32.mrf.mxu0  ;;  %v192_v42 = vpop.f32.mrf.mxu1 }
  0xd9   :  { %v353_v43 = vadd.f32 %v630_v48, %v168_v41  ;;  %v361_v44 = vadd.f32 %v630_v48, %v192_v42 }
  0xdb   :  { %385 = vst [vmem:[%s763_s3 + $0x38] sm:$0xff] %v353_v43 }
  0xdc   :  { %393 = vst [vmem:[%s763_s3 + $0x78] sm:$0xff] %v361_v44  ;;  %v216_v45 = vpop.f32.mrf.mxu2  ;;  %v240_v46 = vpop.f32.mrf.mxu3 }
  0xdd   :  { %v369_v47 = vadd.f32 %v630_v48, %v216_v45  ;;  %v377_v49 = vadd.f32 %v630_v48, %v240_v46 }
  0xdf   :  { %401 = vst [vmem:[%s763_s3 + $0xb8] sm:$0xff] %v369_v47 }
  0xe0   :  { %409 = vst [vmem:[%s763_s3 + $0xf8] sm:$0xff] %v377_v49 }

// kernel: last_layer_single_forward.15
= control target key start
LH: loop header
LB: loop body
LE: loop exit
PB: predicated region body
PF: predicated region fallthrough
CT: control target
= control target key end

     0   :  { %s1145_s1 = inlined_call_operand.vmem [shape: f32[256,128], index: 1, kind: input, shape index: {}]   ;;  %s1146_s0 = inlined_call_operand.vmem [shape: f32[256,256], index: 0, kind: input, shape index: {}]   ;;  %s1147_s2 = inlined_call_operand.vmem [shape: f32[1,128], index: 2, kind: input, shape index: {}]   ;;  %s1148_s3 = inlined_call_operand.vmem [shape: f32[256,128], index: 3, kind: output, shape index: {}]  }
   0x1   :  { %v161_v0 = vld [vmem:[%s1145_s1 + $0x78] sm:$0xff]  ;;  %v160_v2 = vld [vmem:[%s1145_s1 + $0x70] sm:$0xff]  ;;  %v159_v4 = vld [vmem:[%s1145_s1 + $0x68] sm:$0xff] }
   0x2   :  { %v177_v1 = vld [vmem:[%s1145_s1 + $0xf8] sm:$0xff]  ;;  %671 = vmatpush.msra.mxu2 %v161_v0  ;;  %v176_v3 = vld [vmem:[%s1145_s1 + $0xf0] sm:$0xff]  ;;  %178 = vmatpush.msra.mxu0 %v161_v0  ;;  %v175_v5 = vld [vmem:[%s1145_s1 + $0xe8] sm:$0xff] }
   0x3   :  { %687 = vmatpush.msra.mxu3 %v177_v1  ;;  %291 = vmatpush.msra.mxu1 %v177_v1  ;;  %v158_v6 = vld [vmem:[%s1145_s1 + $0x60] sm:$0xff]  ;;  %v157_v8 = vld [vmem:[%s1145_s1 + $0x58] sm:$0xff]  ;;  %v156_v10 = vld [vmem:[%s1145_s1 + $0x50] sm:$0xff] }
   0x4   :  { %672 = vmatpush.msra.mxu2 %v160_v2  ;;  %179 = vmatpush.msra.mxu0 %v160_v2  ;;  %v174_v7 = vld [vmem:[%s1145_s1 + $0xe0] sm:$0xff]  ;;  %v173_v9 = vld [vmem:[%s1145_s1 + $0xd8] sm:$0xff]  ;;  %v172_v11 = vld [vmem:[%s1145_s1 + $0xd0] sm:$0xff] }
   0x5   :  { %688 = vmatpush.msra.mxu3 %v176_v3  ;;  %292 = vmatpush.msra.mxu1 %v176_v3  ;;  %v155_v12 = vld [vmem:[%s1145_s1 + $0x48] sm:$0xff]  ;;  %v154_v14 = vld [vmem:[%s1145_s1 + $0x40] sm:$0xff]  ;;  %v153_v16 = vld [vmem:[%s1145_s1 + $0x38] sm:$0xff] }
   0x6   :  { %673 = vmatpush.msra.mxu2 %v159_v4  ;;  %180 = vmatpush.msra.mxu0 %v159_v4  ;;  %v171_v13 = vld [vmem:[%s1145_s1 + $0xc8] sm:$0xff]  ;;  %v170_v15 = vld [vmem:[%s1145_s1 + $0xc0] sm:$0xff]  ;;  %v169_v17 = vld [vmem:[%s1145_s1 + $0xb8] sm:$0xff] }
   0x7   :  { %689 = vmatpush.msra.mxu3 %v175_v5  ;;  %293 = vmatpush.msra.mxu1 %v175_v5  ;;  %v152_v18 = vld [vmem:[%s1145_s1 + $0x30] sm:$0xff]  ;;  %v151_v20 = vld [vmem:[%s1145_s1 + $0x28] sm:$0xff]  ;;  %v150_v22 = vld [vmem:[%s1145_s1 + $0x20] sm:$0xff] }
   0x8   :  { %674 = vmatpush.msra.mxu2 %v158_v6  ;;  %181 = vmatpush.msra.mxu0 %v158_v6  ;;  %v168_v19 = vld [vmem:[%s1145_s1 + $0xb0] sm:$0xff]  ;;  %v167_v21 = vld [vmem:[%s1145_s1 + $0xa8] sm:$0xff]  ;;  %v166_v23 = vld [vmem:[%s1145_s1 + $0xa0] sm:$0xff] }
   0x9   :  { %690 = vmatpush.msra.mxu3 %v174_v7  ;;  %294 = vmatpush.msra.mxu1 %v174_v7  ;;  %v149_v24 = vld [vmem:[%s1145_s1 + $0x18] sm:$0xff]  ;;  %v148_v26 = vld [vmem:[%s1145_s1 + $0x10] sm:$0xff]  ;;  %v147_v28 = vld [vmem:[%s1145_s1 + $0x8] sm:$0xff] }
   0xa   :  { %675 = vmatpush.msra.mxu2 %v157_v8  ;;  %182 = vmatpush.msra.mxu0 %v157_v8  ;;  %v165_v25 = vld [vmem:[%s1145_s1 + $0x98] sm:$0xff]  ;;  %v164_v27 = vld [vmem:[%s1145_s1 + $0x90] sm:$0xff]  ;;  %v163_v29 = vld [vmem:[%s1145_s1 + $0x88] sm:$0xff] }
   0xb   :  { %691 = vmatpush.msra.mxu3 %v173_v9  ;;  %295 = vmatpush.msra.mxu1 %v173_v9  ;;  %v146_v30 = vld [vmem:[%s1145_s1] sm:$0xff]  ;;  %v115_v33 = vld [vmem:[%s1146_s0 + $0x108] sm:$0xff]  ;;  %v116_v36 = vld [vmem:[%s1146_s0 + $0x110] sm:$0xff] }
   0xc   :  { %676 = vmatpush.msra.mxu2 %v156_v10  ;;  %183 = vmatpush.msra.mxu0 %v156_v10  ;;  %v162_v31 = vld [vmem:[%s1145_s1 + $0x80] sm:$0xff]  ;;  %v83_v35 = vld [vmem:[%s1146_s0 + $0x8] sm:$0xff]  ;;  %v117_v37 = vld [vmem:[%s1146_s0 + $0x118] sm:$0xff] }
   0xd   :  { %692 = vmatpush.msra.mxu3 %v172_v11  ;;  %296 = vmatpush.msra.mxu1 %v172_v11  ;;  %v114_v32 = vld [vmem:[%s1146_s0 + $0x100] sm:$0xff]  ;;  %v84_v38 = vld [vmem:[%s1146_s0 + $0x10] sm:$0xff]  ;;  %v85_v39 = vld [vmem:[%s1146_s0 + $0x18] sm:$0xff] }
   0xe   :  { %677 = vmatpush.msra.mxu2 %v155_v12  ;;  %184 = vmatpush.msra.mxu0 %v155_v12  ;;  %v82_v34 = vld [vmem:[%s1146_s0] sm:$0xff]  ;;  %v119_v41 = vld [vmem:[%s1146_s0 + $0x128] sm:$0xff]  ;;  %v120_v44 = vld [vmem:[%s1146_s0 + $0x130] sm:$0xff] }
   0xf   :  { %693 = vmatpush.msra.mxu3 %v171_v13  ;;  %297 = vmatpush.msra.mxu1 %v171_v13  ;;  %v118_v40 = vld [vmem:[%s1146_s0 + $0x120] sm:$0xff]  ;;  %v87_v43 = vld [vmem:[%s1146_s0 + $0x28] sm:$0xff]  ;;  %v121_v45 = vld [vmem:[%s1146_s0 + $0x138] sm:$0xff] }
  0x10   :  { %678 = vmatpush.msra.mxu2 %v154_v14  ;;  %185 = vmatpush.msra.mxu0 %v154_v14  ;;  %v86_v42 = vld [vmem:[%s1146_s0 + $0x20] sm:$0xff]  ;;  %v88_v46 = vld [vmem:[%s1146_s0 + $0x30] sm:$0xff]  ;;  %v89_v47 = vld [vmem:[%s1146_s0 + $0x38] sm:$0xff] }
  0x11   :  { %694 = vmatpush.msra.mxu3 %v170_v15  ;;  %298 = vmatpush.msra.mxu1 %v170_v15  ;;  %v122_v48 = vld [vmem:[%s1146_s0 + $0x140] sm:$0xff]  ;;  %v123_v49 = vld [vmem:[%s1146_s0 + $0x148] sm:$0xff]  ;;  %v124_v52 = vld [vmem:[%s1146_s0 + $0x150] sm:$0xff] }
  0x12   :  { %679 = vmatpush.msra.mxu2 %v153_v16  ;;  %186 = vmatpush.msra.mxu0 %v153_v16  ;;  %v90_v50 = vld [vmem:[%s1146_s0 + $0x40] sm:$0xff]  ;;  %v91_v51 = vld [vmem:[%s1146_s0 + $0x48] sm:$0xff]  ;;  %v125_v53 = vld [vmem:[%s1146_s0 + $0x158] sm:$0xff] }
  0x13   :  { %695 = vmatpush.msra.mxu3 %v169_v17  ;;  %299 = vmatpush.msra.mxu1 %v169_v17  ;;  %v92_v54 = vld [vmem:[%s1146_s0 + $0x50] sm:$0xff]  ;;  %v93_v55 = vld [vmem:[%s1146_s0 + $0x58] sm:$0xff]  ;;  %v126_v56 = vld [vmem:[%s1146_s0 + $0x160] sm:$0xff] }
  0x14   :  { %680 = vmatpush.msra.mxu2 %v152_v18  ;;  %187 = vmatpush.msra.mxu0 %v152_v18  ;;  %v127_v57 = vld [vmem:[%s1146_s0 + $0x168] sm:$0xff]  ;;  %v94_v58 = vld [vmem:[%s1146_s0 + $0x60] sm:$0xff]  ;;  %v128_v60 = vld [vmem:[%s1146_s0 + $0x170] sm:$0xff] }
  0x15   :  { %696 = vmatpush.msra.mxu3 %v168_v19  ;;  %300 = vmatpush.msra.mxu1 %v168_v19  ;;  %v95_v59 = vld [vmem:[%s1146_s0 + $0x68] sm:$0xff]  ;;  %v129_v61 = vld [vmem:[%s1146_s0 + $0x178] sm:$0xff]  ;;  %v96_v62 = vld [vmem:[%s1146_s0 + $0x70] sm:$0xff] }
  0x16   :  { %681 = vmatpush.msra.mxu2 %v151_v20  ;;  %188 = vmatpush.msra.mxu0 %v151_v20  ;;  %v97_v63 = vld [vmem:[%s1146_s0 + $0x78] sm:$0xff]  ;;  %v130_v0 = vld [vmem:[%s1146_s0 + $0x180] sm:$0xff]  ;;  %v131_v1 = vld [vmem:[%s1146_s0 + $0x188] sm:$0xff] }
  0x17   :  { %697 = vmatpush.msra.mxu3 %v167_v21  ;;  %301 = vmatpush.msra.mxu1 %v167_v21  ;;  %v98_v2 = vld [vmem:[%s1146_s0 + $0x80] sm:$0xff]  ;;  %v99_v3 = vld [vmem:[%s1146_s0 + $0x88] sm:$0xff]  ;;  %v132_v4 = vld [vmem:[%s1146_s0 + $0x190] sm:$0xff] }
  0x18   :  { %682 = vmatpush.msra.mxu2 %v150_v22  ;;  %189 = vmatpush.msra.mxu0 %v150_v22  ;;  %v133_v5 = vld [vmem:[%s1146_s0 + $0x198] sm:$0xff]  ;;  %v100_v6 = vld [vmem:[%s1146_s0 + $0x90] sm:$0xff]  ;;  %v134_v8 = vld [vmem:[%s1146_s0 + $0x1a0] sm:$0xff] }
  0x19   :  { %698 = vmatpush.msra.mxu3 %v166_v23  ;;  %302 = vmatpush.msra.mxu1 %v166_v23  ;;  %v101_v7 = vld [vmem:[%s1146_s0 + $0x98] sm:$0xff]  ;;  %v135_v9 = vld [vmem:[%s1146_s0 + $0x1a8] sm:$0xff]  ;;  %v102_v10 = vld [vmem:[%s1146_s0 + $0xa0] sm:$0xff] }
  0x1a   :  { %683 = vmatpush.msra.mxu2 %v149_v24  ;;  %190 = vmatpush.msra.mxu0 %v149_v24  ;;  %v103_v11 = vld [vmem:[%s1146_s0 + $0xa8] sm:$0xff]  ;;  %v136_v12 = vld [vmem:[%s1146_s0 + $0x1b0] sm:$0xff]  ;;  %v137_v13 = vld [vmem:[%s1146_s0 + $0x1b8] sm:$0xff] }
  0x1b   :  { %699 = vmatpush.msra.mxu3 %v165_v25  ;;  %303 = vmatpush.msra.mxu1 %v165_v25  ;;  %v104_v14 = vld [vmem:[%s1146_s0 + $0xb0] sm:$0xff]  ;;  %v105_v15 = vld [vmem:[%s1146_s0 + $0xb8] sm:$0xff]  ;;  %v138_v16 = vld [vmem:[%s1146_s0 + $0x1c0] sm:$0xff] }
  0x1c   :  { %684 = vmatpush.msra.mxu2 %v148_v26  ;;  %191 = vmatpush.msra.mxu0 %v148_v26  ;;  %v139_v17 = vld [vmem:[%s1146_s0 + $0x1c8] sm:$0xff]  ;;  %v106_v18 = vld [vmem:[%s1146_s0 + $0xc0] sm:$0xff]  ;;  %v140_v20 = vld [vmem:[%s1146_s0 + $0x1d0] sm:$0xff] }
  0x1d   :  { %700 = vmatpush.msra.mxu3 %v164_v27  ;;  %304 = vmatpush.msra.mxu1 %v164_v27  ;;  %v107_v19 = vld [vmem:[%s1146_s0 + $0xc8] sm:$0xff]  ;;  %v141_v21 = vld [vmem:[%s1146_s0 + $0x1d8] sm:$0xff]  ;;  %v108_v22 = vld [vmem:[%s1146_s0 + $0xd0] sm:$0xff] }
  0x1e   :  { %685 = vmatpush.msra.mxu2 %v147_v28  ;;  %192 = vmatpush.msra.mxu0 %v147_v28  ;;  %v109_v23 = vld [vmem:[%s1146_s0 + $0xd8] sm:$0xff]  ;;  %v142_v24 = vld [vmem:[%s1146_s0 + $0x1e0] sm:$0xff]  ;;  %v143_v25 = vld [vmem:[%s1146_s0 + $0x1e8] sm:$0xff] }
  0x1f   :  { %701 = vmatpush.msra.mxu3 %v163_v29  ;;  %305 = vmatpush.msra.mxu1 %v163_v29  ;;  %v110_v26 = vld [vmem:[%s1146_s0 + $0xe0] sm:$0xff]  ;;  %v111_v27 = vld [vmem:[%s1146_s0 + $0xe8] sm:$0xff]  ;;  %v144_v28 = vld [vmem:[%s1146_s0 + $0x1f0] sm:$0xff] }
  0x20   :  { %686 = vmatpush.msra.mxu2 %v146_v30  ;;  %193 = vmatpush.msra.mxu0 %v146_v30  ;;  %v145_v29 = vld [vmem:[%s1146_s0 + $0x1f8] sm:$0xff]  ;;  %v112_v30 = vld [vmem:[%s1146_s0 + $0xf0] sm:$0xff] }
  0x21   :  { %702 = vmatpush.msra.mxu3 %v162_v31  ;;  %242 = vmatmul.f32.vlgmr.msra.gmra.mxu2 %v114_v32  ;;  %v1015_v32 = vld [vmem:[%s1147_s2] ss:$0 sm:$0xff] }
  0x22   :  { %355 = vmatmul.f32.vlgmr.msra.gmra.mxu3 %v115_v33  ;;  %306 = vmatpush.msra.mxu1 %v162_v31  ;;  %v113_v31 = vld [vmem:[%s1146_s0 + $0xf8] sm:$0xff] }
  0x23   :  { %194 = vmatmul.f32.vlgmr.msra.gmra.mxu0 %v82_v34  ;;  %307 = vmatmul.f32.vlgmr.msra.gmra.mxu1 %v83_v35 }
  0x29   :  { %245 = vmatmul.f32.gmra.mxu2 %v116_v36 }
  0x2a   :  { %358 = vmatmul.f32.gmra.mxu3 %v117_v37 }
  0x2b   :  { %197 = vmatmul.f32.gmra.mxu0 %v84_v38  ;;  %310 = vmatmul.f32.gmra.mxu1 %v85_v39 }
  0x31   :  { %248 = vmatmul.f32.gmra.mxu2 %v118_v40 }
  0x32   :  { %361 = vmatmul.f32.gmra.mxu3 %v119_v41 }
  0x33   :  { %200 = vmatmul.f32.gmra.mxu0 %v86_v42  ;;  %313 = vmatmul.f32.gmra.mxu1 %v87_v43 }
  0x39   :  { %251 = vmatmul.f32.gmra.mxu2 %v120_v44 }
  0x3a   :  { %364 = vmatmul.f32.gmra.mxu3 %v121_v45 }
  0x3b   :  { %203 = vmatmul.f32.gmra.mxu0 %v88_v46  ;;  %316 = vmatmul.f32.gmra.mxu1 %v89_v47 }
  0x41   :  { %254 = vmatmul.f32.gmra.mxu2 %v122_v48 }
  0x42   :  { %367 = vmatmul.f32.gmra.mxu3 %v123_v49 }
  0x43   :  { %206 = vmatmul.f32.gmra.mxu0 %v90_v50  ;;  %319 = vmatmul.f32.gmra.mxu1 %v91_v51 }
  0x49   :  { %257 = vmatmul.f32.gmra.mxu2 %v124_v52 }
  0x4a   :  { %370 = vmatmul.f32.gmra.mxu3 %v125_v53 }
  0x4b   :  { %209 = vmatmul.f32.gmra.mxu0 %v92_v54  ;;  %322 = vmatmul.f32.gmra.mxu1 %v93_v55 }
  0x51   :  { %260 = vmatmul.f32.gmra.mxu2 %v126_v56 }
  0x52   :  { %373 = vmatmul.f32.gmra.mxu3 %v127_v57 }
  0x53   :  { %212 = vmatmul.f32.gmra.mxu0 %v94_v58  ;;  %325 = vmatmul.f32.gmra.mxu1 %v95_v59 }
  0x59   :  { %263 = vmatmul.f32.gmra.mxu2 %v128_v60 }
  0x5a   :  { %376 = vmatmul.f32.gmra.mxu3 %v129_v61 }
  0x5b   :  { %215 = vmatmul.f32.gmra.mxu0 %v96_v62  ;;  %328 = vmatmul.f32.gmra.mxu1 %v97_v63 }
  0x61   :  { %266 = vmatmul.f32.gmra.mxu2 %v130_v0 }
  0x62   :  { %379 = vmatmul.f32.gmra.mxu3 %v131_v1 }
  0x63   :  { %218 = vmatmul.f32.gmra.mxu0 %v98_v2  ;;  %331 = vmatmul.f32.gmra.mxu1 %v99_v3 }
  0x69   :  { %269 = vmatmul.f32.gmra.mxu2 %v132_v4 }
  0x6a   :  { %382 = vmatmul.f32.gmra.mxu3 %v133_v5 }
  0x6b   :  { %221 = vmatmul.f32.gmra.mxu0 %v100_v6  ;;  %334 = vmatmul.f32.gmra.mxu1 %v101_v7 }
  0x71   :  { %272 = vmatmul.f32.gmra.mxu2 %v134_v8 }
  0x72   :  { %385 = vmatmul.f32.gmra.mxu3 %v135_v9 }
  0x73   :  { %224 = vmatmul.f32.gmra.mxu0 %v102_v10  ;;  %337 = vmatmul.f32.gmra.mxu1 %v103_v11 }
  0x79   :  { %275 = vmatmul.f32.gmra.mxu2 %v136_v12 }
  0x7a   :  { %388 = vmatmul.f32.gmra.mxu3 %v137_v13 }
  0x7b   :  { %227 = vmatmul.f32.gmra.mxu0 %v104_v14  ;;  %340 = vmatmul.f32.gmra.mxu1 %v105_v15 }
  0x81   :  { %278 = vmatmul.f32.gmra.mxu2 %v138_v16 }
  0x82   :  { %391 = vmatmul.f32.gmra.mxu3 %v139_v17 }
  0x83   :  { %230 = vmatmul.f32.gmra.mxu0 %v106_v18  ;;  %343 = vmatmul.f32.gmra.mxu1 %v107_v19 }
  0x89   :  { %281 = vmatmul.f32.gmra.mxu2 %v140_v20 }
  0x8a   :  { %394 = vmatmul.f32.gmra.mxu3 %v141_v21 }
  0x8b   :  { %233 = vmatmul.f32.gmra.mxu0 %v108_v22  ;;  %346 = vmatmul.f32.gmra.mxu1 %v109_v23 }
  0x91   :  { %284 = vmatmul.f32.gmra.mxu2 %v142_v24 }
  0x92   :  { %397 = vmatmul.f32.gmra.mxu3 %v143_v25 }
  0x93   :  { %236 = vmatmul.f32.gmra.mxu0 %v110_v26  ;;  %349 = vmatmul.f32.gmra.mxu1 %v111_v27 }
  0x99   :  { %287 = vmatmul.f32.gmra.mxu2 %v144_v28 }
  0x9a   :  { %400 = vmatmul.f32.gmra.mxu3 %v145_v29 }
  0x9b   :  { %239 = vmatmul.f32.gmra.mxu0 %v112_v30  ;;  %352 = vmatmul.f32.gmra.mxu1 %v113_v31 }
  0xa0   :  { %v195_v33 = vpop.f32.mrf.mxu0  ;;  %v308_v34 = vpop.f32.mrf.mxu1 }
  0xa1   :  { %v309_v35 = vadd.f32 %v308_v34, %v195_v33 }
  0xa3   :  { %v507_v36 = vadd.f32 %v1015_v32, %v309_v35 }
  0xa4   :  { %v243_v37 = vpop.f32.mrf.mxu2 }
  0xa5   :  { %v356_v38 = vpop.f32.mrf.mxu3  ;;  %vm539_vm0 = vcmp.gt.f32.partialorder %v507_v36, 0.0  ;;  %v571_v39 = vmul.f32 0.2, %v507_v36 }
  0xa6   :  { %v357_v40 = vadd.f32 %v356_v38, %v243_v37 }
  0xa7   :  { %v603_v41 = vsel %vm539_vm0, %v507_v36, %v571_v39 }
  0xa8   :  { %v523_v42 = vadd.f32 %v1015_v32, %v357_v40  ;;  %635 = vst [vmem:[%s1148_s3] sm:$0xff] %v603_v41  ;;  %v198_v43 = vpop.f32.mrf.mxu0  ;;  %v311_v44 = vpop.f32.mrf.mxu1 }
  0xa9   :  { %v312_v46 = vadd.f32 %v311_v44, %v198_v43 }
  0xaa   :  { %vm555_vm1 = vcmp.gt.f32.partialorder %v523_v42, 0.0  ;;  %v587_v45 = vmul.f32 0.2, %v523_v42 }
  0xab   :  { %v508_v48 = vadd.f32 %v1015_v32, %v312_v46 }
  0xac   :  { %v619_v47 = vsel %vm555_vm1, %v523_v42, %v587_v45  ;;  %v246_v49 = vpop.f32.mrf.mxu2 }
  0xad   :  { %651 = vst [vmem:[%s1148_s3 + $0x80] sm:$0xff] %v619_v47  ;;  %v359_v50 = vpop.f32.mrf.mxu3  ;;  %vm540_vm2 = vcmp.gt.f32.partialorder %v508_v48, 0.0  ;;  %v572_v51 = vmul.f32 0.2, %v508_v48 }
  0xae   :  { %v360_v52 = vadd.f32 %v359_v50, %v246_v49 }
  0xaf   :  { %v604_v53 = vsel %vm540_vm2, %v508_v48, %v572_v51 }
  0xb0   :  { %v524_v54 = vadd.f32 %v1015_v32, %v360_v52  ;;  %636 = vst [vmem:[%s1148_s3 + $0x8] sm:$0xff] %v604_v53  ;;  %v201_v55 = vpop.f32.mrf.mxu0  ;;  %v314_v56 = vpop.f32.mrf.mxu1 }
  0xb1   :  { %v315_v58 = vadd.f32 %v314_v56, %v201_v55 }
  0xb2   :  { %vm556_vm3 = vcmp.gt.f32.partialorder %v524_v54, 0.0  ;;  %v588_v57 = vmul.f32 0.2, %v524_v54 }
  0xb3   :  { %v509_v60 = vadd.f32 %v1015_v32, %v315_v58 }
  0xb4   :  { %v620_v59 = vsel %vm556_vm3, %v524_v54, %v588_v57  ;;  %v249_v61 = vpop.f32.mrf.mxu2 }
  0xb5   :  { %652 = vst [vmem:[%s1148_s3 + $0x88] sm:$0xff] %v620_v59  ;;  %v362_v62 = vpop.f32.mrf.mxu3  ;;  %vm541_vm4 = vcmp.gt.f32.partialorder %v509_v60, 0.0  ;;  %v573_v63 = vmul.f32 0.2, %v509_v60 }
  0xb6   :  { %v363_v0 = vadd.f32 %v362_v62, %v249_v61 }
  0xb7   :  { %v605_v1 = vsel %vm541_vm4, %v509_v60, %v573_v63 }
  0xb8   :  { %v525_v2 = vadd.f32 %v1015_v32, %v363_v0  ;;  %637 = vst [vmem:[%s1148_s3 + $0x10] sm:$0xff] %v605_v1  ;;  %v204_v3 = vpop.f32.mrf.mxu0  ;;  %v317_v4 = vpop.f32.mrf.mxu1 }
  0xb9   :  { %v318_v6 = vadd.f32 %v317_v4, %v204_v3 }
  0xba   :  { %vm557_vm5 = vcmp.gt.f32.partialorder %v525_v2, 0.0  ;;  %v589_v5 = vmul.f32 0.2, %v525_v2 }
  0xbb   :  { %v510_v8 = vadd.f32 %v1015_v32, %v318_v6 }
  0xbc   :  { %v621_v7 = vsel %vm557_vm5, %v525_v2, %v589_v5  ;;  %v252_v9 = vpop.f32.mrf.mxu2 }
  0xbd   :  { %653 = vst [vmem:[%s1148_s3 + $0x90] sm:$0xff] %v621_v7  ;;  %v365_v10 = vpop.f32.mrf.mxu3  ;;  %vm542_vm6 = vcmp.gt.f32.partialorder %v510_v8, 0.0  ;;  %v574_v11 = vmul.f32 0.2, %v510_v8 }
  0xbe   :  { %v366_v12 = vadd.f32 %v365_v10, %v252_v9 }
  0xbf   :  { %v606_v13 = vsel %vm542_vm6, %v510_v8, %v574_v11 }
  0xc0   :  { %v526_v14 = vadd.f32 %v1015_v32, %v366_v12  ;;  %638 = vst [vmem:[%s1148_s3 + $0x18] sm:$0xff] %v606_v13  ;;  %v207_v15 = vpop.f32.mrf.mxu0  ;;  %v320_v16 = vpop.f32.mrf.mxu1 }
  0xc1   :  { %v321_v18 = vadd.f32 %v320_v16, %v207_v15 }
  0xc2   :  { %vm558_vm7 = vcmp.gt.f32.partialorder %v526_v14, 0.0  ;;  %v590_v17 = vmul.f32 0.2, %v526_v14 }
  0xc3   :  { %v511_v20 = vadd.f32 %v1015_v32, %v321_v18 }
  0xc4   :  { %v622_v19 = vsel %vm558_vm7, %v526_v14, %v590_v17  ;;  %v255_v21 = vpop.f32.mrf.mxu2 }
  0xc5   :  { %654 = vst [vmem:[%s1148_s3 + $0x98] sm:$0xff] %v622_v19  ;;  %v368_v22 = vpop.f32.mrf.mxu3  ;;  %vm543_vm8 = vcmp.gt.f32.partialorder %v511_v20, 0.0  ;;  %v575_v23 = vmul.f32 0.2, %v511_v20 }
  0xc6   :  { %v369_v24 = vadd.f32 %v368_v22, %v255_v21 }
  0xc7   :  { %v607_v25 = vsel %vm543_vm8, %v511_v20, %v575_v23 }
  0xc8   :  { %v527_v26 = vadd.f32 %v1015_v32, %v369_v24  ;;  %639 = vst [vmem:[%s1148_s3 + $0x20] sm:$0xff] %v607_v25  ;;  %v210_v27 = vpop.f32.mrf.mxu0  ;;  %v323_v28 = vpop.f32.mrf.mxu1 }
  0xc9   :  { %v324_v30 = vadd.f32 %v323_v28, %v210_v27 }
  0xca   :  { %vm559_vm9 = vcmp.gt.f32.partialorder %v527_v26, 0.0  ;;  %v591_v29 = vmul.f32 0.2, %v527_v26 }
  0xcb   :  { %v512_v33 = vadd.f32 %v1015_v32, %v324_v30 }
  0xcc   :  { %v623_v31 = vsel %vm559_vm9, %v527_v26, %v591_v29  ;;  %v258_v34 = vpop.f32.mrf.mxu2 }
  0xcd   :  { %655 = vst [vmem:[%s1148_s3 + $0xa0] sm:$0xff] %v623_v31  ;;  %v371_v35 = vpop.f32.mrf.mxu3  ;;  %vm544_vm10 = vcmp.gt.f32.partialorder %v512_v33, 0.0  ;;  %v576_v36 = vmul.f32 0.2, %v512_v33 }
  0xce   :  { %v372_v37 = vadd.f32 %v371_v35, %v258_v34 }
  0xcf   :  { %v608_v38 = vsel %vm544_vm10, %v512_v33, %v576_v36 }
  0xd0   :  { %v528_v39 = vadd.f32 %v1015_v32, %v372_v37  ;;  %640 = vst [vmem:[%s1148_s3 + $0x28] sm:$0xff] %v608_v38  ;;  %v213_v40 = vpop.f32.mrf.mxu0  ;;  %v326_v41 = vpop.f32.mrf.mxu1 }
  0xd1   :  { %v327_v43 = vadd.f32 %v326_v41, %v213_v40 }
  0xd2   :  { %vm560_vm11 = vcmp.gt.f32.partialorder %v528_v39, 0.0  ;;  %v592_v42 = vmul.f32 0.2, %v528_v39 }
  0xd3   :  { %v513_v45 = vadd.f32 %v1015_v32, %v327_v43 }
  0xd4   :  { %v624_v44 = vsel %vm560_vm11, %v528_v39, %v592_v42  ;;  %v261_v46 = vpop.f32.mrf.mxu2 }
  0xd5   :  { %656 = vst [vmem:[%s1148_s3 + $0xa8] sm:$0xff] %v624_v44  ;;  %v374_v47 = vpop.f32.mrf.mxu3  ;;  %vm545_vm12 = vcmp.gt.f32.partialorder %v513_v45, 0.0  ;;  %v577_v48 = vmul.f32 0.2, %v513_v45 }
  0xd6   :  { %v375_v49 = vadd.f32 %v374_v47, %v261_v46 }
  0xd7   :  { %v609_v50 = vsel %vm545_vm12, %v513_v45, %v577_v48 }
  0xd8   :  { %v529_v51 = vadd.f32 %v1015_v32, %v375_v49  ;;  %641 = vst [vmem:[%s1148_s3 + $0x30] sm:$0xff] %v609_v50  ;;  %v216_v52 = vpop.f32.mrf.mxu0  ;;  %v329_v53 = vpop.f32.mrf.mxu1 }
  0xd9   :  { %v330_v55 = vadd.f32 %v329_v53, %v216_v52 }
  0xda   :  { %vm561_vm13 = vcmp.gt.f32.partialorder %v529_v51, 0.0  ;;  %v593_v54 = vmul.f32 0.2, %v529_v51 }
  0xdb   :  { %v514_v57 = vadd.f32 %v1015_v32, %v330_v55 }
  0xdc   :  { %v625_v56 = vsel %vm561_vm13, %v529_v51, %v593_v54  ;;  %v264_v58 = vpop.f32.mrf.mxu2 }
  0xdd   :  { %657 = vst [vmem:[%s1148_s3 + $0xb0] sm:$0xff] %v625_v56  ;;  %v377_v59 = vpop.f32.mrf.mxu3  ;;  %vm546_vm14 = vcmp.gt.f32.partialorder %v514_v57, 0.0  ;;  %v578_v60 = vmul.f32 0.2, %v514_v57 }
  0xde   :  { %v378_v61 = vadd.f32 %v377_v59, %v264_v58 }
  0xdf   :  { %v610_v62 = vsel %vm546_vm14, %v514_v57, %v578_v60 }
  0xe0   :  { %v530_v63 = vadd.f32 %v1015_v32, %v378_v61  ;;  %642 = vst [vmem:[%s1148_s3 + $0x38] sm:$0xff] %v610_v62  ;;  %v219_v0 = vpop.f32.mrf.mxu0  ;;  %v332_v1 = vpop.f32.mrf.mxu1 }
  0xe1   :  { %v333_v3 = vadd.f32 %v332_v1, %v219_v0 }
  0xe2   :  { %vm562_vm15 = vcmp.gt.f32.partialorder %v530_v63, 0.0  ;;  %v594_v2 = vmul.f32 0.2, %v530_v63 }
  0xe3   :  { %v515_v5 = vadd.f32 %v1015_v32, %v333_v3 }
  0xe4   :  { %v626_v4 = vsel %vm562_vm15, %v530_v63, %v594_v2  ;;  %v267_v6 = vpop.f32.mrf.mxu2 }
  0xe5   :  { %658 = vst [vmem:[%s1148_s3 + $0xb8] sm:$0xff] %v626_v4  ;;  %v380_v7 = vpop.f32.mrf.mxu3  ;;  %vm547_vm0 = vcmp.gt.f32.partialorder %v515_v5, 0.0  ;;  %v579_v8 = vmul.f32 0.2, %v515_v5 }
  0xe6   :  { %v381_v9 = vadd.f32 %v380_v7, %v267_v6 }
  0xe7   :  { %v611_v10 = vsel %vm547_vm0, %v515_v5, %v579_v8 }
  0xe8   :  { %v531_v11 = vadd.f32 %v1015_v32, %v381_v9  ;;  %643 = vst [vmem:[%s1148_s3 + $0x40] sm:$0xff] %v611_v10  ;;  %v222_v12 = vpop.f32.mrf.mxu0  ;;  %v335_v13 = vpop.f32.mrf.mxu1 }
  0xe9   :  { %v336_v15 = vadd.f32 %v335_v13, %v222_v12 }
  0xea   :  { %vm563_vm1 = vcmp.gt.f32.partialorder %v531_v11, 0.0  ;;  %v595_v14 = vmul.f32 0.2, %v531_v11 }
  0xeb   :  { %v516_v17 = vadd.f32 %v1015_v32, %v336_v15 }
  0xec   :  { %v627_v16 = vsel %vm563_vm1, %v531_v11, %v595_v14  ;;  %v270_v18 = vpop.f32.mrf.mxu2 }
  0xed   :  { %659 = vst [vmem:[%s1148_s3 + $0xc0] sm:$0xff] %v627_v16  ;;  %v383_v19 = vpop.f32.mrf.mxu3  ;;  %vm548_vm2 = vcmp.gt.f32.partialorder %v516_v17, 0.0  ;;  %v580_v20 = vmul.f32 0.2, %v516_v17 }
  0xee   :  { %v384_v21 = vadd.f32 %v383_v19, %v270_v18 }
  0xef   :  { %v612_v22 = vsel %vm548_vm2, %v516_v17, %v580_v20 }
  0xf0   :  { %v532_v23 = vadd.f32 %v1015_v32, %v384_v21  ;;  %644 = vst [vmem:[%s1148_s3 + $0x48] sm:$0xff] %v612_v22  ;;  %v225_v24 = vpop.f32.mrf.mxu0  ;;  %v338_v25 = vpop.f32.mrf.mxu1 }
  0xf1   :  { %v339_v27 = vadd.f32 %v338_v25, %v225_v24 }
  0xf2   :  { %vm564_vm3 = vcmp.gt.f32.partialorder %v532_v23, 0.0  ;;  %v596_v26 = vmul.f32 0.2, %v532_v23 }
  0xf3   :  { %v517_v29 = vadd.f32 %v1015_v32, %v339_v27 }
  0xf4   :  { %v628_v28 = vsel %vm564_vm3, %v532_v23, %v596_v26  ;;  %v273_v30 = vpop.f32.mrf.mxu2 }
  0xf5   :  { %660 = vst [vmem:[%s1148_s3 + $0xc8] sm:$0xff] %v628_v28  ;;  %v386_v31 = vpop.f32.mrf.mxu3  ;;  %vm549_vm4 = vcmp.gt.f32.partialorder %v517_v29, 0.0  ;;  %v581_v33 = vmul.f32 0.2, %v517_v29 }
  0xf6   :  { %v387_v34 = vadd.f32 %v386_v31, %v273_v30 }
  0xf7   :  { %v613_v35 = vsel %vm549_vm4, %v517_v29, %v581_v33 }
  0xf8   :  { %v533_v36 = vadd.f32 %v1015_v32, %v387_v34  ;;  %645 = vst [vmem:[%s1148_s3 + $0x50] sm:$0xff] %v613_v35  ;;  %v228_v37 = vpop.f32.mrf.mxu0  ;;  %v341_v38 = vpop.f32.mrf.mxu1 }
  0xf9   :  { %v342_v40 = vadd.f32 %v341_v38, %v228_v37 }
  0xfa   :  { %vm565_vm5 = vcmp.gt.f32.partialorder %v533_v36, 0.0  ;;  %v597_v39 = vmul.f32 0.2, %v533_v36 }
  0xfb   :  { %v518_v42 = vadd.f32 %v1015_v32, %v342_v40 }
  0xfc   :  { %v629_v41 = vsel %vm565_vm5, %v533_v36, %v597_v39  ;;  %v276_v43 = vpop.f32.mrf.mxu2 }
  0xfd   :  { %661 = vst [vmem:[%s1148_s3 + $0xd0] sm:$0xff] %v629_v41  ;;  %v389_v44 = vpop.f32.mrf.mxu3  ;;  %vm550_vm6 = vcmp.gt.f32.partialorder %v518_v42, 0.0  ;;  %v582_v45 = vmul.f32 0.2, %v518_v42 }
  0xfe   :  { %v390_v46 = vadd.f32 %v389_v44, %v276_v43 }
  0xff   :  { %v614_v47 = vsel %vm550_vm6, %v518_v42, %v582_v45 }
 0x100   :  { %v534_v48 = vadd.f32 %v1015_v32, %v390_v46  ;;  %646 = vst [vmem:[%s1148_s3 + $0x58] sm:$0xff] %v614_v47  ;;  %v231_v49 = vpop.f32.mrf.mxu0  ;;  %v344_v50 = vpop.f32.mrf.mxu1 }
 0x101   :  { %v345_v52 = vadd.f32 %v344_v50, %v231_v49 }
 0x102   :  { %vm566_vm7 = vcmp.gt.f32.partialorder %v534_v48, 0.0  ;;  %v598_v51 = vmul.f32 0.2, %v534_v48 }
 0x103   :  { %v519_v54 = vadd.f32 %v1015_v32, %v345_v52 }
 0x104   :  { %v630_v53 = vsel %vm566_vm7, %v534_v48, %v598_v51  ;;  %v279_v55 = vpop.f32.mrf.mxu2 }
 0x105   :  { %662 = vst [vmem:[%s1148_s3 + $0xd8] sm:$0xff] %v630_v53  ;;  %v392_v56 = vpop.f32.mrf.mxu3  ;;  %vm551_vm8 = vcmp.gt.f32.partialorder %v519_v54, 0.0  ;;  %v583_v57 = vmul.f32 0.2, %v519_v54 }
 0x106   :  { %v393_v58 = vadd.f32 %v392_v56, %v279_v55 }
 0x107   :  { %v615_v59 = vsel %vm551_vm8, %v519_v54, %v583_v57 }
 0x108   :  { %v535_v60 = vadd.f32 %v1015_v32, %v393_v58  ;;  %647 = vst [vmem:[%s1148_s3 + $0x60] sm:$0xff] %v615_v59  ;;  %v234_v61 = vpop.f32.mrf.mxu0  ;;  %v347_v62 = vpop.f32.mrf.mxu1 }
 0x109   :  { %v348_v0 = vadd.f32 %v347_v62, %v234_v61 }
 0x10a   :  { %vm567_vm9 = vcmp.gt.f32.partialorder %v535_v60, 0.0  ;;  %v599_v63 = vmul.f32 0.2, %v535_v60 }
 0x10b   :  { %v520_v2 = vadd.f32 %v1015_v32, %v348_v0 }
 0x10c   :  { %v631_v1 = vsel %vm567_vm9, %v535_v60, %v599_v63  ;;  %v282_v3 = vpop.f32.mrf.mxu2 }
 0x10d   :  { %663 = vst [vmem:[%s1148_s3 + $0xe0] sm:$0xff] %v631_v1  ;;  %v395_v4 = vpop.f32.mrf.mxu3  ;;  %vm552_vm10 = vcmp.gt.f32.partialorder %v520_v2, 0.0  ;;  %v584_v5 = vmul.f32 0.2, %v520_v2 }
 0x10e   :  { %v396_v6 = vadd.f32 %v395_v4, %v282_v3 }
 0x10f   :  { %v616_v7 = vsel %vm552_vm10, %v520_v2, %v584_v5 }
 0x110   :  { %v536_v8 = vadd.f32 %v1015_v32, %v396_v6  ;;  %648 = vst [vmem:[%s1148_s3 + $0x68] sm:$0xff] %v616_v7  ;;  %v237_v9 = vpop.f32.mrf.mxu0  ;;  %v350_v10 = vpop.f32.mrf.mxu1 }
 0x111   :  { %v351_v12 = vadd.f32 %v350_v10, %v237_v9 }
 0x112   :  { %vm568_vm11 = vcmp.gt.f32.partialorder %v536_v8, 0.0  ;;  %v600_v11 = vmul.f32 0.2, %v536_v8 }
 0x113   :  { %v521_v14 = vadd.f32 %v1015_v32, %v351_v12 }
 0x114   :  { %v632_v13 = vsel %vm568_vm11, %v536_v8, %v600_v11  ;;  %v285_v15 = vpop.f32.mrf.mxu2 }
 0x115   :  { %664 = vst [vmem:[%s1148_s3 + $0xe8] sm:$0xff] %v632_v13  ;;  %v398_v16 = vpop.f32.mrf.mxu3  ;;  %vm553_vm12 = vcmp.gt.f32.partialorder %v521_v14, 0.0  ;;  %v585_v17 = vmul.f32 0.2, %v521_v14 }
 0x116   :  { %v399_v18 = vadd.f32 %v398_v16, %v285_v15 }
 0x117   :  { %v617_v19 = vsel %vm553_vm12, %v521_v14, %v585_v17 }
 0x118   :  { %v537_v20 = vadd.f32 %v1015_v32, %v399_v18  ;;  %649 = vst [vmem:[%s1148_s3 + $0x70] sm:$0xff] %v617_v19  ;;  %v240_v21 = vpop.f32.mrf.mxu0  ;;  %v353_v22 = vpop.f32.mrf.mxu1 }
 0x119   :  { %v354_v24 = vadd.f32 %v353_v22, %v240_v21 }
 0x11a   :  { %vm569_vm13 = vcmp.gt.f32.partialorder %v537_v20, 0.0  ;;  %v601_v23 = vmul.f32 0.2, %v537_v20 }
 0x11b   :  { %v522_v26 = vadd.f32 %v1015_v32, %v354_v24 }
 0x11c   :  { %v633_v25 = vsel %vm569_vm13, %v537_v20, %v601_v23  ;;  %v288_v27 = vpop.f32.mrf.mxu2 }
 0x11d   :  { %665 = vst [vmem:[%s1148_s3 + $0xf0] sm:$0xff] %v633_v25  ;;  %v401_v28 = vpop.f32.mrf.mxu3  ;;  %vm554_vm14 = vcmp.gt.f32.partialorder %v522_v26, 0.0  ;;  %v586_v29 = vmul.f32 0.2, %v522_v26 }
 0x11e   :  { %v402_v30 = vadd.f32 %v401_v28, %v288_v27 }
 0x11f   :  { %v618_v31 = vsel %vm554_vm14, %v522_v26, %v586_v29 }
 0x120   :  { %v538_v33 = vadd.f32 %v1015_v32, %v402_v30  ;;  %650 = vst [vmem:[%s1148_s3 + $0x78] sm:$0xff] %v618_v31 }
 0x122   :  { %vm570_vm15 = vcmp.gt.f32.partialorder %v538_v33, 0.0  ;;  %v602_v34 = vmul.f32 0.2, %v538_v33 }
 0x124   :  { %v634_v35 = vsel %vm570_vm15, %v538_v33, %v602_v34 }
 0x125   :  { %666 = vst [vmem:[%s1148_s3 + $0xf8] sm:$0xff] %v634_v35 }

// kernel: last_layer_single_forward.16
= control target key start
LH: loop header
LB: loop body
LE: loop exit
PB: predicated region body
PF: predicated region fallthrough
CT: control target
= control target key end

     0   :  { %s1276_s1 = inlined_call_operand.vmem [shape: f32[128,256], index: 1, kind: input, shape index: {}]   ;;  %s1277_s0 = inlined_call_operand.vmem [shape: f32[256,128], index: 0, kind: input, shape index: {}]   ;;  %s1278_s2 = inlined_call_operand.vmem [shape: f32[1,256], index: 2, kind: input, shape index: {}]   ;;  %s1279_s3 = inlined_call_operand.vmem [shape: f32[256,256], index: 3, kind: output, shape index: {}]  }
   0x1   :  { %v208_v0 = vld [vmem:[%s1276_s1 + $0xf0] sm:$0xff]  ;;  %v209_v1 = vld [vmem:[%s1276_s1 + $0xf8] sm:$0xff]  ;;  %v206_v2 = vld [vmem:[%s1276_s1 + $0xe0] sm:$0xff] }
   0x2   :  { %769 = vmatpush.msra.mxu2 %v208_v0  ;;  %785 = vmatpush.msra.mxu3 %v209_v1  ;;  %v207_v3 = vld [vmem:[%s1276_s1 + $0xe8] sm:$0xff]  ;;  %v204_v4 = vld [vmem:[%s1276_s1 + $0xd0] sm:$0xff]  ;;  %v205_v5 = vld [vmem:[%s1276_s1 + $0xd8] sm:$0xff] }
   0x3   :  { %210 = vmatpush.msra.mxu0 %v208_v0  ;;  %323 = vmatpush.msra.mxu1 %v209_v1  ;;  %v202_v6 = vld [vmem:[%s1276_s1 + $0xc0] sm:$0xff]  ;;  %v203_v7 = vld [vmem:[%s1276_s1 + $0xc8] sm:$0xff]  ;;  %v200_v8 = vld [vmem:[%s1276_s1 + $0xb0] sm:$0xff] }
   0x4   :  { %770 = vmatpush.msra.mxu2 %v206_v2  ;;  %786 = vmatpush.msra.mxu3 %v207_v3  ;;  %v201_v9 = vld [vmem:[%s1276_s1 + $0xb8] sm:$0xff]  ;;  %v198_v10 = vld [vmem:[%s1276_s1 + $0xa0] sm:$0xff]  ;;  %v199_v11 = vld [vmem:[%s1276_s1 + $0xa8] sm:$0xff] }
   0x5   :  { %211 = vmatpush.msra.mxu0 %v206_v2  ;;  %324 = vmatpush.msra.mxu1 %v207_v3  ;;  %v196_v12 = vld [vmem:[%s1276_s1 + $0x90] sm:$0xff]  ;;  %v197_v13 = vld [vmem:[%s1276_s1 + $0x98] sm:$0xff]  ;;  %v194_v14 = vld [vmem:[%s1276_s1 + $0x80] sm:$0xff] }
   0x6   :  { %771 = vmatpush.msra.mxu2 %v204_v4  ;;  %787 = vmatpush.msra.mxu3 %v205_v5  ;;  %v195_v15 = vld [vmem:[%s1276_s1 + $0x88] sm:$0xff]  ;;  %v192_v16 = vld [vmem:[%s1276_s1 + $0x70] sm:$0xff]  ;;  %v193_v17 = vld [vmem:[%s1276_s1 + $0x78] sm:$0xff] }
   0x7   :  { %212 = vmatpush.msra.mxu0 %v204_v4  ;;  %325 = vmatpush.msra.mxu1 %v205_v5  ;;  %v190_v18 = vld [vmem:[%s1276_s1 + $0x60] sm:$0xff]  ;;  %v191_v19 = vld [vmem:[%s1276_s1 + $0x68] sm:$0xff]  ;;  %v188_v20 = vld [vmem:[%s1276_s1 + $0x50] sm:$0xff] }
   0x8   :  { %772 = vmatpush.msra.mxu2 %v202_v6  ;;  %788 = vmatpush.msra.mxu3 %v203_v7  ;;  %v189_v21 = vld [vmem:[%s1276_s1 + $0x58] sm:$0xff]  ;;  %v186_v22 = vld [vmem:[%s1276_s1 + $0x40] sm:$0xff]  ;;  %v187_v23 = vld [vmem:[%s1276_s1 + $0x48] sm:$0xff] }
   0x9   :  { %213 = vmatpush.msra.mxu0 %v202_v6  ;;  %326 = vmatpush.msra.mxu1 %v203_v7  ;;  %v184_v24 = vld [vmem:[%s1276_s1 + $0x30] sm:$0xff]  ;;  %v185_v25 = vld [vmem:[%s1276_s1 + $0x38] sm:$0xff]  ;;  %v182_v26 = vld [vmem:[%s1276_s1 + $0x20] sm:$0xff] }
   0xa   :  { %773 = vmatpush.msra.mxu2 %v200_v8  ;;  %789 = vmatpush.msra.mxu3 %v201_v9  ;;  %v183_v27 = vld [vmem:[%s1276_s1 + $0x28] sm:$0xff]  ;;  %v180_v28 = vld [vmem:[%s1276_s1 + $0x10] sm:$0xff]  ;;  %v181_v29 = vld [vmem:[%s1276_s1 + $0x18] sm:$0xff] }
   0xb   :  { %214 = vmatpush.msra.mxu0 %v200_v8  ;;  %327 = vmatpush.msra.mxu1 %v201_v9  ;;  %v178_v30 = vld [vmem:[%s1276_s1] sm:$0xff]  ;;  %v179_v31 = vld [vmem:[%s1276_s1 + $0x8] sm:$0xff]  ;;  %v164_v36 = vld [vmem:[%s1277_s0 + $0x90] sm:$0xff] }
   0xc   :  { %774 = vmatpush.msra.mxu2 %v198_v10  ;;  %790 = vmatpush.msra.mxu3 %v199_v11  ;;  %v162_v32 = vld [vmem:[%s1277_s0 + $0x80] sm:$0xff]  ;;  %v163_v34 = vld [vmem:[%s1277_s0 + $0x88] sm:$0xff]  ;;  %v148_v37 = vld [vmem:[%s1277_s0 + $0x10] sm:$0xff] }
   0xd   :  { %215 = vmatpush.msra.mxu0 %v198_v10  ;;  %328 = vmatpush.msra.mxu1 %v199_v11  ;;  %v146_v33 = vld [vmem:[%s1277_s0] sm:$0xff]  ;;  %v147_v35 = vld [vmem:[%s1277_s0 + $0x8] sm:$0xff]  ;;  %v165_v38 = vld [vmem:[%s1277_s0 + $0x98] sm:$0xff] }
   0xe   :  { %775 = vmatpush.msra.mxu2 %v196_v12  ;;  %791 = vmatpush.msra.mxu3 %v197_v13  ;;  %v149_v39 = vld [vmem:[%s1277_s0 + $0x18] sm:$0xff]  ;;  %v166_v40 = vld [vmem:[%s1277_s0 + $0xa0] sm:$0xff]  ;;  %v167_v42 = vld [vmem:[%s1277_s0 + $0xa8] sm:$0xff] }
   0xf   :  { %216 = vmatpush.msra.mxu0 %v196_v12  ;;  %329 = vmatpush.msra.mxu1 %v197_v13  ;;  %v150_v41 = vld [vmem:[%s1277_s0 + $0x20] sm:$0xff]  ;;  %v151_v43 = vld [vmem:[%s1277_s0 + $0x28] sm:$0xff]  ;;  %v168_v44 = vld [vmem:[%s1277_s0 + $0xb0] sm:$0xff] }
  0x10   :  { %776 = vmatpush.msra.mxu2 %v194_v14  ;;  %792 = vmatpush.msra.mxu3 %v195_v15  ;;  %v152_v45 = vld [vmem:[%s1277_s0 + $0x30] sm:$0xff]  ;;  %v169_v46 = vld [vmem:[%s1277_s0 + $0xb8] sm:$0xff]  ;;  %v170_v48 = vld [vmem:[%s1277_s0 + $0xc0] sm:$0xff] }
  0x11   :  { %217 = vmatpush.msra.mxu0 %v194_v14  ;;  %330 = vmatpush.msra.mxu1 %v195_v15  ;;  %v153_v47 = vld [vmem:[%s1277_s0 + $0x38] sm:$0xff]  ;;  %v154_v49 = vld [vmem:[%s1277_s0 + $0x40] sm:$0xff]  ;;  %v171_v50 = vld [vmem:[%s1277_s0 + $0xc8] sm:$0xff] }
  0x12   :  { %777 = vmatpush.msra.mxu2 %v192_v16  ;;  %793 = vmatpush.msra.mxu3 %v193_v17  ;;  %v155_v51 = vld [vmem:[%s1277_s0 + $0x48] sm:$0xff]  ;;  %v172_v52 = vld [vmem:[%s1277_s0 + $0xd0] sm:$0xff]  ;;  %v173_v54 = vld [vmem:[%s1277_s0 + $0xd8] sm:$0xff] }
  0x13   :  { %218 = vmatpush.msra.mxu0 %v192_v16  ;;  %331 = vmatpush.msra.mxu1 %v193_v17  ;;  %v156_v53 = vld [vmem:[%s1277_s0 + $0x50] sm:$0xff]  ;;  %v157_v55 = vld [vmem:[%s1277_s0 + $0x58] sm:$0xff]  ;;  %v174_v56 = vld [vmem:[%s1277_s0 + $0xe0] sm:$0xff] }
  0x14   :  { %778 = vmatpush.msra.mxu2 %v190_v18  ;;  %794 = vmatpush.msra.mxu3 %v191_v19  ;;  %v158_v57 = vld [vmem:[%s1277_s0 + $0x60] sm:$0xff]  ;;  %v175_v58 = vld [vmem:[%s1277_s0 + $0xe8] sm:$0xff]  ;;  %v176_v60 = vld [vmem:[%s1277_s0 + $0xf0] sm:$0xff] }
  0x15   :  { %219 = vmatpush.msra.mxu0 %v190_v18  ;;  %332 = vmatpush.msra.mxu1 %v191_v19  ;;  %v159_v59 = vld [vmem:[%s1277_s0 + $0x68] sm:$0xff]  ;;  %v160_v61 = vld [vmem:[%s1277_s0 + $0x70] sm:$0xff]  ;;  %v177_v62 = vld [vmem:[%s1277_s0 + $0xf8] sm:$0xff] }
  0x16   :  { %779 = vmatpush.msra.mxu2 %v188_v20  ;;  %795 = vmatpush.msra.mxu3 %v189_v21  ;;  %v161_v63 = vld [vmem:[%s1277_s0 + $0x78] sm:$0xff]  ;;  %v631_v0 = vld [vmem:[%s1278_s2] sm:$0x3] }
  0x17   :  { %220 = vmatpush.msra.mxu0 %v188_v20  ;;  %333 = vmatpush.msra.mxu1 %v189_v21  ;;  %v1016_v1 = vperm.slane %v631_v0, 0  ;;  %v1018_v2 = vperm.slane %v631_v0, 1 }
  0x18   :  { %780 = vmatpush.msra.mxu2 %v186_v22  ;;  %796 = vmatpush.msra.mxu3 %v187_v23 }
  0x19   :  { %221 = vmatpush.msra.mxu0 %v186_v22  ;;  %334 = vmatpush.msra.mxu1 %v187_v23 }
  0x1a   :  { %781 = vmatpush.msra.mxu2 %v184_v24  ;;  %797 = vmatpush.msra.mxu3 %v185_v25 }
  0x1b   :  { %222 = vmatpush.msra.mxu0 %v184_v24  ;;  %335 = vmatpush.msra.mxu1 %v185_v25 }
  0x1c   :  { %782 = vmatpush.msra.mxu2 %v182_v26  ;;  %798 = vmatpush.msra.mxu3 %v183_v27 }
  0x1d   :  { %223 = vmatpush.msra.mxu0 %v182_v26  ;;  %336 = vmatpush.msra.mxu1 %v183_v27 }
  0x1e   :  { %783 = vmatpush.msra.mxu2 %v180_v28  ;;  %799 = vmatpush.msra.mxu3 %v181_v29 }
  0x1f   :  { %224 = vmatpush.msra.mxu0 %v180_v28  ;;  %337 = vmatpush.msra.mxu1 %v181_v29 }
  0x20   :  { %784 = vmatpush.msra.mxu2 %v178_v30  ;;  %800 = vmatpush.msra.mxu3 %v179_v31 }
  0x21   :  { %274 = vmatmul.f32.vlgmr.msra.gmra.mxu2 %v162_v32  ;;  %387 = vmatmul.f32.vlgmr.msra.gmra.mxu3 %v162_v32 }
  0x22   :  { %225 = vmatpush.msra.mxu0 %v178_v30  ;;  %338 = vmatpush.msra.mxu1 %v179_v31 }
  0x23   :  { %226 = vmatmul.f32.vlgmr.msra.gmra.mxu0 %v146_v33  ;;  %339 = vmatmul.f32.vlgmr.msra.gmra.mxu1 %v146_v33 }
  0x29   :  { %277 = vmatmul.f32.gmra.mxu2 %v163_v34  ;;  %390 = vmatmul.f32.gmra.mxu3 %v163_v34 }
  0x2b   :  { %229 = vmatmul.f32.gmra.mxu0 %v147_v35  ;;  %342 = vmatmul.f32.gmra.mxu1 %v147_v35 }
  0x31   :  { %280 = vmatmul.f32.gmra.mxu2 %v164_v36  ;;  %393 = vmatmul.f32.gmra.mxu3 %v164_v36 }
  0x33   :  { %232 = vmatmul.f32.gmra.mxu0 %v148_v37  ;;  %345 = vmatmul.f32.gmra.mxu1 %v148_v37 }
  0x39   :  { %283 = vmatmul.f32.gmra.mxu2 %v165_v38  ;;  %396 = vmatmul.f32.gmra.mxu3 %v165_v38 }
  0x3b   :  { %235 = vmatmul.f32.gmra.mxu0 %v149_v39  ;;  %348 = vmatmul.f32.gmra.mxu1 %v149_v39 }
  0x41   :  { %286 = vmatmul.f32.gmra.mxu2 %v166_v40  ;;  %399 = vmatmul.f32.gmra.mxu3 %v166_v40 }
  0x43   :  { %238 = vmatmul.f32.gmra.mxu0 %v150_v41  ;;  %351 = vmatmul.f32.gmra.mxu1 %v150_v41 }
  0x49   :  { %289 = vmatmul.f32.gmra.mxu2 %v167_v42  ;;  %402 = vmatmul.f32.gmra.mxu3 %v167_v42 }
  0x4b   :  { %241 = vmatmul.f32.gmra.mxu0 %v151_v43  ;;  %354 = vmatmul.f32.gmra.mxu1 %v151_v43 }
  0x51   :  { %292 = vmatmul.f32.gmra.mxu2 %v168_v44  ;;  %405 = vmatmul.f32.gmra.mxu3 %v168_v44 }
  0x53   :  { %244 = vmatmul.f32.gmra.mxu0 %v152_v45  ;;  %357 = vmatmul.f32.gmra.mxu1 %v152_v45 }
  0x59   :  { %295 = vmatmul.f32.gmra.mxu2 %v169_v46  ;;  %408 = vmatmul.f32.gmra.mxu3 %v169_v46 }
  0x5b   :  { %247 = vmatmul.f32.gmra.mxu0 %v153_v47  ;;  %360 = vmatmul.f32.gmra.mxu1 %v153_v47 }
  0x61   :  { %298 = vmatmul.f32.gmra.mxu2 %v170_v48  ;;  %411 = vmatmul.f32.gmra.mxu3 %v170_v48 }
  0x63   :  { %250 = vmatmul.f32.gmra.mxu0 %v154_v49  ;;  %363 = vmatmul.f32.gmra.mxu1 %v154_v49 }
  0x69   :  { %301 = vmatmul.f32.gmra.mxu2 %v171_v50  ;;  %414 = vmatmul.f32.gmra.mxu3 %v171_v50 }
  0x6b   :  { %253 = vmatmul.f32.gmra.mxu0 %v155_v51  ;;  %366 = vmatmul.f32.gmra.mxu1 %v155_v51 }
  0x71   :  { %304 = vmatmul.f32.gmra.mxu2 %v172_v52  ;;  %417 = vmatmul.f32.gmra.mxu3 %v172_v52 }
  0x73   :  { %256 = vmatmul.f32.gmra.mxu0 %v156_v53  ;;  %369 = vmatmul.f32.gmra.mxu1 %v156_v53 }
  0x79   :  { %307 = vmatmul.f32.gmra.mxu2 %v173_v54  ;;  %420 = vmatmul.f32.gmra.mxu3 %v173_v54 }
  0x7b   :  { %259 = vmatmul.f32.gmra.mxu0 %v157_v55  ;;  %372 = vmatmul.f32.gmra.mxu1 %v157_v55 }
  0x81   :  { %310 = vmatmul.f32.gmra.mxu2 %v174_v56  ;;  %423 = vmatmul.f32.gmra.mxu3 %v174_v56 }
  0x83   :  { %262 = vmatmul.f32.gmra.mxu0 %v158_v57  ;;  %375 = vmatmul.f32.gmra.mxu1 %v158_v57 }
  0x89   :  { %313 = vmatmul.f32.gmra.mxu2 %v175_v58  ;;  %426 = vmatmul.f32.gmra.mxu3 %v175_v58 }
  0x8b   :  { %265 = vmatmul.f32.gmra.mxu0 %v159_v59  ;;  %378 = vmatmul.f32.gmra.mxu1 %v159_v59 }
  0x91   :  { %316 = vmatmul.f32.gmra.mxu2 %v176_v60  ;;  %429 = vmatmul.f32.gmra.mxu3 %v176_v60 }
  0x93   :  { %268 = vmatmul.f32.gmra.mxu0 %v160_v61  ;;  %381 = vmatmul.f32.gmra.mxu1 %v160_v61 }
  0x99   :  { %319 = vmatmul.f32.gmra.mxu2 %v177_v62  ;;  %432 = vmatmul.f32.gmra.mxu3 %v177_v62 }
  0x9b   :  { %271 = vmatmul.f32.gmra.mxu0 %v161_v63  ;;  %384 = vmatmul.f32.gmra.mxu1 %v161_v63 }
  0xa0   :  { %v227_v3 = vpop.f32.mrf.mxu0  ;;  %v340_v4 = vpop.f32.mrf.mxu1 }
  0xa1   :  { %v637_v5 = vadd.f32 %v1016_v1, %v227_v3  ;;  %v638_v6 = vadd.f32 %v1018_v2, %v340_v4 }
  0xa3   :  { %701 = vst [vmem:[%s1279_s3] sm:$0xff] %v637_v5 }
  0xa4   :  { %v275_v7 = vpop.f32.mrf.mxu2  ;;  %702 = vst [vmem:[%s1279_s3 + $0x8] sm:$0xff] %v638_v6  ;;  %v388_v8 = vpop.f32.mrf.mxu3 }
  0xa5   :  { %v669_v9 = vadd.f32 %v1016_v1, %v275_v7  ;;  %v670_v10 = vadd.f32 %v1018_v2, %v388_v8 }
  0xa7   :  { %733 = vst [vmem:[%s1279_s3 + $0x100] sm:$0xff] %v669_v9 }
  0xa8   :  { %734 = vst [vmem:[%s1279_s3 + $0x108] sm:$0xff] %v670_v10  ;;  %v230_v11 = vpop.f32.mrf.mxu0  ;;  %v343_v12 = vpop.f32.mrf.mxu1 }
  0xa9   :  { %v639_v13 = vadd.f32 %v1016_v1, %v230_v11  ;;  %v640_v14 = vadd.f32 %v1018_v2, %v343_v12 }
  0xab   :  { %703 = vst [vmem:[%s1279_s3 + $0x10] sm:$0xff] %v639_v13 }
  0xac   :  { %v278_v15 = vpop.f32.mrf.mxu2  ;;  %704 = vst [vmem:[%s1279_s3 + $0x18] sm:$0xff] %v640_v14  ;;  %v391_v16 = vpop.f32.mrf.mxu3 }
  0xad   :  { %v671_v17 = vadd.f32 %v1016_v1, %v278_v15  ;;  %v672_v18 = vadd.f32 %v1018_v2, %v391_v16 }
  0xaf   :  { %735 = vst [vmem:[%s1279_s3 + $0x110] sm:$0xff] %v671_v17 }
  0xb0   :  { %736 = vst [vmem:[%s1279_s3 + $0x118] sm:$0xff] %v672_v18  ;;  %v233_v19 = vpop.f32.mrf.mxu0  ;;  %v346_v20 = vpop.f32.mrf.mxu1 }
  0xb1   :  { %v641_v21 = vadd.f32 %v1016_v1, %v233_v19  ;;  %v642_v22 = vadd.f32 %v1018_v2, %v346_v20 }
  0xb3   :  { %705 = vst [vmem:[%s1279_s3 + $0x20] sm:$0xff] %v641_v21 }
  0xb4   :  { %v281_v23 = vpop.f32.mrf.mxu2  ;;  %706 = vst [vmem:[%s1279_s3 + $0x28] sm:$0xff] %v642_v22  ;;  %v394_v24 = vpop.f32.mrf.mxu3 }
  0xb5   :  { %v673_v25 = vadd.f32 %v1016_v1, %v281_v23  ;;  %v674_v26 = vadd.f32 %v1018_v2, %v394_v24 }
  0xb7   :  { %737 = vst [vmem:[%s1279_s3 + $0x120] sm:$0xff] %v673_v25 }
  0xb8   :  { %738 = vst [vmem:[%s1279_s3 + $0x128] sm:$0xff] %v674_v26  ;;  %v236_v27 = vpop.f32.mrf.mxu0  ;;  %v349_v28 = vpop.f32.mrf.mxu1 }
  0xb9   :  { %v643_v29 = vadd.f32 %v1016_v1, %v236_v27  ;;  %v644_v30 = vadd.f32 %v1018_v2, %v349_v28 }
  0xbb   :  { %707 = vst [vmem:[%s1279_s3 + $0x30] sm:$0xff] %v643_v29 }
  0xbc   :  { %v284_v31 = vpop.f32.mrf.mxu2  ;;  %708 = vst [vmem:[%s1279_s3 + $0x38] sm:$0xff] %v644_v30  ;;  %v397_v32 = vpop.f32.mrf.mxu3 }
  0xbd   :  { %v675_v33 = vadd.f32 %v1016_v1, %v284_v31  ;;  %v676_v34 = vadd.f32 %v1018_v2, %v397_v32 }
  0xbf   :  { %739 = vst [vmem:[%s1279_s3 + $0x130] sm:$0xff] %v675_v33 }
  0xc0   :  { %740 = vst [vmem:[%s1279_s3 + $0x138] sm:$0xff] %v676_v34  ;;  %v239_v35 = vpop.f32.mrf.mxu0  ;;  %v352_v36 = vpop.f32.mrf.mxu1 }
  0xc1   :  { %v645_v37 = vadd.f32 %v1016_v1, %v239_v35  ;;  %v646_v38 = vadd.f32 %v1018_v2, %v352_v36 }
  0xc3   :  { %709 = vst [vmem:[%s1279_s3 + $0x40] sm:$0xff] %v645_v37 }
  0xc4   :  { %v287_v39 = vpop.f32.mrf.mxu2  ;;  %710 = vst [vmem:[%s1279_s3 + $0x48] sm:$0xff] %v646_v38  ;;  %v400_v40 = vpop.f32.mrf.mxu3 }
  0xc5   :  { %v677_v41 = vadd.f32 %v1016_v1, %v287_v39  ;;  %v678_v42 = vadd.f32 %v1018_v2, %v400_v40 }
  0xc7   :  { %741 = vst [vmem:[%s1279_s3 + $0x140] sm:$0xff] %v677_v41 }
  0xc8   :  { %742 = vst [vmem:[%s1279_s3 + $0x148] sm:$0xff] %v678_v42  ;;  %v242_v43 = vpop.f32.mrf.mxu0  ;;  %v355_v44 = vpop.f32.mrf.mxu1 }
  0xc9   :  { %v647_v45 = vadd.f32 %v1016_v1, %v242_v43  ;;  %v648_v46 = vadd.f32 %v1018_v2, %v355_v44 }
  0xcb   :  { %711 = vst [vmem:[%s1279_s3 + $0x50] sm:$0xff] %v647_v45 }
  0xcc   :  { %v290_v47 = vpop.f32.mrf.mxu2  ;;  %712 = vst [vmem:[%s1279_s3 + $0x58] sm:$0xff] %v648_v46  ;;  %v403_v48 = vpop.f32.mrf.mxu3 }
  0xcd   :  { %v679_v49 = vadd.f32 %v1016_v1, %v290_v47  ;;  %v680_v50 = vadd.f32 %v1018_v2, %v403_v48 }
  0xcf   :  { %743 = vst [vmem:[%s1279_s3 + $0x150] sm:$0xff] %v679_v49 }
  0xd0   :  { %744 = vst [vmem:[%s1279_s3 + $0x158] sm:$0xff] %v680_v50  ;;  %v245_v51 = vpop.f32.mrf.mxu0  ;;  %v358_v52 = vpop.f32.mrf.mxu1 }
  0xd1   :  { %v649_v53 = vadd.f32 %v1016_v1, %v245_v51  ;;  %v650_v54 = vadd.f32 %v1018_v2, %v358_v52 }
  0xd3   :  { %713 = vst [vmem:[%s1279_s3 + $0x60] sm:$0xff] %v649_v53 }
  0xd4   :  { %v293_v55 = vpop.f32.mrf.mxu2  ;;  %714 = vst [vmem:[%s1279_s3 + $0x68] sm:$0xff] %v650_v54  ;;  %v406_v56 = vpop.f32.mrf.mxu3 }
  0xd5   :  { %v681_v57 = vadd.f32 %v1016_v1, %v293_v55  ;;  %v682_v58 = vadd.f32 %v1018_v2, %v406_v56 }
  0xd7   :  { %745 = vst [vmem:[%s1279_s3 + $0x160] sm:$0xff] %v681_v57 }
  0xd8   :  { %746 = vst [vmem:[%s1279_s3 + $0x168] sm:$0xff] %v682_v58  ;;  %v248_v59 = vpop.f32.mrf.mxu0  ;;  %v361_v60 = vpop.f32.mrf.mxu1 }
  0xd9   :  { %v651_v61 = vadd.f32 %v1016_v1, %v248_v59  ;;  %v652_v62 = vadd.f32 %v1018_v2, %v361_v60 }
  0xdb   :  { %715 = vst [vmem:[%s1279_s3 + $0x70] sm:$0xff] %v651_v61 }
  0xdc   :  { %v296_v63 = vpop.f32.mrf.mxu2  ;;  %716 = vst [vmem:[%s1279_s3 + $0x78] sm:$0xff] %v652_v62  ;;  %v409_v0 = vpop.f32.mrf.mxu3 }
  0xdd   :  { %v683_v3 = vadd.f32 %v1016_v1, %v296_v63  ;;  %v684_v4 = vadd.f32 %v1018_v2, %v409_v0 }
  0xdf   :  { %747 = vst [vmem:[%s1279_s3 + $0x170] sm:$0xff] %v683_v3 }
  0xe0   :  { %748 = vst [vmem:[%s1279_s3 + $0x178] sm:$0xff] %v684_v4  ;;  %v251_v5 = vpop.f32.mrf.mxu0  ;;  %v364_v6 = vpop.f32.mrf.mxu1 }
  0xe1   :  { %v653_v7 = vadd.f32 %v1016_v1, %v251_v5  ;;  %v654_v8 = vadd.f32 %v1018_v2, %v364_v6 }
  0xe3   :  { %717 = vst [vmem:[%s1279_s3 + $0x80] sm:$0xff] %v653_v7 }
  0xe4   :  { %v299_v9 = vpop.f32.mrf.mxu2  ;;  %718 = vst [vmem:[%s1279_s3 + $0x88] sm:$0xff] %v654_v8  ;;  %v412_v10 = vpop.f32.mrf.mxu3 }
  0xe5   :  { %v685_v11 = vadd.f32 %v1016_v1, %v299_v9  ;;  %v686_v12 = vadd.f32 %v1018_v2, %v412_v10 }
  0xe7   :  { %749 = vst [vmem:[%s1279_s3 + $0x180] sm:$0xff] %v685_v11 }
  0xe8   :  { %750 = vst [vmem:[%s1279_s3 + $0x188] sm:$0xff] %v686_v12  ;;  %v254_v13 = vpop.f32.mrf.mxu0  ;;  %v367_v14 = vpop.f32.mrf.mxu1 }
  0xe9   :  { %v655_v15 = vadd.f32 %v1016_v1, %v254_v13  ;;  %v656_v16 = vadd.f32 %v1018_v2, %v367_v14 }
  0xeb   :  { %719 = vst [vmem:[%s1279_s3 + $0x90] sm:$0xff] %v655_v15 }
  0xec   :  { %v302_v17 = vpop.f32.mrf.mxu2  ;;  %720 = vst [vmem:[%s1279_s3 + $0x98] sm:$0xff] %v656_v16  ;;  %v415_v18 = vpop.f32.mrf.mxu3 }
  0xed   :  { %v687_v19 = vadd.f32 %v1016_v1, %v302_v17  ;;  %v688_v20 = vadd.f32 %v1018_v2, %v415_v18 }
  0xef   :  { %751 = vst [vmem:[%s1279_s3 + $0x190] sm:$0xff] %v687_v19 }
  0xf0   :  { %752 = vst [vmem:[%s1279_s3 + $0x198] sm:$0xff] %v688_v20  ;;  %v257_v21 = vpop.f32.mrf.mxu0  ;;  %v370_v22 = vpop.f32.mrf.mxu1 }
  0xf1   :  { %v657_v23 = vadd.f32 %v1016_v1, %v257_v21  ;;  %v658_v24 = vadd.f32 %v1018_v2, %v370_v22 }
  0xf3   :  { %721 = vst [vmem:[%s1279_s3 + $0xa0] sm:$0xff] %v657_v23 }
  0xf4   :  { %v305_v25 = vpop.f32.mrf.mxu2  ;;  %722 = vst [vmem:[%s1279_s3 + $0xa8] sm:$0xff] %v658_v24  ;;  %v418_v26 = vpop.f32.mrf.mxu3 }
  0xf5   :  { %v689_v27 = vadd.f32 %v1016_v1, %v305_v25  ;;  %v690_v28 = vadd.f32 %v1018_v2, %v418_v26 }
  0xf7   :  { %753 = vst [vmem:[%s1279_s3 + $0x1a0] sm:$0xff] %v689_v27 }
  0xf8   :  { %754 = vst [vmem:[%s1279_s3 + $0x1a8] sm:$0xff] %v690_v28  ;;  %v260_v29 = vpop.f32.mrf.mxu0  ;;  %v373_v30 = vpop.f32.mrf.mxu1 }
  0xf9   :  { %v659_v31 = vadd.f32 %v1016_v1, %v260_v29  ;;  %v660_v32 = vadd.f32 %v1018_v2, %v373_v30 }
  0xfb   :  { %723 = vst [vmem:[%s1279_s3 + $0xb0] sm:$0xff] %v659_v31 }
  0xfc   :  { %v308_v33 = vpop.f32.mrf.mxu2  ;;  %724 = vst [vmem:[%s1279_s3 + $0xb8] sm:$0xff] %v660_v32  ;;  %v421_v34 = vpop.f32.mrf.mxu3 }
  0xfd   :  { %v691_v35 = vadd.f32 %v1016_v1, %v308_v33  ;;  %v692_v36 = vadd.f32 %v1018_v2, %v421_v34 }
  0xff   :  { %755 = vst [vmem:[%s1279_s3 + $0x1b0] sm:$0xff] %v691_v35 }
 0x100   :  { %756 = vst [vmem:[%s1279_s3 + $0x1b8] sm:$0xff] %v692_v36  ;;  %v263_v37 = vpop.f32.mrf.mxu0  ;;  %v376_v38 = vpop.f32.mrf.mxu1 }
 0x101   :  { %v661_v39 = vadd.f32 %v1016_v1, %v263_v37  ;;  %v662_v40 = vadd.f32 %v1018_v2, %v376_v38 }
 0x103   :  { %725 = vst [vmem:[%s1279_s3 + $0xc0] sm:$0xff] %v661_v39 }
 0x104   :  { %v311_v41 = vpop.f32.mrf.mxu2  ;;  %726 = vst [vmem:[%s1279_s3 + $0xc8] sm:$0xff] %v662_v40  ;;  %v424_v42 = vpop.f32.mrf.mxu3 }
 0x105   :  { %v693_v43 = vadd.f32 %v1016_v1, %v311_v41  ;;  %v694_v44 = vadd.f32 %v1018_v2, %v424_v42 }
 0x107   :  { %757 = vst [vmem:[%s1279_s3 + $0x1c0] sm:$0xff] %v693_v43 }
 0x108   :  { %758 = vst [vmem:[%s1279_s3 + $0x1c8] sm:$0xff] %v694_v44  ;;  %v266_v45 = vpop.f32.mrf.mxu0  ;;  %v379_v46 = vpop.f32.mrf.mxu1 }
 0x109   :  { %v663_v47 = vadd.f32 %v1016_v1, %v266_v45  ;;  %v664_v48 = vadd.f32 %v1018_v2, %v379_v46 }
 0x10b   :  { %727 = vst [vmem:[%s1279_s3 + $0xd0] sm:$0xff] %v663_v47 }
 0x10c   :  { %v314_v49 = vpop.f32.mrf.mxu2  ;;  %728 = vst [vmem:[%s1279_s3 + $0xd8] sm:$0xff] %v664_v48  ;;  %v427_v50 = vpop.f32.mrf.mxu3 }
 0x10d   :  { %v695_v51 = vadd.f32 %v1016_v1, %v314_v49  ;;  %v696_v52 = vadd.f32 %v1018_v2, %v427_v50 }
 0x10f   :  { %759 = vst [vmem:[%s1279_s3 + $0x1d0] sm:$0xff] %v695_v51 }
 0x110   :  { %760 = vst [vmem:[%s1279_s3 + $0x1d8] sm:$0xff] %v696_v52  ;;  %v269_v53 = vpop.f32.mrf.mxu0  ;;  %v382_v54 = vpop.f32.mrf.mxu1 }
 0x111   :  { %v665_v55 = vadd.f32 %v1016_v1, %v269_v53  ;;  %v666_v56 = vadd.f32 %v1018_v2, %v382_v54 }
 0x113   :  { %729 = vst [vmem:[%s1279_s3 + $0xe0] sm:$0xff] %v665_v55 }
 0x114   :  { %v317_v57 = vpop.f32.mrf.mxu2  ;;  %730 = vst [vmem:[%s1279_s3 + $0xe8] sm:$0xff] %v666_v56  ;;  %v430_v58 = vpop.f32.mrf.mxu3 }
 0x115   :  { %v697_v59 = vadd.f32 %v1016_v1, %v317_v57  ;;  %v698_v60 = vadd.f32 %v1018_v2, %v430_v58 }
 0x117   :  { %761 = vst [vmem:[%s1279_s3 + $0x1e0] sm:$0xff] %v697_v59 }
 0x118   :  { %762 = vst [vmem:[%s1279_s3 + $0x1e8] sm:$0xff] %v698_v60  ;;  %v272_v61 = vpop.f32.mrf.mxu0  ;;  %v385_v62 = vpop.f32.mrf.mxu1 }
 0x119   :  { %v667_v63 = vadd.f32 %v1016_v1, %v272_v61  ;;  %v668_v0 = vadd.f32 %v1018_v2, %v385_v62 }
 0x11b   :  { %731 = vst [vmem:[%s1279_s3 + $0xf0] sm:$0xff] %v667_v63 }
 0x11c   :  { %v320_v3 = vpop.f32.mrf.mxu2  ;;  %732 = vst [vmem:[%s1279_s3 + $0xf8] sm:$0xff] %v668_v0  ;;  %v433_v4 = vpop.f32.mrf.mxu3 }
 0x11d   :  { %v699_v5 = vadd.f32 %v1016_v1, %v320_v3  ;;  %v700_v6 = vadd.f32 %v1018_v2, %v433_v4 }
 0x11f   :  { %763 = vst [vmem:[%s1279_s3 + $0x1f0] sm:$0xff] %v699_v5 }
 0x120   :  { %764 = vst [vmem:[%s1279_s3 + $0x1f8] sm:$0xff] %v700_v6 }

// kernel: last_layer_single_forward.17
= control target key start
LH: loop header
LB: loop body
LE: loop exit
PB: predicated region body
PF: predicated region fallthrough
CT: control target
= control target key end

     0   :  { %s1918_s1 = inlined_call_operand.vmem [shape: f32[256,256], index: 1, kind: input, shape index: {}]   ;;  %s1919_s0 = inlined_call_operand.vmem [shape: f32[256,256], index: 0, kind: input, shape index: {}]   ;;  %s1920_s2 = inlined_call_operand.vmem [shape: f32[1,256], index: 2, kind: input, shape index: {}]   ;;  %s1921_s3 = inlined_call_operand.vmem [shape: f32[256,256], index: 3, kind: output, shape index: {}]  }
   0x1   :  { %v241_v0 = vld [vmem:[%s1918_s1 + $0xf8] sm:$0xff]  ;;  %v239_v2 = vld [vmem:[%s1918_s1 + $0xe8] sm:$0xff]  ;;  %v240_v4 = vld [vmem:[%s1918_s1 + $0xf0] sm:$0xff] }
   0x2   :  { %v273_v1 = vld [vmem:[%s1918_s1 + $0x1f8] sm:$0xff]  ;;  %500 = vmatpush.msra.mxu2 %v241_v0  ;;  %v271_v3 = vld [vmem:[%s1918_s1 + $0x1e8] sm:$0xff]  ;;  %v272_v5 = vld [vmem:[%s1918_s1 + $0x1f0] sm:$0xff]  ;;  %274 = vmatpush.msra.mxu0 %v240_v4 }
   0x3   :  { %613 = vmatpush.msra.mxu3 %v273_v1  ;;  %387 = vmatpush.msra.mxu1 %v272_v5  ;;  %v237_v6 = vld [vmem:[%s1918_s1 + $0xd8] sm:$0xff]  ;;  %v238_v8 = vld [vmem:[%s1918_s1 + $0xe0] sm:$0xff]  ;;  %v235_v10 = vld [vmem:[%s1918_s1 + $0xc8] sm:$0xff] }
   0x4   :  { %v269_v7 = vld [vmem:[%s1918_s1 + $0x1d8] sm:$0xff]  ;;  %501 = vmatpush.msra.mxu2 %v239_v2  ;;  %v270_v9 = vld [vmem:[%s1918_s1 + $0x1e0] sm:$0xff]  ;;  %275 = vmatpush.msra.mxu0 %v238_v8  ;;  %v267_v11 = vld [vmem:[%s1918_s1 + $0x1c8] sm:$0xff] }
   0x5   :  { %614 = vmatpush.msra.mxu3 %v271_v3  ;;  %388 = vmatpush.msra.mxu1 %v270_v9  ;;  %v236_v12 = vld [vmem:[%s1918_s1 + $0xd0] sm:$0xff]  ;;  %v234_v14 = vld [vmem:[%s1918_s1 + $0xc0] sm:$0xff]  ;;  %v233_v16 = vld [vmem:[%s1918_s1 + $0xb8] sm:$0xff] }
   0x6   :  { %v268_v13 = vld [vmem:[%s1918_s1 + $0x1d0] sm:$0xff]  ;;  %502 = vmatpush.msra.mxu2 %v237_v6  ;;  %v266_v15 = vld [vmem:[%s1918_s1 + $0x1c0] sm:$0xff]  ;;  %276 = vmatpush.msra.mxu0 %v236_v12  ;;  %v265_v17 = vld [vmem:[%s1918_s1 + $0x1b8] sm:$0xff] }
   0x7   :  { %615 = vmatpush.msra.mxu3 %v269_v7  ;;  %389 = vmatpush.msra.mxu1 %v268_v13  ;;  %v232_v18 = vld [vmem:[%s1918_s1 + $0xb0] sm:$0xff]  ;;  %v231_v20 = vld [vmem:[%s1918_s1 + $0xa8] sm:$0xff]  ;;  %v230_v22 = vld [vmem:[%s1918_s1 + $0xa0] sm:$0xff] }
   0x8   :  { %503 = vmatpush.msra.mxu2 %v235_v10  ;;  %v264_v19 = vld [vmem:[%s1918_s1 + $0x1b0] sm:$0xff]  ;;  %277 = vmatpush.msra.mxu0 %v234_v14  ;;  %v263_v21 = vld [vmem:[%s1918_s1 + $0x1a8] sm:$0xff]  ;;  %v262_v23 = vld [vmem:[%s1918_s1 + $0x1a0] sm:$0xff] }
   0x9   :  { %616 = vmatpush.msra.mxu3 %v267_v11  ;;  %390 = vmatpush.msra.mxu1 %v266_v15  ;;  %v229_v24 = vld [vmem:[%s1918_s1 + $0x98] sm:$0xff]  ;;  %v228_v26 = vld [vmem:[%s1918_s1 + $0x90] sm:$0xff]  ;;  %v227_v28 = vld [vmem:[%s1918_s1 + $0x88] sm:$0xff] }
   0xa   :  { %504 = vmatpush.msra.mxu2 %v233_v16  ;;  %278 = vmatpush.msra.mxu0 %v232_v18  ;;  %v261_v25 = vld [vmem:[%s1918_s1 + $0x198] sm:$0xff]  ;;  %v260_v27 = vld [vmem:[%s1918_s1 + $0x190] sm:$0xff]  ;;  %v259_v29 = vld [vmem:[%s1918_s1 + $0x188] sm:$0xff] }
   0xb   :  { %617 = vmatpush.msra.mxu3 %v265_v17  ;;  %391 = vmatpush.msra.mxu1 %v264_v19  ;;  %v226_v30 = vld [vmem:[%s1918_s1 + $0x80] sm:$0xff]  ;;  %v225_v32 = vld [vmem:[%s1918_s1 + $0x78] sm:$0xff]  ;;  %v224_v34 = vld [vmem:[%s1918_s1 + $0x70] sm:$0xff] }
   0xc   :  { %505 = vmatpush.msra.mxu2 %v231_v20  ;;  %279 = vmatpush.msra.mxu0 %v230_v22  ;;  %v258_v31 = vld [vmem:[%s1918_s1 + $0x180] sm:$0xff]  ;;  %v257_v33 = vld [vmem:[%s1918_s1 + $0x178] sm:$0xff]  ;;  %v256_v35 = vld [vmem:[%s1918_s1 + $0x170] sm:$0xff] }
   0xd   :  { %618 = vmatpush.msra.mxu3 %v263_v21  ;;  %392 = vmatpush.msra.mxu1 %v262_v23  ;;  %v223_v36 = vld [vmem:[%s1918_s1 + $0x68] sm:$0xff]  ;;  %v222_v38 = vld [vmem:[%s1918_s1 + $0x60] sm:$0xff]  ;;  %v221_v40 = vld [vmem:[%s1918_s1 + $0x58] sm:$0xff] }
   0xe   :  { %506 = vmatpush.msra.mxu2 %v229_v24  ;;  %280 = vmatpush.msra.mxu0 %v228_v26  ;;  %v255_v37 = vld [vmem:[%s1918_s1 + $0x168] sm:$0xff]  ;;  %v254_v39 = vld [vmem:[%s1918_s1 + $0x160] sm:$0xff]  ;;  %v253_v41 = vld [vmem:[%s1918_s1 + $0x158] sm:$0xff] }
   0xf   :  { %619 = vmatpush.msra.mxu3 %v261_v25  ;;  %393 = vmatpush.msra.mxu1 %v260_v27  ;;  %v220_v42 = vld [vmem:[%s1918_s1 + $0x50] sm:$0xff]  ;;  %v219_v44 = vld [vmem:[%s1918_s1 + $0x48] sm:$0xff]  ;;  %v218_v46 = vld [vmem:[%s1918_s1 + $0x40] sm:$0xff] }
  0x10   :  { %507 = vmatpush.msra.mxu2 %v227_v28  ;;  %281 = vmatpush.msra.mxu0 %v226_v30  ;;  %v252_v43 = vld [vmem:[%s1918_s1 + $0x150] sm:$0xff]  ;;  %v251_v45 = vld [vmem:[%s1918_s1 + $0x148] sm:$0xff]  ;;  %v250_v47 = vld [vmem:[%s1918_s1 + $0x140] sm:$0xff] }
  0x11   :  { %620 = vmatpush.msra.mxu3 %v259_v29  ;;  %394 = vmatpush.msra.mxu1 %v258_v31  ;;  %v217_v48 = vld [vmem:[%s1918_s1 + $0x38] sm:$0xff]  ;;  %v216_v50 = vld [vmem:[%s1918_s1 + $0x30] sm:$0xff]  ;;  %v215_v52 = vld [vmem:[%s1918_s1 + $0x28] sm:$0xff] }
  0x12   :  { %508 = vmatpush.msra.mxu2 %v225_v32  ;;  %282 = vmatpush.msra.mxu0 %v224_v34  ;;  %v249_v49 = vld [vmem:[%s1918_s1 + $0x138] sm:$0xff]  ;;  %v248_v51 = vld [vmem:[%s1918_s1 + $0x130] sm:$0xff]  ;;  %v247_v53 = vld [vmem:[%s1918_s1 + $0x128] sm:$0xff] }
  0x13   :  { %621 = vmatpush.msra.mxu3 %v257_v33  ;;  %395 = vmatpush.msra.mxu1 %v256_v35  ;;  %v214_v54 = vld [vmem:[%s1918_s1 + $0x20] sm:$0xff]  ;;  %v213_v56 = vld [vmem:[%s1918_s1 + $0x18] sm:$0xff]  ;;  %v212_v58 = vld [vmem:[%s1918_s1 + $0x10] sm:$0xff] }
  0x14   :  { %509 = vmatpush.msra.mxu2 %v223_v36  ;;  %283 = vmatpush.msra.mxu0 %v222_v38  ;;  %v246_v55 = vld [vmem:[%s1918_s1 + $0x120] sm:$0xff]  ;;  %v245_v57 = vld [vmem:[%s1918_s1 + $0x118] sm:$0xff]  ;;  %v244_v59 = vld [vmem:[%s1918_s1 + $0x110] sm:$0xff] }
  0x15   :  { %622 = vmatpush.msra.mxu3 %v255_v37  ;;  %396 = vmatpush.msra.mxu1 %v254_v39  ;;  %v211_v60 = vld [vmem:[%s1918_s1 + $0x8] sm:$0xff]  ;;  %v146_v62 = vld [vmem:[%s1919_s0] sm:$0xff]  ;;  %v148_v2 = vld [vmem:[%s1919_s0 + $0x10] sm:$0xff] }
  0x16   :  { %510 = vmatpush.msra.mxu2 %v221_v40  ;;  %284 = vmatpush.msra.mxu0 %v220_v42  ;;  %v243_v61 = vld [vmem:[%s1918_s1 + $0x108] sm:$0xff]  ;;  %v210_v0 = vld [vmem:[%s1918_s1] sm:$0xff]  ;;  %v149_v3 = vld [vmem:[%s1919_s0 + $0x18] sm:$0xff] }
  0x17   :  { %623 = vmatpush.msra.mxu3 %v253_v41  ;;  %397 = vmatpush.msra.mxu1 %v252_v43  ;;  %v147_v63 = vld [vmem:[%s1919_s0 + $0x8] sm:$0xff]  ;;  %v242_v1 = vld [vmem:[%s1918_s1 + $0x100] sm:$0xff]  ;;  %v152_v6 = vld [vmem:[%s1919_s0 + $0x30] sm:$0xff] }
  0x18   :  { %511 = vmatpush.msra.mxu2 %v219_v44  ;;  %285 = vmatpush.msra.mxu0 %v218_v46  ;;  %v150_v4 = vld [vmem:[%s1919_s0 + $0x20] sm:$0xff]  ;;  %v151_v5 = vld [vmem:[%s1919_s0 + $0x28] sm:$0xff]  ;;  %v153_v7 = vld [vmem:[%s1919_s0 + $0x38] sm:$0xff] }
  0x19   :  { %624 = vmatpush.msra.mxu3 %v251_v45  ;;  %398 = vmatpush.msra.mxu1 %v250_v47  ;;  %v154_v8 = vld [vmem:[%s1919_s0 + $0x40] sm:$0xff]  ;;  %v155_v9 = vld [vmem:[%s1919_s0 + $0x48] sm:$0xff]  ;;  %v156_v10 = vld [vmem:[%s1919_s0 + $0x50] sm:$0xff] }
  0x1a   :  { %512 = vmatpush.msra.mxu2 %v217_v48  ;;  %286 = vmatpush.msra.mxu0 %v216_v50  ;;  %v157_v11 = vld [vmem:[%s1919_s0 + $0x58] sm:$0xff]  ;;  %v158_v12 = vld [vmem:[%s1919_s0 + $0x60] sm:$0xff]  ;;  %v159_v13 = vld [vmem:[%s1919_s0 + $0x68] sm:$0xff] }
  0x1b   :  { %625 = vmatpush.msra.mxu3 %v249_v49  ;;  %399 = vmatpush.msra.mxu1 %v248_v51  ;;  %v160_v14 = vld [vmem:[%s1919_s0 + $0x70] sm:$0xff]  ;;  %v161_v15 = vld [vmem:[%s1919_s0 + $0x78] sm:$0xff]  ;;  %v162_v16 = vld [vmem:[%s1919_s0 + $0x80] sm:$0xff] }
  0x1c   :  { %513 = vmatpush.msra.mxu2 %v215_v52  ;;  %287 = vmatpush.msra.mxu0 %v214_v54  ;;  %v163_v17 = vld [vmem:[%s1919_s0 + $0x88] sm:$0xff]  ;;  %v164_v18 = vld [vmem:[%s1919_s0 + $0x90] sm:$0xff]  ;;  %v165_v19 = vld [vmem:[%s1919_s0 + $0x98] sm:$0xff] }
  0x1d   :  { %626 = vmatpush.msra.mxu3 %v247_v53  ;;  %400 = vmatpush.msra.mxu1 %v246_v55  ;;  %v166_v20 = vld [vmem:[%s1919_s0 + $0xa0] sm:$0xff]  ;;  %v167_v21 = vld [vmem:[%s1919_s0 + $0xa8] sm:$0xff]  ;;  %v168_v22 = vld [vmem:[%s1919_s0 + $0xb0] sm:$0xff] }
  0x1e   :  { %514 = vmatpush.msra.mxu2 %v213_v56  ;;  %288 = vmatpush.msra.mxu0 %v212_v58  ;;  %v169_v23 = vld [vmem:[%s1919_s0 + $0xb8] sm:$0xff]  ;;  %v170_v24 = vld [vmem:[%s1919_s0 + $0xc0] sm:$0xff]  ;;  %v171_v25 = vld [vmem:[%s1919_s0 + $0xc8] sm:$0xff] }
  0x1f   :  { %627 = vmatpush.msra.mxu3 %v245_v57  ;;  %401 = vmatpush.msra.mxu1 %v244_v59  ;;  %v172_v26 = vld [vmem:[%s1919_s0 + $0xd0] sm:$0xff]  ;;  %v173_v27 = vld [vmem:[%s1919_s0 + $0xd8] sm:$0xff]  ;;  %v174_v28 = vld [vmem:[%s1919_s0 + $0xe0] sm:$0xff] }
  0x20   :  { %515 = vmatpush.msra.mxu2 %v211_v60  ;;  %289 = vmatpush.msra.mxu0 %v210_v0  ;;  %v175_v29 = vld [vmem:[%s1919_s0 + $0xe8] sm:$0xff]  ;;  %v176_v30 = vld [vmem:[%s1919_s0 + $0xf0] sm:$0xff]  ;;  %v177_v31 = vld [vmem:[%s1919_s0 + $0xf8] sm:$0xff] }
  0x21   :  { %628 = vmatpush.msra.mxu3 %v243_v61  ;;  %516 = vmatmul.f32.vlgmr.msra.gmra.mxu2 %v146_v62  ;;  %v921_v32 = vld [vmem:[%s1920_s2] sm:$0x3]  ;;  %v179_v34 = vld [vmem:[%s1919_s0 + $0x108] sm:$0xff]  ;;  %v180_v45 = vld [vmem:[%s1919_s0 + $0x110] sm:$0xff] }
  0x22   :  { %629 = vmatmul.f32.vlgmr.msra.gmra.mxu3 %v147_v63  ;;  %402 = vmatpush.msra.mxu1 %v242_v1  ;;  %v178_v33 = vld [vmem:[%s1919_s0 + $0x100] sm:$0xff]  ;;  %v1568_v35 = vperm.slane %v921_v32, 0  ;;  %v1571_v40 = vperm.slane %v921_v32, 1  ;;  %v181_v46 = vld [vmem:[%s1919_s0 + $0x118] sm:$0xff]  ;;  %v183_v60 = vld [vmem:[%s1919_s0 + $0x128] sm:$0xff] }
  0x23   :  { %290 = vmatmul.f32.vlgmr.msra.gmra.mxu0 %v146_v62  ;;  %403 = vmatmul.f32.vlgmr.msra.gmra.mxu1 %v147_v63  ;;  %v182_v59 = vld [vmem:[%s1919_s0 + $0x120] sm:$0xff] }
  0x29   :  { %519 = vmatmul.f32.gmra.mxu2 %v148_v2 }
  0x2a   :  { %632 = vmatmul.f32.gmra.mxu3 %v149_v3 }
  0x2b   :  { %293 = vmatmul.f32.gmra.mxu0 %v148_v2  ;;  %406 = vmatmul.f32.gmra.mxu1 %v149_v3 }
  0x31   :  { %522 = vmatmul.f32.gmra.mxu2 %v150_v4 }
  0x32   :  { %635 = vmatmul.f32.gmra.mxu3 %v151_v5 }
  0x33   :  { %296 = vmatmul.f32.gmra.mxu0 %v150_v4  ;;  %409 = vmatmul.f32.gmra.mxu1 %v151_v5 }
  0x39   :  { %525 = vmatmul.f32.gmra.mxu2 %v152_v6 }
  0x3a   :  { %638 = vmatmul.f32.gmra.mxu3 %v153_v7 }
  0x3b   :  { %299 = vmatmul.f32.gmra.mxu0 %v152_v6  ;;  %412 = vmatmul.f32.gmra.mxu1 %v153_v7 }
  0x41   :  { %528 = vmatmul.f32.gmra.mxu2 %v154_v8 }
  0x42   :  { %641 = vmatmul.f32.gmra.mxu3 %v155_v9 }
  0x43   :  { %302 = vmatmul.f32.gmra.mxu0 %v154_v8  ;;  %415 = vmatmul.f32.gmra.mxu1 %v155_v9  ;;  %v184_v9 = vld [vmem:[%s1919_s0 + $0x130] sm:$0xff] }
  0x49   :  { %531 = vmatmul.f32.gmra.mxu2 %v156_v10 }
  0x4a   :  { %644 = vmatmul.f32.gmra.mxu3 %v157_v11 }
  0x4b   :  { %305 = vmatmul.f32.gmra.mxu0 %v156_v10  ;;  %418 = vmatmul.f32.gmra.mxu1 %v157_v11  ;;  %v185_v10 = vld [vmem:[%s1919_s0 + $0x138] sm:$0xff] }
  0x51   :  { %534 = vmatmul.f32.gmra.mxu2 %v158_v12 }
  0x52   :  { %647 = vmatmul.f32.gmra.mxu3 %v159_v13 }
  0x53   :  { %308 = vmatmul.f32.gmra.mxu0 %v158_v12  ;;  %421 = vmatmul.f32.gmra.mxu1 %v159_v13 }
  0x59   :  { %537 = vmatmul.f32.gmra.mxu2 %v160_v14 }
  0x5a   :  { %650 = vmatmul.f32.gmra.mxu3 %v161_v15 }
  0x5b   :  { %311 = vmatmul.f32.gmra.mxu0 %v160_v14  ;;  %424 = vmatmul.f32.gmra.mxu1 %v161_v15 }
  0x61   :  { %540 = vmatmul.f32.gmra.mxu2 %v162_v16 }
  0x62   :  { %653 = vmatmul.f32.gmra.mxu3 %v163_v17 }
  0x63   :  { %314 = vmatmul.f32.gmra.mxu0 %v162_v16  ;;  %427 = vmatmul.f32.gmra.mxu1 %v163_v17 }
  0x69   :  { %543 = vmatmul.f32.gmra.mxu2 %v164_v18 }
  0x6a   :  { %656 = vmatmul.f32.gmra.mxu3 %v165_v19 }
  0x6b   :  { %317 = vmatmul.f32.gmra.mxu0 %v164_v18  ;;  %430 = vmatmul.f32.gmra.mxu1 %v165_v19 }
  0x71   :  { %546 = vmatmul.f32.gmra.mxu2 %v166_v20 }
  0x72   :  { %659 = vmatmul.f32.gmra.mxu3 %v167_v21 }
  0x73   :  { %320 = vmatmul.f32.gmra.mxu0 %v166_v20  ;;  %433 = vmatmul.f32.gmra.mxu1 %v167_v21 }
  0x79   :  { %549 = vmatmul.f32.gmra.mxu2 %v168_v22 }
  0x7a   :  { %662 = vmatmul.f32.gmra.mxu3 %v169_v23 }
  0x7b   :  { %323 = vmatmul.f32.gmra.mxu0 %v168_v22  ;;  %436 = vmatmul.f32.gmra.mxu1 %v169_v23  ;;  %v186_v23 = vld [vmem:[%s1919_s0 + $0x140] sm:$0xff] }
  0x81   :  { %552 = vmatmul.f32.gmra.mxu2 %v170_v24 }
  0x82   :  { %665 = vmatmul.f32.gmra.mxu3 %v171_v25 }
  0x83   :  { %326 = vmatmul.f32.gmra.mxu0 %v170_v24  ;;  %439 = vmatmul.f32.gmra.mxu1 %v171_v25  ;;  %v187_v24 = vld [vmem:[%s1919_s0 + $0x148] sm:$0xff] }
  0x89   :  { %555 = vmatmul.f32.gmra.mxu2 %v172_v26 }
  0x8a   :  { %668 = vmatmul.f32.gmra.mxu3 %v173_v27 }
  0x8b   :  { %329 = vmatmul.f32.gmra.mxu0 %v172_v26  ;;  %442 = vmatmul.f32.gmra.mxu1 %v173_v27 }
  0x91   :  { %558 = vmatmul.f32.gmra.mxu2 %v174_v28 }
  0x92   :  { %671 = vmatmul.f32.gmra.mxu3 %v175_v29 }
  0x93   :  { %332 = vmatmul.f32.gmra.mxu0 %v174_v28  ;;  %445 = vmatmul.f32.gmra.mxu1 %v175_v29 }
  0x99   :  { %561 = vmatmul.f32.gmra.mxu2 %v176_v30 }
  0x9a   :  { %674 = vmatmul.f32.gmra.mxu3 %v177_v31 }
  0x9b   :  { %335 = vmatmul.f32.gmra.mxu0 %v176_v30  ;;  %448 = vmatmul.f32.gmra.mxu1 %v177_v31 }
  0xa0   :  { %v291_v36 = vpop.f32.mrf.mxu0  ;;  %v404_v37 = vpop.f32.mrf.mxu1 }
  0xa1   :  { %564 = vmatmul.f32.gmra.mxu2 %v178_v33  ;;  %v405_v38 = vadd.f32 %v404_v37, %v291_v36 }
  0xa2   :  { %677 = vmatmul.f32.gmra.mxu3 %v179_v34 }
  0xa3   :  { %v927_v39 = vadd.f32 %v1568_v35, %v405_v38  ;;  %338 = vmatmul.f32.gmra.mxu0 %v178_v33  ;;  %451 = vmatmul.f32.gmra.mxu1 %v179_v34  ;;  %v188_v38 = vld [vmem:[%s1919_s0 + $0x150] sm:$0xff] }
  0xa4   :  { %v517_v41 = vpop.f32.mrf.mxu2 }
  0xa5   :  { %v630_v42 = vpop.f32.mrf.mxu3  ;;  %vm991_vm0 = vcmp.gt.f32.partialorder %v927_v39, 0.0  ;;  %v1055_v43 = vmul.f32 0.2, %v927_v39 }
  0xa6   :  { %v631_v44 = vadd.f32 %v630_v42, %v517_v41 }
  0xa7   :  { %v1119_v47 = vsel %vm991_vm0, %v927_v39, %v1055_v43  ;;  %v189_v39 = vld [vmem:[%s1919_s0 + $0x158] sm:$0xff] }
  0xa8   :  { %v928_v48 = vadd.f32 %v1571_v40, %v631_v44  ;;  %1183 = vst [vmem:[%s1921_s3] sm:$0xff] %v1119_v47  ;;  %v294_v49 = vpop.f32.mrf.mxu0  ;;  %v407_v50 = vpop.f32.mrf.mxu1 }
  0xa9   :  { %567 = vmatmul.f32.gmra.mxu2 %v180_v45  ;;  %v408_v52 = vadd.f32 %v407_v50, %v294_v49 }
  0xaa   :  { %vm992_vm1 = vcmp.gt.f32.partialorder %v928_v48, 0.0  ;;  %v1056_v51 = vmul.f32 0.2, %v928_v48  ;;  %680 = vmatmul.f32.gmra.mxu3 %v181_v46 }
  0xab   :  { %v929_v54 = vadd.f32 %v1568_v35, %v408_v52  ;;  %341 = vmatmul.f32.gmra.mxu0 %v180_v45  ;;  %454 = vmatmul.f32.gmra.mxu1 %v181_v46 }
  0xac   :  { %v1120_v53 = vsel %vm992_vm1, %v928_v48, %v1056_v51  ;;  %v520_v55 = vpop.f32.mrf.mxu2 }
  0xad   :  { %1184 = vst [vmem:[%s1921_s3 + $0x8] sm:$0xff] %v1120_v53  ;;  %v633_v56 = vpop.f32.mrf.mxu3  ;;  %vm993_vm2 = vcmp.gt.f32.partialorder %v929_v54, 0.0  ;;  %v1057_v57 = vmul.f32 0.2, %v929_v54  ;;  %v190_v53 = vld [vmem:[%s1919_s0 + $0x160] sm:$0xff] }
  0xae   :  { %v634_v58 = vadd.f32 %v633_v56, %v520_v55 }
  0xaf   :  { %v1121_v61 = vsel %vm993_vm2, %v929_v54, %v1057_v57  ;;  %v191_v54 = vld [vmem:[%s1919_s0 + $0x168] sm:$0xff] }
  0xb0   :  { %v930_v62 = vadd.f32 %v1571_v40, %v634_v58  ;;  %1185 = vst [vmem:[%s1921_s3 + $0x10] sm:$0xff] %v1121_v61  ;;  %v297_v63 = vpop.f32.mrf.mxu0  ;;  %v410_v0 = vpop.f32.mrf.mxu1 }
  0xb1   :  { %570 = vmatmul.f32.gmra.mxu2 %v182_v59  ;;  %v411_v2 = vadd.f32 %v410_v0, %v297_v63 }
  0xb2   :  { %vm994_vm3 = vcmp.gt.f32.partialorder %v930_v62, 0.0  ;;  %v1058_v1 = vmul.f32 0.2, %v930_v62  ;;  %683 = vmatmul.f32.gmra.mxu3 %v183_v60 }
  0xb3   :  { %v931_v4 = vadd.f32 %v1568_v35, %v411_v2  ;;  %344 = vmatmul.f32.gmra.mxu0 %v182_v59  ;;  %457 = vmatmul.f32.gmra.mxu1 %v183_v60 }
  0xb4   :  { %v1122_v3 = vsel %vm994_vm3, %v930_v62, %v1058_v1  ;;  %v523_v5 = vpop.f32.mrf.mxu2 }
  0xb5   :  { %1186 = vst [vmem:[%s1921_s3 + $0x18] sm:$0xff] %v1122_v3  ;;  %v636_v6 = vpop.f32.mrf.mxu3  ;;  %vm995_vm4 = vcmp.gt.f32.partialorder %v931_v4, 0.0  ;;  %v1059_v7 = vmul.f32 0.2, %v931_v4  ;;  %v192_v3 = vld [vmem:[%s1919_s0 + $0x170] sm:$0xff] }
  0xb6   :  { %v637_v8 = vadd.f32 %v636_v6, %v523_v5 }
  0xb7   :  { %v1123_v11 = vsel %vm995_vm4, %v931_v4, %v1059_v7  ;;  %v193_v4 = vld [vmem:[%s1919_s0 + $0x178] sm:$0xff] }
  0xb8   :  { %v932_v12 = vadd.f32 %v1571_v40, %v637_v8  ;;  %1187 = vst [vmem:[%s1921_s3 + $0x20] sm:$0xff] %v1123_v11  ;;  %v300_v13 = vpop.f32.mrf.mxu0  ;;  %v413_v14 = vpop.f32.mrf.mxu1 }
  0xb9   :  { %573 = vmatmul.f32.gmra.mxu2 %v184_v9  ;;  %v414_v16 = vadd.f32 %v413_v14, %v300_v13 }
  0xba   :  { %vm996_vm5 = vcmp.gt.f32.partialorder %v932_v12, 0.0  ;;  %v1060_v15 = vmul.f32 0.2, %v932_v12  ;;  %686 = vmatmul.f32.gmra.mxu3 %v185_v10 }
  0xbb   :  { %v933_v18 = vadd.f32 %v1568_v35, %v414_v16  ;;  %347 = vmatmul.f32.gmra.mxu0 %v184_v9  ;;  %460 = vmatmul.f32.gmra.mxu1 %v185_v10 }
  0xbc   :  { %v1124_v17 = vsel %vm996_vm5, %v932_v12, %v1060_v15  ;;  %v526_v19 = vpop.f32.mrf.mxu2 }
  0xbd   :  { %1188 = vst [vmem:[%s1921_s3 + $0x28] sm:$0xff] %v1124_v17  ;;  %v639_v20 = vpop.f32.mrf.mxu3  ;;  %vm997_vm6 = vcmp.gt.f32.partialorder %v933_v18, 0.0  ;;  %v1061_v21 = vmul.f32 0.2, %v933_v18  ;;  %v194_v17 = vld [vmem:[%s1919_s0 + $0x180] sm:$0xff] }
  0xbe   :  { %v640_v22 = vadd.f32 %v639_v20, %v526_v19 }
  0xbf   :  { %v1125_v25 = vsel %vm997_vm6, %v933_v18, %v1061_v21  ;;  %v195_v18 = vld [vmem:[%s1919_s0 + $0x188] sm:$0xff] }
  0xc0   :  { %v934_v26 = vadd.f32 %v1571_v40, %v640_v22  ;;  %1189 = vst [vmem:[%s1921_s3 + $0x30] sm:$0xff] %v1125_v25  ;;  %v303_v27 = vpop.f32.mrf.mxu0  ;;  %v416_v28 = vpop.f32.mrf.mxu1 }
  0xc1   :  { %576 = vmatmul.f32.gmra.mxu2 %v186_v23  ;;  %v417_v30 = vadd.f32 %v416_v28, %v303_v27 }
  0xc2   :  { %vm998_vm7 = vcmp.gt.f32.partialorder %v934_v26, 0.0  ;;  %v1062_v29 = vmul.f32 0.2, %v934_v26  ;;  %689 = vmatmul.f32.gmra.mxu3 %v187_v24 }
  0xc3   :  { %v935_v32 = vadd.f32 %v1568_v35, %v417_v30  ;;  %350 = vmatmul.f32.gmra.mxu0 %v186_v23  ;;  %463 = vmatmul.f32.gmra.mxu1 %v187_v24 }
  0xc4   :  { %v1126_v31 = vsel %vm998_vm7, %v934_v26, %v1062_v29  ;;  %v529_v33 = vpop.f32.mrf.mxu2 }
  0xc5   :  { %1190 = vst [vmem:[%s1921_s3 + $0x38] sm:$0xff] %v1126_v31  ;;  %v642_v34 = vpop.f32.mrf.mxu3  ;;  %vm999_vm8 = vcmp.gt.f32.partialorder %v935_v32, 0.0  ;;  %v1063_v36 = vmul.f32 0.2, %v935_v32  ;;  %v196_v31 = vld [vmem:[%s1919_s0 + $0x190] sm:$0xff] }
  0xc6   :  { %v643_v37 = vadd.f32 %v642_v34, %v529_v33 }
  0xc7   :  { %v1127_v41 = vsel %vm999_vm8, %v935_v32, %v1063_v36  ;;  %v197_v32 = vld [vmem:[%s1919_s0 + $0x198] sm:$0xff] }
  0xc8   :  { %v936_v42 = vadd.f32 %v1571_v40, %v643_v37  ;;  %1191 = vst [vmem:[%s1921_s3 + $0x40] sm:$0xff] %v1127_v41  ;;  %v306_v43 = vpop.f32.mrf.mxu0  ;;  %v419_v44 = vpop.f32.mrf.mxu1 }
  0xc9   :  { %579 = vmatmul.f32.gmra.mxu2 %v188_v38  ;;  %v420_v46 = vadd.f32 %v419_v44, %v306_v43 }
  0xca   :  { %vm1000_vm9 = vcmp.gt.f32.partialorder %v936_v42, 0.0  ;;  %v1064_v45 = vmul.f32 0.2, %v936_v42  ;;  %692 = vmatmul.f32.gmra.mxu3 %v189_v39 }
  0xcb   :  { %v937_v48 = vadd.f32 %v1568_v35, %v420_v46  ;;  %353 = vmatmul.f32.gmra.mxu0 %v188_v38  ;;  %466 = vmatmul.f32.gmra.mxu1 %v189_v39 }
  0xcc   :  { %v1128_v47 = vsel %vm1000_vm9, %v936_v42, %v1064_v45  ;;  %v532_v49 = vpop.f32.mrf.mxu2 }
  0xcd   :  { %1192 = vst [vmem:[%s1921_s3 + $0x48] sm:$0xff] %v1128_v47  ;;  %v645_v50 = vpop.f32.mrf.mxu3  ;;  %vm1001_vm10 = vcmp.gt.f32.partialorder %v937_v48, 0.0  ;;  %v1065_v51 = vmul.f32 0.2, %v937_v48  ;;  %v198_v47 = vld [vmem:[%s1919_s0 + $0x1a0] sm:$0xff] }
  0xce   :  { %v646_v52 = vadd.f32 %v645_v50, %v532_v49 }
  0xcf   :  { %v1129_v55 = vsel %vm1001_vm10, %v937_v48, %v1065_v51  ;;  %v199_v48 = vld [vmem:[%s1919_s0 + $0x1a8] sm:$0xff] }
  0xd0   :  { %v938_v56 = vadd.f32 %v1571_v40, %v646_v52  ;;  %1193 = vst [vmem:[%s1921_s3 + $0x50] sm:$0xff] %v1129_v55  ;;  %v309_v57 = vpop.f32.mrf.mxu0  ;;  %v422_v58 = vpop.f32.mrf.mxu1 }
  0xd1   :  { %582 = vmatmul.f32.gmra.mxu2 %v190_v53  ;;  %v423_v60 = vadd.f32 %v422_v58, %v309_v57 }
  0xd2   :  { %vm1002_vm11 = vcmp.gt.f32.partialorder %v938_v56, 0.0  ;;  %v1066_v59 = vmul.f32 0.2, %v938_v56  ;;  %695 = vmatmul.f32.gmra.mxu3 %v191_v54 }
  0xd3   :  { %v939_v62 = vadd.f32 %v1568_v35, %v423_v60  ;;  %356 = vmatmul.f32.gmra.mxu0 %v190_v53  ;;  %469 = vmatmul.f32.gmra.mxu1 %v191_v54 }
  0xd4   :  { %v1130_v61 = vsel %vm1002_vm11, %v938_v56, %v1066_v59  ;;  %v535_v63 = vpop.f32.mrf.mxu2 }
  0xd5   :  { %1194 = vst [vmem:[%s1921_s3 + $0x58] sm:$0xff] %v1130_v61  ;;  %v648_v0 = vpop.f32.mrf.mxu3  ;;  %vm1003_vm12 = vcmp.gt.f32.partialorder %v939_v62, 0.0  ;;  %v1067_v1 = vmul.f32 0.2, %v939_v62  ;;  %v200_v61 = vld [vmem:[%s1919_s0 + $0x1b0] sm:$0xff] }
  0xd6   :  { %v649_v2 = vadd.f32 %v648_v0, %v535_v63 }
  0xd7   :  { %v1131_v5 = vsel %vm1003_vm12, %v939_v62, %v1067_v1  ;;  %v201_v62 = vld [vmem:[%s1919_s0 + $0x1b8] sm:$0xff] }
  0xd8   :  { %v940_v6 = vadd.f32 %v1571_v40, %v649_v2  ;;  %1195 = vst [vmem:[%s1921_s3 + $0x60] sm:$0xff] %v1131_v5  ;;  %v312_v7 = vpop.f32.mrf.mxu0  ;;  %v425_v8 = vpop.f32.mrf.mxu1 }
  0xd9   :  { %585 = vmatmul.f32.gmra.mxu2 %v192_v3  ;;  %v426_v10 = vadd.f32 %v425_v8, %v312_v7 }
  0xda   :  { %vm1004_vm13 = vcmp.gt.f32.partialorder %v940_v6, 0.0  ;;  %v1068_v9 = vmul.f32 0.2, %v940_v6  ;;  %698 = vmatmul.f32.gmra.mxu3 %v193_v4 }
  0xdb   :  { %v941_v12 = vadd.f32 %v1568_v35, %v426_v10  ;;  %359 = vmatmul.f32.gmra.mxu0 %v192_v3  ;;  %472 = vmatmul.f32.gmra.mxu1 %v193_v4 }
  0xdc   :  { %v1132_v11 = vsel %vm1004_vm13, %v940_v6, %v1068_v9  ;;  %v538_v13 = vpop.f32.mrf.mxu2 }
  0xdd   :  { %1196 = vst [vmem:[%s1921_s3 + $0x68] sm:$0xff] %v1132_v11  ;;  %v651_v14 = vpop.f32.mrf.mxu3  ;;  %vm1005_vm14 = vcmp.gt.f32.partialorder %v941_v12, 0.0  ;;  %v1069_v15 = vmul.f32 0.2, %v941_v12  ;;  %v202_v11 = vld [vmem:[%s1919_s0 + $0x1c0] sm:$0xff] }
  0xde   :  { %v652_v16 = vadd.f32 %v651_v14, %v538_v13 }
  0xdf   :  { %v1133_v19 = vsel %vm1005_vm14, %v941_v12, %v1069_v15  ;;  %v203_v12 = vld [vmem:[%s1919_s0 + $0x1c8] sm:$0xff] }
  0xe0   :  { %v942_v20 = vadd.f32 %v1571_v40, %v652_v16  ;;  %1197 = vst [vmem:[%s1921_s3 + $0x70] sm:$0xff] %v1133_v19  ;;  %v315_v21 = vpop.f32.mrf.mxu0  ;;  %v428_v22 = vpop.f32.mrf.mxu1 }
  0xe1   :  { %588 = vmatmul.f32.gmra.mxu2 %v194_v17  ;;  %v429_v24 = vadd.f32 %v428_v22, %v315_v21 }
  0xe2   :  { %vm1006_vm15 = vcmp.gt.f32.partialorder %v942_v20, 0.0  ;;  %v1070_v23 = vmul.f32 0.2, %v942_v20  ;;  %701 = vmatmul.f32.gmra.mxu3 %v195_v18 }
  0xe3   :  { %v943_v26 = vadd.f32 %v1568_v35, %v429_v24  ;;  %362 = vmatmul.f32.gmra.mxu0 %v194_v17  ;;  %475 = vmatmul.f32.gmra.mxu1 %v195_v18 }
  0xe4   :  { %v1134_v25 = vsel %vm1006_vm15, %v942_v20, %v1070_v23  ;;  %v541_v27 = vpop.f32.mrf.mxu2 }
  0xe5   :  { %1198 = vst [vmem:[%s1921_s3 + $0x78] sm:$0xff] %v1134_v25  ;;  %v654_v28 = vpop.f32.mrf.mxu3  ;;  %vm1007_vm0 = vcmp.gt.f32.partialorder %v943_v26, 0.0  ;;  %v1071_v29 = vmul.f32 0.2, %v943_v26  ;;  %v204_v25 = vld [vmem:[%s1919_s0 + $0x1d0] sm:$0xff] }
  0xe6   :  { %v655_v30 = vadd.f32 %v654_v28, %v541_v27 }
  0xe7   :  { %v1135_v33 = vsel %vm1007_vm0, %v943_v26, %v1071_v29  ;;  %v205_v26 = vld [vmem:[%s1919_s0 + $0x1d8] sm:$0xff] }
  0xe8   :  { %v944_v34 = vadd.f32 %v1571_v40, %v655_v30  ;;  %1199 = vst [vmem:[%s1921_s3 + $0x80] sm:$0xff] %v1135_v33  ;;  %v318_v36 = vpop.f32.mrf.mxu0  ;;  %v431_v37 = vpop.f32.mrf.mxu1 }
  0xe9   :  { %591 = vmatmul.f32.gmra.mxu2 %v196_v31  ;;  %v432_v39 = vadd.f32 %v431_v37, %v318_v36 }
  0xea   :  { %vm1008_vm1 = vcmp.gt.f32.partialorder %v944_v34, 0.0  ;;  %v1072_v38 = vmul.f32 0.2, %v944_v34  ;;  %704 = vmatmul.f32.gmra.mxu3 %v197_v32 }
  0xeb   :  { %v945_v42 = vadd.f32 %v1568_v35, %v432_v39  ;;  %365 = vmatmul.f32.gmra.mxu0 %v196_v31  ;;  %478 = vmatmul.f32.gmra.mxu1 %v197_v32 }
  0xec   :  { %v1136_v41 = vsel %vm1008_vm1, %v944_v34, %v1072_v38  ;;  %v544_v43 = vpop.f32.mrf.mxu2 }
  0xed   :  { %1200 = vst [vmem:[%s1921_s3 + $0x88] sm:$0xff] %v1136_v41  ;;  %v657_v44 = vpop.f32.mrf.mxu3  ;;  %vm1009_vm2 = vcmp.gt.f32.partialorder %v945_v42, 0.0  ;;  %v1073_v45 = vmul.f32 0.2, %v945_v42  ;;  %v206_v41 = vld [vmem:[%s1919_s0 + $0x1e0] sm:$0xff] }
  0xee   :  { %v658_v46 = vadd.f32 %v657_v44, %v544_v43 }
  0xef   :  { %v1137_v49 = vsel %vm1009_vm2, %v945_v42, %v1073_v45  ;;  %v207_v42 = vld [vmem:[%s1919_s0 + $0x1e8] sm:$0xff] }
  0xf0   :  { %v946_v50 = vadd.f32 %v1571_v40, %v658_v46  ;;  %1201 = vst [vmem:[%s1921_s3 + $0x90] sm:$0xff] %v1137_v49  ;;  %v321_v51 = vpop.f32.mrf.mxu0  ;;  %v434_v52 = vpop.f32.mrf.mxu1 }
  0xf1   :  { %594 = vmatmul.f32.gmra.mxu2 %v198_v47  ;;  %v435_v54 = vadd.f32 %v434_v52, %v321_v51 }
  0xf2   :  { %vm1010_vm3 = vcmp.gt.f32.partialorder %v946_v50, 0.0  ;;  %v1074_v53 = vmul.f32 0.2, %v946_v50  ;;  %707 = vmatmul.f32.gmra.mxu3 %v199_v48 }
  0xf3   :  { %v947_v56 = vadd.f32 %v1568_v35, %v435_v54  ;;  %368 = vmatmul.f32.gmra.mxu0 %v198_v47  ;;  %481 = vmatmul.f32.gmra.mxu1 %v199_v48 }
  0xf4   :  { %v1138_v55 = vsel %vm1010_vm3, %v946_v50, %v1074_v53  ;;  %v547_v57 = vpop.f32.mrf.mxu2 }
  0xf5   :  { %1202 = vst [vmem:[%s1921_s3 + $0x98] sm:$0xff] %v1138_v55  ;;  %v660_v58 = vpop.f32.mrf.mxu3  ;;  %vm1011_vm4 = vcmp.gt.f32.partialorder %v947_v56, 0.0  ;;  %v1075_v59 = vmul.f32 0.2, %v947_v56  ;;  %v208_v55 = vld [vmem:[%s1919_s0 + $0x1f0] sm:$0xff] }
  0xf6   :  { %v661_v60 = vadd.f32 %v660_v58, %v547_v57 }
  0xf7   :  { %v1139_v63 = vsel %vm1011_vm4, %v947_v56, %v1075_v59  ;;  %v209_v56 = vld [vmem:[%s1919_s0 + $0x1f8] sm:$0xff] }
  0xf8   :  { %v948_v0 = vadd.f32 %v1571_v40, %v661_v60  ;;  %1203 = vst [vmem:[%s1921_s3 + $0xa0] sm:$0xff] %v1139_v63  ;;  %v324_v1 = vpop.f32.mrf.mxu0  ;;  %v437_v2 = vpop.f32.mrf.mxu1 }
  0xf9   :  { %597 = vmatmul.f32.gmra.mxu2 %v200_v61  ;;  %v438_v4 = vadd.f32 %v437_v2, %v324_v1 }
  0xfa   :  { %vm1012_vm5 = vcmp.gt.f32.partialorder %v948_v0, 0.0  ;;  %v1076_v3 = vmul.f32 0.2, %v948_v0  ;;  %710 = vmatmul.f32.gmra.mxu3 %v201_v62 }
  0xfb   :  { %v949_v6 = vadd.f32 %v1568_v35, %v438_v4  ;;  %371 = vmatmul.f32.gmra.mxu0 %v200_v61  ;;  %484 = vmatmul.f32.gmra.mxu1 %v201_v62 }
  0xfc   :  { %v1140_v5 = vsel %vm1012_vm5, %v948_v0, %v1076_v3  ;;  %v550_v7 = vpop.f32.mrf.mxu2 }
  0xfd   :  { %1204 = vst [vmem:[%s1921_s3 + $0xa8] sm:$0xff] %v1140_v5  ;;  %v663_v8 = vpop.f32.mrf.mxu3  ;;  %vm1013_vm6 = vcmp.gt.f32.partialorder %v949_v6, 0.0  ;;  %v1077_v9 = vmul.f32 0.2, %v949_v6 }
  0xfe   :  { %v664_v10 = vadd.f32 %v663_v8, %v550_v7 }
  0xff   :  { %v1141_v13 = vsel %vm1013_vm6, %v949_v6, %v1077_v9 }
 0x100   :  { %v950_v14 = vadd.f32 %v1571_v40, %v664_v10  ;;  %1205 = vst [vmem:[%s1921_s3 + $0xb0] sm:$0xff] %v1141_v13  ;;  %v327_v15 = vpop.f32.mrf.mxu0  ;;  %v440_v16 = vpop.f32.mrf.mxu1 }
 0x101   :  { %600 = vmatmul.f32.gmra.mxu2 %v202_v11  ;;  %v441_v18 = vadd.f32 %v440_v16, %v327_v15 }
 0x102   :  { %vm1014_vm7 = vcmp.gt.f32.partialorder %v950_v14, 0.0  ;;  %v1078_v17 = vmul.f32 0.2, %v950_v14  ;;  %713 = vmatmul.f32.gmra.mxu3 %v203_v12 }
 0x103   :  { %v951_v20 = vadd.f32 %v1568_v35, %v441_v18  ;;  %374 = vmatmul.f32.gmra.mxu0 %v202_v11  ;;  %487 = vmatmul.f32.gmra.mxu1 %v203_v12 }
 0x104   :  { %v1142_v19 = vsel %vm1014_vm7, %v950_v14, %v1078_v17  ;;  %v553_v21 = vpop.f32.mrf.mxu2 }
 0x105   :  { %1206 = vst [vmem:[%s1921_s3 + $0xb8] sm:$0xff] %v1142_v19  ;;  %v666_v22 = vpop.f32.mrf.mxu3  ;;  %vm1015_vm8 = vcmp.gt.f32.partialorder %v951_v20, 0.0  ;;  %v1079_v23 = vmul.f32 0.2, %v951_v20 }
 0x106   :  { %v667_v24 = vadd.f32 %v666_v22, %v553_v21 }
 0x107   :  { %v1143_v27 = vsel %vm1015_vm8, %v951_v20, %v1079_v23 }
 0x108   :  { %v952_v28 = vadd.f32 %v1571_v40, %v667_v24  ;;  %1207 = vst [vmem:[%s1921_s3 + $0xc0] sm:$0xff] %v1143_v27  ;;  %v330_v29 = vpop.f32.mrf.mxu0  ;;  %v443_v30 = vpop.f32.mrf.mxu1 }
 0x109   :  { %603 = vmatmul.f32.gmra.mxu2 %v204_v25  ;;  %v444_v32 = vadd.f32 %v443_v30, %v330_v29 }
 0x10a   :  { %vm1016_vm9 = vcmp.gt.f32.partialorder %v952_v28, 0.0  ;;  %v1080_v31 = vmul.f32 0.2, %v952_v28  ;;  %716 = vmatmul.f32.gmra.mxu3 %v205_v26 }
 0x10b   :  { %v953_v34 = vadd.f32 %v1568_v35, %v444_v32  ;;  %377 = vmatmul.f32.gmra.mxu0 %v204_v25  ;;  %490 = vmatmul.f32.gmra.mxu1 %v205_v26 }
 0x10c   :  { %v1144_v33 = vsel %vm1016_vm9, %v952_v28, %v1080_v31  ;;  %v556_v36 = vpop.f32.mrf.mxu2 }
 0x10d   :  { %1208 = vst [vmem:[%s1921_s3 + $0xc8] sm:$0xff] %v1144_v33  ;;  %v669_v37 = vpop.f32.mrf.mxu3  ;;  %vm1017_vm10 = vcmp.gt.f32.partialorder %v953_v34, 0.0  ;;  %v1081_v38 = vmul.f32 0.2, %v953_v34 }
 0x10e   :  { %v670_v39 = vadd.f32 %v669_v37, %v556_v36 }
 0x10f   :  { %v1145_v43 = vsel %vm1017_vm10, %v953_v34, %v1081_v38 }
 0x110   :  { %v954_v44 = vadd.f32 %v1571_v40, %v670_v39  ;;  %1209 = vst [vmem:[%s1921_s3 + $0xd0] sm:$0xff] %v1145_v43  ;;  %v333_v45 = vpop.f32.mrf.mxu0  ;;  %v446_v46 = vpop.f32.mrf.mxu1 }
 0x111   :  { %606 = vmatmul.f32.gmra.mxu2 %v206_v41  ;;  %v447_v48 = vadd.f32 %v446_v46, %v333_v45 }
 0x112   :  { %vm1018_vm11 = vcmp.gt.f32.partialorder %v954_v44, 0.0  ;;  %v1082_v47 = vmul.f32 0.2, %v954_v44  ;;  %719 = vmatmul.f32.gmra.mxu3 %v207_v42 }
 0x113   :  { %v955_v50 = vadd.f32 %v1568_v35, %v447_v48  ;;  %380 = vmatmul.f32.gmra.mxu0 %v206_v41  ;;  %493 = vmatmul.f32.gmra.mxu1 %v207_v42 }
 0x114   :  { %v1146_v49 = vsel %vm1018_vm11, %v954_v44, %v1082_v47  ;;  %v559_v51 = vpop.f32.mrf.mxu2 }
 0x115   :  { %1210 = vst [vmem:[%s1921_s3 + $0xd8] sm:$0xff] %v1146_v49  ;;  %v672_v52 = vpop.f32.mrf.mxu3  ;;  %vm1019_vm12 = vcmp.gt.f32.partialorder %v955_v50, 0.0  ;;  %v1083_v53 = vmul.f32 0.2, %v955_v50 }
 0x116   :  { %v673_v54 = vadd.f32 %v672_v52, %v559_v51 }
 0x117   :  { %v1147_v57 = vsel %vm1019_vm12, %v955_v50, %v1083_v53 }
 0x118   :  { %v956_v58 = vadd.f32 %v1571_v40, %v673_v54  ;;  %1211 = vst [vmem:[%s1921_s3 + $0xe0] sm:$0xff] %v1147_v57  ;;  %v336_v59 = vpop.f32.mrf.mxu0  ;;  %v449_v60 = vpop.f32.mrf.mxu1 }
 0x119   :  { %609 = vmatmul.f32.gmra.mxu2 %v208_v55  ;;  %v450_v62 = vadd.f32 %v449_v60, %v336_v59 }
 0x11a   :  { %vm1020_vm13 = vcmp.gt.f32.partialorder %v956_v58, 0.0  ;;  %v1084_v61 = vmul.f32 0.2, %v956_v58  ;;  %722 = vmatmul.f32.gmra.mxu3 %v209_v56 }
 0x11b   :  { %v957_v0 = vadd.f32 %v1568_v35, %v450_v62  ;;  %383 = vmatmul.f32.gmra.mxu0 %v208_v55  ;;  %496 = vmatmul.f32.gmra.mxu1 %v209_v56 }
 0x11c   :  { %v1148_v63 = vsel %vm1020_vm13, %v956_v58, %v1084_v61  ;;  %v562_v1 = vpop.f32.mrf.mxu2 }
 0x11d   :  { %1212 = vst [vmem:[%s1921_s3 + $0xe8] sm:$0xff] %v1148_v63  ;;  %v675_v2 = vpop.f32.mrf.mxu3  ;;  %vm1021_vm14 = vcmp.gt.f32.partialorder %v957_v0, 0.0  ;;  %v1085_v3 = vmul.f32 0.2, %v957_v0 }
 0x11e   :  { %v676_v4 = vadd.f32 %v675_v2, %v562_v1 }
 0x11f   :  { %v1149_v5 = vsel %vm1021_vm14, %v957_v0, %v1085_v3 }
 0x120   :  { %v958_v6 = vadd.f32 %v1571_v40, %v676_v4  ;;  %1213 = vst [vmem:[%s1921_s3 + $0xf0] sm:$0xff] %v1149_v5  ;;  %v339_v7 = vpop.f32.mrf.mxu0  ;;  %v452_v8 = vpop.f32.mrf.mxu1 }
 0x121   :  { %v453_v10 = vadd.f32 %v452_v8, %v339_v7 }
 0x122   :  { %vm1022_vm15 = vcmp.gt.f32.partialorder %v958_v6, 0.0  ;;  %v1086_v9 = vmul.f32 0.2, %v958_v6 }
 0x123   :  { %v959_v12 = vadd.f32 %v1568_v35, %v453_v10 }
 0x124   :  { %v1150_v11 = vsel %vm1022_vm15, %v958_v6, %v1086_v9  ;;  %v565_v13 = vpop.f32.mrf.mxu2 }
 0x125   :  { %1214 = vst [vmem:[%s1921_s3 + $0xf8] sm:$0xff] %v1150_v11  ;;  %v678_v14 = vpop.f32.mrf.mxu3  ;;  %vm1023_vm0 = vcmp.gt.f32.partialorder %v959_v12, 0.0  ;;  %v1087_v15 = vmul.f32 0.2, %v959_v12 }
 0x126   :  { %v679_v16 = vadd.f32 %v678_v14, %v565_v13 }
 0x127   :  { %v1151_v17 = vsel %vm1023_vm0, %v959_v12, %v1087_v15 }
 0x128   :  { %v960_v18 = vadd.f32 %v1571_v40, %v679_v16  ;;  %1215 = vst [vmem:[%s1921_s3 + $0x100] sm:$0xff] %v1151_v17  ;;  %v342_v19 = vpop.f32.mrf.mxu0  ;;  %v455_v20 = vpop.f32.mrf.mxu1 }
 0x129   :  { %v456_v22 = vadd.f32 %v455_v20, %v342_v19 }
 0x12a   :  { %vm1024_vm1 = vcmp.gt.f32.partialorder %v960_v18, 0.0  ;;  %v1088_v21 = vmul.f32 0.2, %v960_v18 }
 0x12b   :  { %v961_v24 = vadd.f32 %v1568_v35, %v456_v22 }
 0x12c   :  { %v1152_v23 = vsel %vm1024_vm1, %v960_v18, %v1088_v21  ;;  %v568_v25 = vpop.f32.mrf.mxu2 }
 0x12d   :  { %1216 = vst [vmem:[%s1921_s3 + $0x108] sm:$0xff] %v1152_v23  ;;  %v681_v26 = vpop.f32.mrf.mxu3  ;;  %vm1025_vm2 = vcmp.gt.f32.partialorder %v961_v24, 0.0  ;;  %v1089_v27 = vmul.f32 0.2, %v961_v24 }
 0x12e   :  { %v682_v28 = vadd.f32 %v681_v26, %v568_v25 }
 0x12f   :  { %v1153_v29 = vsel %vm1025_vm2, %v961_v24, %v1089_v27 }
 0x130   :  { %v962_v30 = vadd.f32 %v1571_v40, %v682_v28  ;;  %1217 = vst [vmem:[%s1921_s3 + $0x110] sm:$0xff] %v1153_v29  ;;  %v345_v31 = vpop.f32.mrf.mxu0  ;;  %v458_v32 = vpop.f32.mrf.mxu1 }
 0x131   :  { %v459_v34 = vadd.f32 %v458_v32, %v345_v31 }
 0x132   :  { %vm1026_vm3 = vcmp.gt.f32.partialorder %v962_v30, 0.0  ;;  %v1090_v33 = vmul.f32 0.2, %v962_v30 }
 0x133   :  { %v963_v37 = vadd.f32 %v1568_v35, %v459_v34 }
 0x134   :  { %v1154_v36 = vsel %vm1026_vm3, %v962_v30, %v1090_v33  ;;  %v571_v38 = vpop.f32.mrf.mxu2 }
 0x135   :  { %1218 = vst [vmem:[%s1921_s3 + $0x118] sm:$0xff] %v1154_v36  ;;  %v684_v39 = vpop.f32.mrf.mxu3  ;;  %vm1027_vm4 = vcmp.gt.f32.partialorder %v963_v37, 0.0  ;;  %v1091_v41 = vmul.f32 0.2, %v963_v37 }
 0x136   :  { %v685_v42 = vadd.f32 %v684_v39, %v571_v38 }
 0x137   :  { %v1155_v43 = vsel %vm1027_vm4, %v963_v37, %v1091_v41 }
 0x138   :  { %v964_v44 = vadd.f32 %v1571_v40, %v685_v42  ;;  %1219 = vst [vmem:[%s1921_s3 + $0x120] sm:$0xff] %v1155_v43  ;;  %v348_v45 = vpop.f32.mrf.mxu0  ;;  %v461_v46 = vpop.f32.mrf.mxu1 }
 0x139   :  { %v462_v48 = vadd.f32 %v461_v46, %v348_v45 }
 0x13a   :  { %vm1028_vm5 = vcmp.gt.f32.partialorder %v964_v44, 0.0  ;;  %v1092_v47 = vmul.f32 0.2, %v964_v44 }
 0x13b   :  { %v965_v50 = vadd.f32 %v1568_v35, %v462_v48 }
 0x13c   :  { %v1156_v49 = vsel %vm1028_vm5, %v964_v44, %v1092_v47  ;;  %v574_v51 = vpop.f32.mrf.mxu2 }
 0x13d   :  { %1220 = vst [vmem:[%s1921_s3 + $0x128] sm:$0xff] %v1156_v49  ;;  %v687_v52 = vpop.f32.mrf.mxu3  ;;  %vm1029_vm6 = vcmp.gt.f32.partialorder %v965_v50, 0.0  ;;  %v1093_v53 = vmul.f32 0.2, %v965_v50 }
 0x13e   :  { %v688_v54 = vadd.f32 %v687_v52, %v574_v51 }
 0x13f   :  { %v1157_v55 = vsel %vm1029_vm6, %v965_v50, %v1093_v53 }
 0x140   :  { %v966_v56 = vadd.f32 %v1571_v40, %v688_v54  ;;  %1221 = vst [vmem:[%s1921_s3 + $0x130] sm:$0xff] %v1157_v55  ;;  %v351_v57 = vpop.f32.mrf.mxu0  ;;  %v464_v58 = vpop.f32.mrf.mxu1 }
 0x141   :  { %v465_v60 = vadd.f32 %v464_v58, %v351_v57 }
 0x142   :  { %vm1030_vm7 = vcmp.gt.f32.partialorder %v966_v56, 0.0  ;;  %v1094_v59 = vmul.f32 0.2, %v966_v56 }
 0x143   :  { %v967_v62 = vadd.f32 %v1568_v35, %v465_v60 }
 0x144   :  { %v1158_v61 = vsel %vm1030_vm7, %v966_v56, %v1094_v59  ;;  %v577_v63 = vpop.f32.mrf.mxu2 }
 0x145   :  { %1222 = vst [vmem:[%s1921_s3 + $0x138] sm:$0xff] %v1158_v61  ;;  %v690_v0 = vpop.f32.mrf.mxu3  ;;  %vm1031_vm8 = vcmp.gt.f32.partialorder %v967_v62, 0.0  ;;  %v1095_v1 = vmul.f32 0.2, %v967_v62 }
 0x146   :  { %v691_v2 = vadd.f32 %v690_v0, %v577_v63 }
 0x147   :  { %v1159_v3 = vsel %vm1031_vm8, %v967_v62, %v1095_v1 }
 0x148   :  { %v968_v4 = vadd.f32 %v1571_v40, %v691_v2  ;;  %1223 = vst [vmem:[%s1921_s3 + $0x140] sm:$0xff] %v1159_v3  ;;  %v354_v5 = vpop.f32.mrf.mxu0  ;;  %v467_v6 = vpop.f32.mrf.mxu1 }
 0x149   :  { %v468_v8 = vadd.f32 %v467_v6, %v354_v5 }
 0x14a   :  { %vm1032_vm9 = vcmp.gt.f32.partialorder %v968_v4, 0.0  ;;  %v1096_v7 = vmul.f32 0.2, %v968_v4 }
 0x14b   :  { %v969_v10 = vadd.f32 %v1568_v35, %v468_v8 }
 0x14c   :  { %v1160_v9 = vsel %vm1032_vm9, %v968_v4, %v1096_v7  ;;  %v580_v11 = vpop.f32.mrf.mxu2 }
 0x14d   :  { %1224 = vst [vmem:[%s1921_s3 + $0x148] sm:$0xff] %v1160_v9  ;;  %v693_v12 = vpop.f32.mrf.mxu3  ;;  %vm1033_vm10 = vcmp.gt.f32.partialorder %v969_v10, 0.0  ;;  %v1097_v13 = vmul.f32 0.2, %v969_v10 }
 0x14e   :  { %v694_v14 = vadd.f32 %v693_v12, %v580_v11 }
 0x14f   :  { %v1161_v15 = vsel %vm1033_vm10, %v969_v10, %v1097_v13 }
 0x150   :  { %v970_v16 = vadd.f32 %v1571_v40, %v694_v14  ;;  %1225 = vst [vmem:[%s1921_s3 + $0x150] sm:$0xff] %v1161_v15  ;;  %v357_v17 = vpop.f32.mrf.mxu0  ;;  %v470_v18 = vpop.f32.mrf.mxu1 }
 0x151   :  { %v471_v20 = vadd.f32 %v470_v18, %v357_v17 }
 0x152   :  { %vm1034_vm11 = vcmp.gt.f32.partialorder %v970_v16, 0.0  ;;  %v1098_v19 = vmul.f32 0.2, %v970_v16 }
 0x153   :  { %v971_v22 = vadd.f32 %v1568_v35, %v471_v20 }
 0x154   :  { %v1162_v21 = vsel %vm1034_vm11, %v970_v16, %v1098_v19  ;;  %v583_v23 = vpop.f32.mrf.mxu2 }
 0x155   :  { %1226 = vst [vmem:[%s1921_s3 + $0x158] sm:$0xff] %v1162_v21  ;;  %v696_v24 = vpop.f32.mrf.mxu3  ;;  %vm1035_vm12 = vcmp.gt.f32.partialorder %v971_v22, 0.0  ;;  %v1099_v25 = vmul.f32 0.2, %v971_v22 }
 0x156   :  { %v697_v26 = vadd.f32 %v696_v24, %v583_v23 }
 0x157   :  { %v1163_v27 = vsel %vm1035_vm12, %v971_v22, %v1099_v25 }
 0x158   :  { %v972_v28 = vadd.f32 %v1571_v40, %v697_v26  ;;  %1227 = vst [vmem:[%s1921_s3 + $0x160] sm:$0xff] %v1163_v27  ;;  %v360_v29 = vpop.f32.mrf.mxu0  ;;  %v473_v30 = vpop.f32.mrf.mxu1 }
 0x159   :  { %v474_v32 = vadd.f32 %v473_v30, %v360_v29 }
 0x15a   :  { %vm1036_vm13 = vcmp.gt.f32.partialorder %v972_v28, 0.0  ;;  %v1100_v31 = vmul.f32 0.2, %v972_v28 }
 0x15b   :  { %v973_v34 = vadd.f32 %v1568_v35, %v474_v32 }
 0x15c   :  { %v1164_v33 = vsel %vm1036_vm13, %v972_v28, %v1100_v31  ;;  %v586_v36 = vpop.f32.mrf.mxu2 }
 0x15d   :  { %1228 = vst [vmem:[%s1921_s3 + $0x168] sm:$0xff] %v1164_v33  ;;  %v699_v37 = vpop.f32.mrf.mxu3  ;;  %vm1037_vm14 = vcmp.gt.f32.partialorder %v973_v34, 0.0  ;;  %v1101_v38 = vmul.f32 0.2, %v973_v34 }
 0x15e   :  { %v700_v39 = vadd.f32 %v699_v37, %v586_v36 }
 0x15f   :  { %v1165_v41 = vsel %vm1037_vm14, %v973_v34, %v1101_v38 }
 0x160   :  { %v974_v42 = vadd.f32 %v1571_v40, %v700_v39  ;;  %1229 = vst [vmem:[%s1921_s3 + $0x170] sm:$0xff] %v1165_v41  ;;  %v363_v43 = vpop.f32.mrf.mxu0  ;;  %v476_v44 = vpop.f32.mrf.mxu1 }
 0x161   :  { %v477_v46 = vadd.f32 %v476_v44, %v363_v43 }
 0x162   :  { %vm1038_vm15 = vcmp.gt.f32.partialorder %v974_v42, 0.0  ;;  %v1102_v45 = vmul.f32 0.2, %v974_v42 }
 0x163   :  { %v975_v48 = vadd.f32 %v1568_v35, %v477_v46 }
 0x164   :  { %v1166_v47 = vsel %vm1038_vm15, %v974_v42, %v1102_v45  ;;  %v589_v49 = vpop.f32.mrf.mxu2 }
 0x165   :  { %1230 = vst [vmem:[%s1921_s3 + $0x178] sm:$0xff] %v1166_v47  ;;  %v702_v50 = vpop.f32.mrf.mxu3  ;;  %vm1039_vm0 = vcmp.gt.f32.partialorder %v975_v48, 0.0  ;;  %v1103_v51 = vmul.f32 0.2, %v975_v48 }
 0x166   :  { %v703_v52 = vadd.f32 %v702_v50, %v589_v49 }
 0x167   :  { %v1167_v53 = vsel %vm1039_vm0, %v975_v48, %v1103_v51 }
 0x168   :  { %v976_v54 = vadd.f32 %v1571_v40, %v703_v52  ;;  %1231 = vst [vmem:[%s1921_s3 + $0x180] sm:$0xff] %v1167_v53  ;;  %v366_v55 = vpop.f32.mrf.mxu0  ;;  %v479_v56 = vpop.f32.mrf.mxu1 }
 0x169   :  { %v480_v58 = vadd.f32 %v479_v56, %v366_v55 }
 0x16a   :  { %vm1040_vm1 = vcmp.gt.f32.partialorder %v976_v54, 0.0  ;;  %v1104_v57 = vmul.f32 0.2, %v976_v54 }
 0x16b   :  { %v977_v60 = vadd.f32 %v1568_v35, %v480_v58 }
 0x16c   :  { %v1168_v59 = vsel %vm1040_vm1, %v976_v54, %v1104_v57  ;;  %v592_v61 = vpop.f32.mrf.mxu2 }
 0x16d   :  { %1232 = vst [vmem:[%s1921_s3 + $0x188] sm:$0xff] %v1168_v59  ;;  %v705_v62 = vpop.f32.mrf.mxu3  ;;  %vm1041_vm2 = vcmp.gt.f32.partialorder %v977_v60, 0.0  ;;  %v1105_v63 = vmul.f32 0.2, %v977_v60 }
 0x16e   :  { %v706_v0 = vadd.f32 %v705_v62, %v592_v61 }
 0x16f   :  { %v1169_v1 = vsel %vm1041_vm2, %v977_v60, %v1105_v63 }
 0x170   :  { %v978_v2 = vadd.f32 %v1571_v40, %v706_v0  ;;  %1233 = vst [vmem:[%s1921_s3 + $0x190] sm:$0xff] %v1169_v1  ;;  %v369_v3 = vpop.f32.mrf.mxu0  ;;  %v482_v4 = vpop.f32.mrf.mxu1 }
 0x171   :  { %v483_v6 = vadd.f32 %v482_v4, %v369_v3 }
 0x172   :  { %vm1042_vm3 = vcmp.gt.f32.partialorder %v978_v2, 0.0  ;;  %v1106_v5 = vmul.f32 0.2, %v978_v2 }
 0x173   :  { %v979_v8 = vadd.f32 %v1568_v35, %v483_v6 }
 0x174   :  { %v1170_v7 = vsel %vm1042_vm3, %v978_v2, %v1106_v5  ;;  %v595_v9 = vpop.f32.mrf.mxu2 }
 0x175   :  { %1234 = vst [vmem:[%s1921_s3 + $0x198] sm:$0xff] %v1170_v7  ;;  %v708_v10 = vpop.f32.mrf.mxu3  ;;  %vm1043_vm4 = vcmp.gt.f32.partialorder %v979_v8, 0.0  ;;  %v1107_v11 = vmul.f32 0.2, %v979_v8 }
 0x176   :  { %v709_v12 = vadd.f32 %v708_v10, %v595_v9 }
 0x177   :  { %v1171_v13 = vsel %vm1043_vm4, %v979_v8, %v1107_v11 }
 0x178   :  { %v980_v14 = vadd.f32 %v1571_v40, %v709_v12  ;;  %1235 = vst [vmem:[%s1921_s3 + $0x1a0] sm:$0xff] %v1171_v13  ;;  %v372_v15 = vpop.f32.mrf.mxu0  ;;  %v485_v16 = vpop.f32.mrf.mxu1 }
 0x179   :  { %v486_v18 = vadd.f32 %v485_v16, %v372_v15 }
 0x17a   :  { %vm1044_vm5 = vcmp.gt.f32.partialorder %v980_v14, 0.0  ;;  %v1108_v17 = vmul.f32 0.2, %v980_v14 }
 0x17b   :  { %v981_v20 = vadd.f32 %v1568_v35, %v486_v18 }
 0x17c   :  { %v1172_v19 = vsel %vm1044_vm5, %v980_v14, %v1108_v17  ;;  %v598_v21 = vpop.f32.mrf.mxu2 }
 0x17d   :  { %1236 = vst [vmem:[%s1921_s3 + $0x1a8] sm:$0xff] %v1172_v19  ;;  %v711_v22 = vpop.f32.mrf.mxu3  ;;  %vm1045_vm6 = vcmp.gt.f32.partialorder %v981_v20, 0.0  ;;  %v1109_v23 = vmul.f32 0.2, %v981_v20 }
 0x17e   :  { %v712_v24 = vadd.f32 %v711_v22, %v598_v21 }
 0x17f   :  { %v1173_v25 = vsel %vm1045_vm6, %v981_v20, %v1109_v23 }
 0x180   :  { %v982_v26 = vadd.f32 %v1571_v40, %v712_v24  ;;  %1237 = vst [vmem:[%s1921_s3 + $0x1b0] sm:$0xff] %v1173_v25  ;;  %v375_v27 = vpop.f32.mrf.mxu0  ;;  %v488_v28 = vpop.f32.mrf.mxu1 }
 0x181   :  { %v489_v30 = vadd.f32 %v488_v28, %v375_v27 }
 0x182   :  { %vm1046_vm7 = vcmp.gt.f32.partialorder %v982_v26, 0.0  ;;  %v1110_v29 = vmul.f32 0.2, %v982_v26 }
 0x183   :  { %v983_v32 = vadd.f32 %v1568_v35, %v489_v30 }
 0x184   :  { %v1174_v31 = vsel %vm1046_vm7, %v982_v26, %v1110_v29  ;;  %v601_v33 = vpop.f32.mrf.mxu2 }
 0x185   :  { %1238 = vst [vmem:[%s1921_s3 + $0x1b8] sm:$0xff] %v1174_v31  ;;  %v714_v34 = vpop.f32.mrf.mxu3  ;;  %vm1047_vm8 = vcmp.gt.f32.partialorder %v983_v32, 0.0  ;;  %v1111_v36 = vmul.f32 0.2, %v983_v32 }
 0x186   :  { %v715_v37 = vadd.f32 %v714_v34, %v601_v33 }
 0x187   :  { %v1175_v38 = vsel %vm1047_vm8, %v983_v32, %v1111_v36 }
 0x188   :  { %v984_v39 = vadd.f32 %v1571_v40, %v715_v37  ;;  %1239 = vst [vmem:[%s1921_s3 + $0x1c0] sm:$0xff] %v1175_v38  ;;  %v378_v41 = vpop.f32.mrf.mxu0  ;;  %v491_v42 = vpop.f32.mrf.mxu1 }
 0x189   :  { %v492_v44 = vadd.f32 %v491_v42, %v378_v41 }
 0x18a   :  { %vm1048_vm9 = vcmp.gt.f32.partialorder %v984_v39, 0.0  ;;  %v1112_v43 = vmul.f32 0.2, %v984_v39 }
 0x18b   :  { %v985_v46 = vadd.f32 %v1568_v35, %v492_v44 }
 0x18c   :  { %v1176_v45 = vsel %vm1048_vm9, %v984_v39, %v1112_v43  ;;  %v604_v47 = vpop.f32.mrf.mxu2 }
 0x18d   :  { %1240 = vst [vmem:[%s1921_s3 + $0x1c8] sm:$0xff] %v1176_v45  ;;  %v717_v48 = vpop.f32.mrf.mxu3  ;;  %vm1049_vm10 = vcmp.gt.f32.partialorder %v985_v46, 0.0  ;;  %v1113_v49 = vmul.f32 0.2, %v985_v46 }
 0x18e   :  { %v718_v50 = vadd.f32 %v717_v48, %v604_v47 }
 0x18f   :  { %v1177_v51 = vsel %vm1049_vm10, %v985_v46, %v1113_v49 }
 0x190   :  { %v986_v52 = vadd.f32 %v1571_v40, %v718_v50  ;;  %1241 = vst [vmem:[%s1921_s3 + $0x1d0] sm:$0xff] %v1177_v51  ;;  %v381_v53 = vpop.f32.mrf.mxu0  ;;  %v494_v54 = vpop.f32.mrf.mxu1 }
 0x191   :  { %v495_v56 = vadd.f32 %v494_v54, %v381_v53 }
 0x192   :  { %vm1050_vm11 = vcmp.gt.f32.partialorder %v986_v52, 0.0  ;;  %v1114_v55 = vmul.f32 0.2, %v986_v52 }
 0x193   :  { %v987_v58 = vadd.f32 %v1568_v35, %v495_v56 }
 0x194   :  { %v1178_v57 = vsel %vm1050_vm11, %v986_v52, %v1114_v55  ;;  %v607_v59 = vpop.f32.mrf.mxu2 }
 0x195   :  { %1242 = vst [vmem:[%s1921_s3 + $0x1d8] sm:$0xff] %v1178_v57  ;;  %v720_v60 = vpop.f32.mrf.mxu3  ;;  %vm1051_vm12 = vcmp.gt.f32.partialorder %v987_v58, 0.0  ;;  %v1115_v61 = vmul.f32 0.2, %v987_v58 }
 0x196   :  { %v721_v62 = vadd.f32 %v720_v60, %v607_v59 }
 0x197   :  { %v1179_v63 = vsel %vm1051_vm12, %v987_v58, %v1115_v61 }
 0x198   :  { %v988_v0 = vadd.f32 %v1571_v40, %v721_v62  ;;  %1243 = vst [vmem:[%s1921_s3 + $0x1e0] sm:$0xff] %v1179_v63  ;;  %v384_v1 = vpop.f32.mrf.mxu0  ;;  %v497_v2 = vpop.f32.mrf.mxu1 }
 0x199   :  { %v498_v4 = vadd.f32 %v497_v2, %v384_v1 }
 0x19a   :  { %vm1052_vm13 = vcmp.gt.f32.partialorder %v988_v0, 0.0  ;;  %v1116_v3 = vmul.f32 0.2, %v988_v0 }
 0x19b   :  { %v989_v6 = vadd.f32 %v1568_v35, %v498_v4 }
 0x19c   :  { %v1180_v5 = vsel %vm1052_vm13, %v988_v0, %v1116_v3  ;;  %v610_v7 = vpop.f32.mrf.mxu2 }
 0x19d   :  { %1244 = vst [vmem:[%s1921_s3 + $0x1e8] sm:$0xff] %v1180_v5  ;;  %v723_v8 = vpop.f32.mrf.mxu3  ;;  %vm1053_vm14 = vcmp.gt.f32.partialorder %v989_v6, 0.0  ;;  %v1117_v9 = vmul.f32 0.2, %v989_v6 }
 0x19e   :  { %v724_v10 = vadd.f32 %v723_v8, %v610_v7 }
 0x19f   :  { %v1181_v11 = vsel %vm1053_vm14, %v989_v6, %v1117_v9 }
 0x1a0   :  { %v990_v12 = vadd.f32 %v1571_v40, %v724_v10  ;;  %1245 = vst [vmem:[%s1921_s3 + $0x1f0] sm:$0xff] %v1181_v11 }
 0x1a2   :  { %vm1054_vm15 = vcmp.gt.f32.partialorder %v990_v12, 0.0  ;;  %v1118_v13 = vmul.f32 0.2, %v990_v12 }
 0x1a4   :  { %v1182_v14 = vsel %vm1054_vm15, %v990_v12, %v1118_v13 }
 0x1a5   :  { %1246 = vst [vmem:[%s1921_s3 + $0x1f8] sm:$0xff] %v1182_v14 }

// kernel: last_layer_single_forward.19
= control target key start
LH: loop header
LB: loop body
LE: loop exit
PB: predicated region body
PF: predicated region fallthrough
CT: control target
= control target key end

     0   :  { %s2567_s7 = inlined_call_operand.vmem [shape: f32[128,128], index: 7, kind: input, shape index: {}]   ;;  %s2568_s6 = inlined_call_operand.vmem [shape: f32[128,128], index: 6, kind: input, shape index: {}]   ;;  %s2569_s4 = inlined_call_operand.vmem [shape: f32[128,128], index: 4, kind: input, shape index: {}]   ;;  %s2570_s3 = inlined_call_operand.vmem [shape: f32[128,128], index: 3, kind: input, shape index: {}]   ;;  %s2571_s2 = inlined_call_operand.vmem [shape: f32[256,128], index: 2, kind: input, shape index: {}]   ;;  %s2572_s1 = inlined_call_operand.vmem [shape: f32[256,128], index: 1, kind: input, shape index: {}]   ;;  %s2573_s0 = inlined_call_operand.vmem [shape: f32[256,128], index: 0, kind: input, shape index: {}]   ;;  %s2574_s5 = inlined_call_operand.vmem [shape: f32[1,128], index: 5, kind: input, shape index: {}]   ;;  %s2575_s8 = inlined_call_operand.vmem [shape: f32[1,128], index: 8, kind: input, shape index: {}]   ;;  %s2576_s9 = inlined_call_operand.vmem [shape: f32[256,128], index: 9, kind: output, shape index: {0}]   ;;  %s2577_s10 = inlined_call_operand.vmem [shape: f32[256,128], index: 10, kind: output, shape index: {1}]  }
   0x1   :  { %v455_v0 = vld [vmem:[%s2567_s7 + $0x78] sm:$0xff]  ;;  %v454_v4 = vld [vmem:[%s2567_s7 + $0x70] sm:$0xff]  ;;  %v453_v8 = vld [vmem:[%s2567_s7 + $0x68] sm:$0xff] }
   0x2   :  { %v439_v1 = vld [vmem:[%s2568_s6 + $0x78] sm:$0xff]  ;;  %456 = vmatpush.msra.mxu2 %v455_v0  ;;  %v438_v5 = vld [vmem:[%s2568_s6 + $0x70] sm:$0xff]  ;;  %v437_v9 = vld [vmem:[%s2568_s6 + $0x68] sm:$0xff] }
   0x3   :  { %v129_v2 = vld [vmem:[%s2569_s4 + $0x78] sm:$0xff]  ;;  %569 = vmatpush.msra.mxu3 %v439_v1  ;;  %v128_v6 = vld [vmem:[%s2569_s4 + $0x70] sm:$0xff]  ;;  %v127_v10 = vld [vmem:[%s2569_s4 + $0x68] sm:$0xff] }
   0x4   :  { %v113_v3 = vld [vmem:[%s2570_s3 + $0x78] sm:$0xff]  ;;  %130 = vmatpush.msra.mxu0 %v129_v2  ;;  %v112_v7 = vld [vmem:[%s2570_s3 + $0x70] sm:$0xff]  ;;  %457 = vmatpush.msra.mxu2 %v454_v4  ;;  %v111_v11 = vld [vmem:[%s2570_s3 + $0x68] sm:$0xff] }
   0x5   :  { %243 = vmatpush.msra.mxu1 %v113_v3  ;;  %570 = vmatpush.msra.mxu3 %v438_v5  ;;  %v452_v12 = vld [vmem:[%s2567_s7 + $0x60] sm:$0xff]  ;;  %v451_v16 = vld [vmem:[%s2567_s7 + $0x58] sm:$0xff]  ;;  %v450_v20 = vld [vmem:[%s2567_s7 + $0x50] sm:$0xff] }
   0x6   :  { %131 = vmatpush.msra.mxu0 %v128_v6  ;;  %v436_v13 = vld [vmem:[%s2568_s6 + $0x60] sm:$0xff]  ;;  %458 = vmatpush.msra.mxu2 %v453_v8  ;;  %v435_v17 = vld [vmem:[%s2568_s6 + $0x58] sm:$0xff]  ;;  %v434_v21 = vld [vmem:[%s2568_s6 + $0x50] sm:$0xff] }
   0x7   :  { %244 = vmatpush.msra.mxu1 %v112_v7  ;;  %571 = vmatpush.msra.mxu3 %v437_v9  ;;  %v126_v14 = vld [vmem:[%s2569_s4 + $0x60] sm:$0xff]  ;;  %v125_v18 = vld [vmem:[%s2569_s4 + $0x58] sm:$0xff]  ;;  %v124_v22 = vld [vmem:[%s2569_s4 + $0x50] sm:$0xff] }
   0x8   :  { %v110_v15 = vld [vmem:[%s2570_s3 + $0x60] sm:$0xff]  ;;  %132 = vmatpush.msra.mxu0 %v127_v10  ;;  %459 = vmatpush.msra.mxu2 %v452_v12  ;;  %v109_v19 = vld [vmem:[%s2570_s3 + $0x58] sm:$0xff]  ;;  %v108_v23 = vld [vmem:[%s2570_s3 + $0x50] sm:$0xff] }
   0x9   :  { %245 = vmatpush.msra.mxu1 %v111_v11  ;;  %572 = vmatpush.msra.mxu3 %v436_v13  ;;  %v449_v24 = vld [vmem:[%s2567_s7 + $0x48] sm:$0xff]  ;;  %v448_v28 = vld [vmem:[%s2567_s7 + $0x40] sm:$0xff]  ;;  %v447_v32 = vld [vmem:[%s2567_s7 + $0x38] sm:$0xff] }
   0xa   :  { %133 = vmatpush.msra.mxu0 %v126_v14  ;;  %460 = vmatpush.msra.mxu2 %v451_v16  ;;  %v433_v25 = vld [vmem:[%s2568_s6 + $0x48] sm:$0xff]  ;;  %v432_v29 = vld [vmem:[%s2568_s6 + $0x40] sm:$0xff]  ;;  %v431_v33 = vld [vmem:[%s2568_s6 + $0x38] sm:$0xff] }
   0xb   :  { %246 = vmatpush.msra.mxu1 %v110_v15  ;;  %573 = vmatpush.msra.mxu3 %v435_v17  ;;  %v123_v26 = vld [vmem:[%s2569_s4 + $0x48] sm:$0xff]  ;;  %v122_v30 = vld [vmem:[%s2569_s4 + $0x40] sm:$0xff]  ;;  %v121_v34 = vld [vmem:[%s2569_s4 + $0x38] sm:$0xff] }
   0xc   :  { %134 = vmatpush.msra.mxu0 %v125_v18  ;;  %461 = vmatpush.msra.mxu2 %v450_v20  ;;  %v107_v27 = vld [vmem:[%s2570_s3 + $0x48] sm:$0xff]  ;;  %v106_v31 = vld [vmem:[%s2570_s3 + $0x40] sm:$0xff]  ;;  %v105_v35 = vld [vmem:[%s2570_s3 + $0x38] sm:$0xff] }
   0xd   :  { %247 = vmatpush.msra.mxu1 %v109_v19  ;;  %574 = vmatpush.msra.mxu3 %v434_v21  ;;  %v446_v36 = vld [vmem:[%s2567_s7 + $0x30] sm:$0xff]  ;;  %v445_v40 = vld [vmem:[%s2567_s7 + $0x28] sm:$0xff]  ;;  %v444_v44 = vld [vmem:[%s2567_s7 + $0x20] sm:$0xff] }
   0xe   :  { %135 = vmatpush.msra.mxu0 %v124_v22  ;;  %462 = vmatpush.msra.mxu2 %v449_v24  ;;  %v430_v37 = vld [vmem:[%s2568_s6 + $0x30] sm:$0xff]  ;;  %v429_v41 = vld [vmem:[%s2568_s6 + $0x28] sm:$0xff]  ;;  %v428_v45 = vld [vmem:[%s2568_s6 + $0x20] sm:$0xff] }
   0xf   :  { %248 = vmatpush.msra.mxu1 %v108_v23  ;;  %575 = vmatpush.msra.mxu3 %v433_v25  ;;  %v120_v38 = vld [vmem:[%s2569_s4 + $0x30] sm:$0xff]  ;;  %v119_v42 = vld [vmem:[%s2569_s4 + $0x28] sm:$0xff]  ;;  %v118_v46 = vld [vmem:[%s2569_s4 + $0x20] sm:$0xff] }
  0x10   :  { %136 = vmatpush.msra.mxu0 %v123_v26  ;;  %463 = vmatpush.msra.mxu2 %v448_v28  ;;  %v104_v39 = vld [vmem:[%s2570_s3 + $0x30] sm:$0xff]  ;;  %v103_v43 = vld [vmem:[%s2570_s3 + $0x28] sm:$0xff]  ;;  %v102_v47 = vld [vmem:[%s2570_s3 + $0x20] sm:$0xff] }
  0x11   :  { %249 = vmatpush.msra.mxu1 %v107_v27  ;;  %576 = vmatpush.msra.mxu3 %v432_v29  ;;  %v443_v48 = vld [vmem:[%s2567_s7 + $0x18] sm:$0xff]  ;;  %v442_v52 = vld [vmem:[%s2567_s7 + $0x10] sm:$0xff]  ;;  %v441_v56 = vld [vmem:[%s2567_s7 + $0x8] sm:$0xff] }
  0x12   :  { %137 = vmatpush.msra.mxu0 %v122_v30  ;;  %464 = vmatpush.msra.mxu2 %v447_v32  ;;  %v427_v49 = vld [vmem:[%s2568_s6 + $0x18] sm:$0xff]  ;;  %v426_v53 = vld [vmem:[%s2568_s6 + $0x10] sm:$0xff]  ;;  %v425_v57 = vld [vmem:[%s2568_s6 + $0x8] sm:$0xff] }
  0x13   :  { %250 = vmatpush.msra.mxu1 %v106_v31  ;;  %577 = vmatpush.msra.mxu3 %v431_v33  ;;  %v117_v50 = vld [vmem:[%s2569_s4 + $0x18] sm:$0xff]  ;;  %v116_v54 = vld [vmem:[%s2569_s4 + $0x10] sm:$0xff]  ;;  %v115_v58 = vld [vmem:[%s2569_s4 + $0x8] sm:$0xff] }
  0x14   :  { %138 = vmatpush.msra.mxu0 %v121_v34  ;;  %465 = vmatpush.msra.mxu2 %v446_v36  ;;  %v101_v51 = vld [vmem:[%s2570_s3 + $0x18] sm:$0xff]  ;;  %v100_v55 = vld [vmem:[%s2570_s3 + $0x10] sm:$0xff]  ;;  %v99_v59 = vld [vmem:[%s2570_s3 + $0x8] sm:$0xff] }
  0x15   :  { %251 = vmatpush.msra.mxu1 %v105_v35  ;;  %578 = vmatpush.msra.mxu3 %v430_v37  ;;  %v440_v60 = vld [vmem:[%s2567_s7] sm:$0xff]  ;;  %v35_v3 = vld [vmem:[%s2571_s2 + $0x8] sm:$0xff]  ;;  %v36_v6 = vld [vmem:[%s2571_s2 + $0x10] sm:$0xff] }
  0x16   :  { %139 = vmatpush.msra.mxu0 %v120_v38  ;;  %466 = vmatpush.msra.mxu2 %v445_v40  ;;  %v424_v61 = vld [vmem:[%s2568_s6] sm:$0xff]  ;;  %v393_v4 = vld [vmem:[%s2572_s1 + $0x8] sm:$0xff]  ;;  %v394_v7 = vld [vmem:[%s2572_s1 + $0x10] sm:$0xff] }
  0x17   :  { %252 = vmatpush.msra.mxu1 %v104_v39  ;;  %579 = vmatpush.msra.mxu3 %v429_v41  ;;  %v114_v62 = vld [vmem:[%s2569_s4] sm:$0xff]  ;;  %v67_v5 = vld [vmem:[%s2573_s0 + $0x8] sm:$0xff]  ;;  %v68_v8 = vld [vmem:[%s2573_s0 + $0x10] sm:$0xff] }
  0x18   :  { %140 = vmatpush.msra.mxu0 %v119_v42  ;;  %467 = vmatpush.msra.mxu2 %v444_v44  ;;  %v98_v63 = vld [vmem:[%s2570_s3] sm:$0xff]  ;;  %v37_v9 = vld [vmem:[%s2571_s2 + $0x18] sm:$0xff]  ;;  %v39_v15 = vld [vmem:[%s2571_s2 + $0x28] sm:$0xff] }
  0x19   :  { %253 = vmatpush.msra.mxu1 %v103_v43  ;;  %580 = vmatpush.msra.mxu3 %v428_v45  ;;  %v34_v0 = vld [vmem:[%s2571_s2] sm:$0xff]  ;;  %v395_v10 = vld [vmem:[%s2572_s1 + $0x18] sm:$0xff]  ;;  %v397_v16 = vld [vmem:[%s2572_s1 + $0x28] sm:$0xff] }
  0x1a   :  { %141 = vmatpush.msra.mxu0 %v118_v46  ;;  %468 = vmatpush.msra.mxu2 %v443_v48  ;;  %v392_v1 = vld [vmem:[%s2572_s1] sm:$0xff]  ;;  %v69_v11 = vld [vmem:[%s2573_s0 + $0x18] sm:$0xff]  ;;  %v71_v17 = vld [vmem:[%s2573_s0 + $0x28] sm:$0xff] }
  0x1b   :  { %254 = vmatpush.msra.mxu1 %v102_v47  ;;  %581 = vmatpush.msra.mxu3 %v427_v49  ;;  %v66_v2 = vld [vmem:[%s2573_s0] sm:$0xff]  ;;  %v40_v18 = vld [vmem:[%s2571_s2 + $0x30] sm:$0xff]  ;;  %v41_v21 = vld [vmem:[%s2571_s2 + $0x38] sm:$0xff] }
  0x1c   :  { %142 = vmatpush.msra.mxu0 %v117_v50  ;;  %469 = vmatpush.msra.mxu2 %v442_v52  ;;  %v38_v12 = vld [vmem:[%s2571_s2 + $0x20] sm:$0xff]  ;;  %v398_v19 = vld [vmem:[%s2572_s1 + $0x30] sm:$0xff]  ;;  %v399_v22 = vld [vmem:[%s2572_s1 + $0x38] sm:$0xff] }
  0x1d   :  { %255 = vmatpush.msra.mxu1 %v101_v51  ;;  %582 = vmatpush.msra.mxu3 %v426_v53  ;;  %v396_v13 = vld [vmem:[%s2572_s1 + $0x20] sm:$0xff]  ;;  %v72_v20 = vld [vmem:[%s2573_s0 + $0x30] sm:$0xff]  ;;  %v73_v23 = vld [vmem:[%s2573_s0 + $0x38] sm:$0xff] }
  0x1e   :  { %143 = vmatpush.msra.mxu0 %v116_v54  ;;  %470 = vmatpush.msra.mxu2 %v441_v56  ;;  %v70_v14 = vld [vmem:[%s2573_s0 + $0x20] sm:$0xff]  ;;  %v43_v27 = vld [vmem:[%s2571_s2 + $0x48] sm:$0xff]  ;;  %v44_v30 = vld [vmem:[%s2571_s2 + $0x50] sm:$0xff] }
  0x1f   :  { %256 = vmatpush.msra.mxu1 %v100_v55  ;;  %583 = vmatpush.msra.mxu3 %v425_v57  ;;  %v42_v24 = vld [vmem:[%s2571_s2 + $0x40] sm:$0xff]  ;;  %v401_v28 = vld [vmem:[%s2572_s1 + $0x48] sm:$0xff]  ;;  %v402_v31 = vld [vmem:[%s2572_s1 + $0x50] sm:$0xff] }
  0x20   :  { %144 = vmatpush.msra.mxu0 %v115_v58  ;;  %471 = vmatpush.msra.mxu2 %v440_v60  ;;  %v400_v25 = vld [vmem:[%s2572_s1 + $0x40] sm:$0xff]  ;;  %v75_v29 = vld [vmem:[%s2573_s0 + $0x48] sm:$0xff]  ;;  %v76_v32 = vld [vmem:[%s2573_s0 + $0x50] sm:$0xff] }
  0x21   :  { %257 = vmatpush.msra.mxu1 %v99_v59  ;;  %584 = vmatpush.msra.mxu3 %v424_v61  ;;  %v74_v26 = vld [vmem:[%s2573_s0 + $0x40] sm:$0xff]  ;;  %v45_v33 = vld [vmem:[%s2571_s2 + $0x58] sm:$0xff]  ;;  %v47_v39 = vld [vmem:[%s2571_s2 + $0x68] sm:$0xff] }
  0x22   :  { %145 = vmatpush.msra.mxu0 %v114_v62  ;;  %472 = vmatmul.f32.vlgmr.msra.gmra.mxu2 %v34_v0  ;;  %v403_v34 = vld [vmem:[%s2572_s1 + $0x58] sm:$0xff]  ;;  %v46_v36 = vld [vmem:[%s2571_s2 + $0x60] sm:$0xff]  ;;  %v405_v40 = vld [vmem:[%s2572_s1 + $0x68] sm:$0xff] }
  0x23   :  { %258 = vmatpush.msra.mxu1 %v98_v63  ;;  %585 = vmatmul.f32.vlgmr.msra.gmra.mxu3 %v392_v1  ;;  %v77_v35 = vld [vmem:[%s2573_s0 + $0x58] sm:$0xff]  ;;  %v404_v37 = vld [vmem:[%s2572_s1 + $0x60] sm:$0xff]  ;;  %v79_v41 = vld [vmem:[%s2573_s0 + $0x68] sm:$0xff] }
  0x24   :  { %146 = vmatmul.f32.vlgmr.msra.gmra.mxu0 %v34_v0  ;;  %259 = vmatmul.f32.vlgmr.msra.gmra.mxu1 %v66_v2  ;;  %v78_v38 = vld [vmem:[%s2573_s0 + $0x60] sm:$0xff]  ;;  %v48_v42 = vld [vmem:[%s2571_s2 + $0x70] sm:$0xff]  ;;  %v49_v45 = vld [vmem:[%s2571_s2 + $0x78] sm:$0xff] }
  0x25   :  { %v406_v43 = vld [vmem:[%s2572_s1 + $0x70] sm:$0xff]  ;;  %v407_v46 = vld [vmem:[%s2572_s1 + $0x78] sm:$0xff]  ;;  %v2063_v48 = vld [vmem:[%s2574_s5] ss:$0 sm:$0xff] }
  0x26   :  { %v80_v44 = vld [vmem:[%s2573_s0 + $0x70] sm:$0xff]  ;;  %v81_v47 = vld [vmem:[%s2573_s0 + $0x78] sm:$0xff]  ;;  %v50_v49 = vld [vmem:[%s2571_s2 + $0x80] sm:$0xff] }
  0x27   :  { %v408_v50 = vld [vmem:[%s2572_s1 + $0x80] sm:$0xff]  ;;  %v51_v60 = vld [vmem:[%s2571_s2 + $0x88] sm:$0xff] }
  0x28   :  { %v82_v53 = vld [vmem:[%s2573_s0 + $0x80] sm:$0xff]  ;;  %v409_v61 = vld [vmem:[%s2572_s1 + $0x88] sm:$0xff] }
  0x29   :  { %v2080_v56 = vld [vmem:[%s2575_s8] ss:$0 sm:$0xff]  ;;  %v83_v1 = vld [vmem:[%s2573_s0 + $0x88] sm:$0xff] }
  0x2a   :  { %475 = vmatmul.f32.gmra.mxu2 %v35_v3 }
  0x2b   :  { %588 = vmatmul.f32.gmra.mxu3 %v393_v4 }
  0x2c   :  { %149 = vmatmul.f32.gmra.mxu0 %v35_v3  ;;  %262 = vmatmul.f32.gmra.mxu1 %v67_v5 }
  0x32   :  { %478 = vmatmul.f32.gmra.mxu2 %v36_v6 }
  0x33   :  { %591 = vmatmul.f32.gmra.mxu3 %v394_v7 }
  0x34   :  { %152 = vmatmul.f32.gmra.mxu0 %v36_v6  ;;  %265 = vmatmul.f32.gmra.mxu1 %v68_v8 }
  0x3a   :  { %481 = vmatmul.f32.gmra.mxu2 %v37_v9 }
  0x3b   :  { %594 = vmatmul.f32.gmra.mxu3 %v395_v10  ;;  %v52_v10 = vld [vmem:[%s2571_s2 + $0x90] sm:$0xff] }
  0x3c   :  { %155 = vmatmul.f32.gmra.mxu0 %v37_v9  ;;  %268 = vmatmul.f32.gmra.mxu1 %v69_v11  ;;  %v410_v11 = vld [vmem:[%s2572_s1 + $0x90] sm:$0xff] }
  0x42   :  { %484 = vmatmul.f32.gmra.mxu2 %v38_v12 }
  0x43   :  { %597 = vmatmul.f32.gmra.mxu3 %v396_v13 }
  0x44   :  { %158 = vmatmul.f32.gmra.mxu0 %v38_v12  ;;  %271 = vmatmul.f32.gmra.mxu1 %v70_v14 }
  0x4a   :  { %487 = vmatmul.f32.gmra.mxu2 %v39_v15 }
  0x4b   :  { %600 = vmatmul.f32.gmra.mxu3 %v397_v16 }
  0x4c   :  { %161 = vmatmul.f32.gmra.mxu0 %v39_v15  ;;  %274 = vmatmul.f32.gmra.mxu1 %v71_v17  ;;  %v84_v15 = vld [vmem:[%s2573_s0 + $0x90] sm:$0xff] }
  0x52   :  { %490 = vmatmul.f32.gmra.mxu2 %v40_v18 }
  0x53   :  { %603 = vmatmul.f32.gmra.mxu3 %v398_v19 }
  0x54   :  { %164 = vmatmul.f32.gmra.mxu0 %v40_v18  ;;  %277 = vmatmul.f32.gmra.mxu1 %v72_v20 }
  0x5a   :  { %493 = vmatmul.f32.gmra.mxu2 %v41_v21 }
  0x5b   :  { %606 = vmatmul.f32.gmra.mxu3 %v399_v22 }
  0x5c   :  { %167 = vmatmul.f32.gmra.mxu0 %v41_v21  ;;  %280 = vmatmul.f32.gmra.mxu1 %v73_v23 }
  0x62   :  { %496 = vmatmul.f32.gmra.mxu2 %v42_v24 }
  0x63   :  { %609 = vmatmul.f32.gmra.mxu3 %v400_v25 }
  0x64   :  { %170 = vmatmul.f32.gmra.mxu0 %v42_v24  ;;  %283 = vmatmul.f32.gmra.mxu1 %v74_v26  ;;  %v53_v26 = vld [vmem:[%s2571_s2 + $0x98] sm:$0xff] }
  0x6a   :  { %499 = vmatmul.f32.gmra.mxu2 %v43_v27 }
  0x6b   :  { %612 = vmatmul.f32.gmra.mxu3 %v401_v28 }
  0x6c   :  { %173 = vmatmul.f32.gmra.mxu0 %v43_v27  ;;  %286 = vmatmul.f32.gmra.mxu1 %v75_v29  ;;  %v411_v27 = vld [vmem:[%s2572_s1 + $0x98] sm:$0xff] }
  0x72   :  { %502 = vmatmul.f32.gmra.mxu2 %v44_v30 }
  0x73   :  { %615 = vmatmul.f32.gmra.mxu3 %v402_v31  ;;  %v85_v31 = vld [vmem:[%s2573_s0 + $0x98] sm:$0xff] }
  0x74   :  { %176 = vmatmul.f32.gmra.mxu0 %v44_v30  ;;  %289 = vmatmul.f32.gmra.mxu1 %v76_v32 }
  0x7a   :  { %505 = vmatmul.f32.gmra.mxu2 %v45_v33 }
  0x7b   :  { %618 = vmatmul.f32.gmra.mxu3 %v403_v34  ;;  %v1668_v34 = vmov 0.0  }
  0x7c   :  { %179 = vmatmul.f32.gmra.mxu0 %v45_v33  ;;  %292 = vmatmul.f32.gmra.mxu1 %v77_v35  ;;  %1562 = vst [vmem:[%s2577_s10 + $0x30] sm:$0xff] %v1668_v34 }
  0x7d   :  { %1563 = vst [vmem:[%s2577_s10 + $0x38] sm:$0xff] %v1668_v34 }
  0x7e   :  { %1564 = vst [vmem:[%s2577_s10 + $0x40] sm:$0xff] %v1668_v34 }
  0x7f   :  { %1565 = vst [vmem:[%s2577_s10 + $0x48] sm:$0xff] %v1668_v34 }
  0x80   :  { %1566 = vst [vmem:[%s2577_s10 + $0x50] sm:$0xff] %v1668_v34 }
  0x81   :  { %1567 = vst [vmem:[%s2577_s10 + $0x58] sm:$0xff] %v1668_v34 }
  0x82   :  { %508 = vmatmul.f32.gmra.mxu2 %v46_v36  ;;  %1568 = vst [vmem:[%s2577_s10 + $0x60] sm:$0xff] %v1668_v34 }
  0x83   :  { %621 = vmatmul.f32.gmra.mxu3 %v404_v37  ;;  %1569 = vst [vmem:[%s2577_s10 + $0x68] sm:$0xff] %v1668_v34 }
  0x84   :  { %182 = vmatmul.f32.gmra.mxu0 %v46_v36  ;;  %295 = vmatmul.f32.gmra.mxu1 %v78_v38  ;;  %1570 = vst [vmem:[%s2577_s10 + $0x70] sm:$0xff] %v1668_v34 }
  0x85   :  { %1571 = vst [vmem:[%s2577_s10 + $0x78] sm:$0xff] %v1668_v34 }
  0x86   :  { %1572 = vst [vmem:[%s2577_s10 + $0x80] sm:$0xff] %v1668_v34 }
  0x87   :  { %1573 = vst [vmem:[%s2577_s10 + $0x88] sm:$0xff] %v1668_v34 }
  0x88   :  { %1574 = vst [vmem:[%s2577_s10 + $0x90] sm:$0xff] %v1668_v34 }
  0x89   :  { %1575 = vst [vmem:[%s2577_s10 + $0x98] sm:$0xff] %v1668_v34 }
  0x8a   :  { %511 = vmatmul.f32.gmra.mxu2 %v47_v39  ;;  %1576 = vst [vmem:[%s2577_s10 + $0xa0] sm:$0xff] %v1668_v34 }
  0x8b   :  { %624 = vmatmul.f32.gmra.mxu3 %v405_v40  ;;  %1577 = vst [vmem:[%s2577_s10 + $0xa8] sm:$0xff] %v1668_v34 }
  0x8c   :  { %185 = vmatmul.f32.gmra.mxu0 %v47_v39  ;;  %298 = vmatmul.f32.gmra.mxu1 %v79_v41  ;;  %1578 = vst [vmem:[%s2577_s10 + $0xb0] sm:$0xff] %v1668_v34 }
  0x8d   :  { %1579 = vst [vmem:[%s2577_s10 + $0xb8] sm:$0xff] %v1668_v34 }
  0x8e   :  { %1580 = vst [vmem:[%s2577_s10 + $0xc0] sm:$0xff] %v1668_v34 }
  0x8f   :  { %1581 = vst [vmem:[%s2577_s10 + $0xc8] sm:$0xff] %v1668_v34 }
  0x90   :  { %1582 = vst [vmem:[%s2577_s10 + $0xd0] sm:$0xff] %v1668_v34 }
  0x91   :  { %1583 = vst [vmem:[%s2577_s10 + $0xd8] sm:$0xff] %v1668_v34 }
  0x92   :  { %514 = vmatmul.f32.gmra.mxu2 %v48_v42  ;;  %1584 = vst [vmem:[%s2577_s10 + $0xe0] sm:$0xff] %v1668_v34 }
  0x93   :  { %627 = vmatmul.f32.gmra.mxu3 %v406_v43  ;;  %v412_v43 = vld [vmem:[%s2572_s1 + $0xa0] sm:$0xff]  ;;  %1585 = vst [vmem:[%s2577_s10 + $0xe8] sm:$0xff] %v1668_v34 }
  0x94   :  { %188 = vmatmul.f32.gmra.mxu0 %v48_v42  ;;  %301 = vmatmul.f32.gmra.mxu1 %v80_v44  ;;  %v54_v42 = vld [vmem:[%s2571_s2 + $0xa0] sm:$0xff]  ;;  %1586 = vst [vmem:[%s2577_s10 + $0xf0] sm:$0xff] %v1668_v34 }
  0x95   :  { %1587 = vst [vmem:[%s2577_s10 + $0xf8] sm:$0xff] %v1668_v34  ;;  %v415_v34 = vld [vmem:[%s2572_s1 + $0xb8] sm:$0xff] }
  0x9a   :  { %517 = vmatmul.f32.gmra.mxu2 %v49_v45 }
  0x9b   :  { %630 = vmatmul.f32.gmra.mxu3 %v407_v46 }
  0x9c   :  { %191 = vmatmul.f32.gmra.mxu0 %v49_v45  ;;  %304 = vmatmul.f32.gmra.mxu1 %v81_v47 }
  0xa1   :  { %v147_v51 = vpop.f32.mrf.mxu0  ;;  %v260_v52 = vpop.f32.mrf.mxu1 }
  0xa2   :  { %v261_v54 = vadd.f32 %v260_v52, %v147_v51  ;;  %520 = vmatmul.f32.gmra.mxu2 %v50_v49 }
  0xa3   :  { %633 = vmatmul.f32.gmra.mxu3 %v408_v50  ;;  %v86_v50 = vld [vmem:[%s2573_s0 + $0xa0] sm:$0xff] }
  0xa4   :  { %v2075_v55 = vadd.f32 %v2063_v48, %v261_v54  ;;  %194 = vmatmul.f32.gmra.mxu0 %v50_v49  ;;  %307 = vmatmul.f32.gmra.mxu1 %v82_v53 }
  0xa5   :  { %v473_v57 = vpop.f32.mrf.mxu2 }
  0xa6   :  { %718 = vst [vmem:[%s2576_s9] sm:$0xff] %v2075_v55  ;;  %v586_v58 = vpop.f32.mrf.mxu3 }
  0xa7   :  { %v587_v59 = vadd.f32 %v586_v58, %v473_v57 }
  0xa9   :  { %v2093_v62 = vadd.f32 %v2080_v56, %v587_v59  ;;  %v150_v63 = vpop.f32.mrf.mxu0  ;;  %v263_v0 = vpop.f32.mrf.mxu1 }
  0xaa   :  { %v264_v2 = vadd.f32 %v263_v0, %v150_v63  ;;  %523 = vmatmul.f32.gmra.mxu2 %v51_v60 }
  0xab   :  { %v782_v3 = vand.u32 2147483647, %v2093_v62  ;;  %636 = vmatmul.f32.gmra.mxu3 %v409_v61  ;;  %v750_v44 = vmax.f32 %v2093_v62, 0.0 }
  0xac   :  { %v2100_v4 = vadd.f32 %v2063_v48, %v264_v2  ;;  %197 = vmatmul.f32.gmra.mxu0 %v51_v60  ;;  %310 = vmatmul.f32.gmra.mxu1 %v83_v1  ;;  %v55_v1 = vld [vmem:[%s2571_s2 + $0xa8] sm:$0xff] }
  0xad   :  { %v814_v5 = vsub.f32 0.0, %v782_v3  ;;  %v476_v6 = vpop.f32.mrf.mxu2  ;;  %v413_v2 = vld [vmem:[%s2572_s1 + $0xa8] sm:$0xff] }
  0xae   :  { %719 = vst [vmem:[%s2576_s9 + $0x8] sm:$0xff] %v2100_v4  ;;  %v589_v7 = vpop.f32.mrf.mxu3 }
  0xaf   :  { %v846_v8 = vmul.f32 1.442695, %v814_v5  ;;  %v590_v9 = vadd.f32 %v589_v7, %v476_v6 }
  0xb1   :  { %1631 = vpow2.f32 %v846_v8  ;;  %v2113_v12 = vadd.f32 %v2080_v56, %v590_v9  ;;  %v153_v13 = vpop.f32.mrf.mxu0  ;;  %v266_v14 = vpop.f32.mrf.mxu1  ;;  %v87_v9 = vld [vmem:[%s2573_s0 + $0xa8] sm:$0xff] }
  0xb2   :  { %v267_v16 = vadd.f32 %v266_v14, %v153_v13  ;;  %526 = vmatmul.f32.gmra.mxu2 %v52_v10 }
  0xb3   :  { %v783_v17 = vand.u32 2147483647, %v2113_v12  ;;  %639 = vmatmul.f32.gmra.mxu3 %v410_v11  ;;  %v751_v5 = vmax.f32 %v2113_v12, 0.0 }
  0xb4   :  { %v2120_v18 = vadd.f32 %v2063_v48, %v267_v16  ;;  %200 = vmatmul.f32.gmra.mxu0 %v52_v10  ;;  %313 = vmatmul.f32.gmra.mxu1 %v84_v15 }
  0xb5   :  { %v815_v19 = vsub.f32 0.0, %v783_v17  ;;  %v479_v20 = vpop.f32.mrf.mxu2 }
  0xb6   :  { %720 = vst [vmem:[%s2576_s9 + $0x10] sm:$0xff] %v2120_v18  ;;  %v592_v21 = vpop.f32.mrf.mxu3 }
  0xb7   :  { %v1632_v22 = vpop.eup %1631  ;;  %v848_v23 = vmul.f32 1.442695, %v815_v19  ;;  %v593_v24 = vadd.f32 %v592_v21, %v479_v20 }
  0xb8   :  { %v910_v25 = vadd.f32 1.0, %v1632_v22 }
  0xb9   :  { %1633 = vpow2.f32 %v848_v23  ;;  %v2133_v28 = vadd.f32 %v2080_v56, %v593_v24  ;;  %v2135_v29 = vpop.f32.mrf.mxu0  ;;  %v2137_v30 = vpop.f32.mrf.mxu1  ;;  %v1457_v24 = vlaneseq }
  0xba   :  { %1635 = vlog2.f32 %v910_v25  ;;  %529 = vmatmul.f32.gmra.mxu2 %v53_v26  ;;  %v270_v25 = vadd.f32 %v2137_v30, %v2135_v29 }
  0xbb   :  { %v784_v32 = vand.u32 2147483647, %v2133_v28  ;;  %642 = vmatmul.f32.gmra.mxu3 %v411_v27  ;;  %v752_v21 = vmax.f32 %v2133_v28, 0.0  ;;  %v414_v28 = vld [vmem:[%s2572_s1 + $0xb0] sm:$0xff] }
  0xbc   :  { %203 = vmatmul.f32.gmra.mxu0 %v53_v26  ;;  %316 = vmatmul.f32.gmra.mxu1 %v85_v31  ;;  %v56_v31 = vld [vmem:[%s2571_s2 + $0xb0] sm:$0xff] }
  0xbd   :  { %v816_v33 = vsub.f32 0.0, %v784_v32  ;;  %v482_v35 = vpop.f32.mrf.mxu2 }
  0xbe   :  { %v595_v36 = vpop.f32.mrf.mxu3 }
  0xbf   :  { %v1634_v37 = vpop.eup %1633  ;;  %v850_v38 = vmul.f32 1.442695, %v816_v33  ;;  %v596_v39 = vadd.f32 %v595_v36, %v482_v35 }
  0xc0   :  { %v1636_v40 = vpop.eup %1635  ;;  %v911_v41 = vadd.f32 1.0, %v1634_v37  ;;  %v88_v37 = vld [vmem:[%s2573_s0 + $0xb0] sm:$0xff] }
  0xc1   :  { %v943_v45 = vmul.f32 0.6931472, %v1636_v40  ;;  %1637 = vpow2.f32 %v850_v38  ;;  %v2167_v46 = vadd.f32 %v2080_v56, %v596_v39  ;;  %v2169_v47 = vpop.f32.mrf.mxu0  ;;  %v2171_v49 = vpop.f32.mrf.mxu1  ;;  %v1230_v38 = vmul.f32 %v2075_v55, %v2075_v55 }
  0xc2   :  { %1639 = vlog2.f32 %v911_v41  ;;  %532 = vmatmul.f32.gmra.mxu2 %v54_v42  ;;  %v273_v29 = vadd.f32 %v2171_v49, %v2169_v47 }
  0xc3   :  { %v1006_v51 = vadd.f32 %v943_v45, %v750_v44  ;;  %v785_v52 = vand.u32 2147483647, %v2167_v46  ;;  %645 = vmatmul.f32.gmra.mxu3 %v412_v43  ;;  %v2288_v43 = vand.u32 127, %v1457_v24  ;;  %v2295_v44 = vadd.f32 %v2063_v48, %v270_v25 }
  0xc4   :  { %206 = vmatmul.f32.gmra.mxu0 %v54_v42  ;;  %319 = vmatmul.f32.gmra.mxu1 %v86_v50  ;;  %v2303_v49 = vadd.f32 %v2063_v48, %v273_v29  ;;  %v90_v29 = vld [vmem:[%s2573_s0 + $0xc0] sm:$0xff] }
  0xc5   :  { %v1038_v53 = vmul.f32 0.9, %v1006_v51  ;;  %v817_v54 = vsub.f32 0.0, %v785_v52  ;;  %v485_v57 = vpop.f32.mrf.mxu2  ;;  %vm1491_vm0 = vcmp.lt.s32.totalorder %v2288_v43, 32  ;;  %721 = vst [vmem:[%s2576_s9 + $0x18] sm:$0xff] %v2295_v44 }
  0xc6   :  { %v598_v58 = vpop.f32.mrf.mxu3  ;;  %722 = vst [vmem:[%s2576_s9 + $0x20] sm:$0xff] %v2303_v49 }
  0xc7   :  { %v1638_v59 = vpop.eup %1637  ;;  %v2197_v60 = vadd.f32 0.1, %v1038_v53  ;;  %v852_v61 = vmul.f32 1.442695, %v817_v54  ;;  %v599_v62 = vadd.f32 %v598_v58, %v485_v57 }
  0xc8   :  { %v1640_v63 = vpop.eup %1639  ;;  %v912_v0 = vadd.f32 1.0, %v1638_v59 }
  0xc9   :  { %v1134_v3 = vmul.f32 2.0, %v2197_v60  ;;  %v945_v6 = vmul.f32 0.6931472, %v1640_v63  ;;  %1641 = vpow2.f32 %v852_v61  ;;  %v162_v7 = vpop.f32.mrf.mxu0  ;;  %v275_v8 = vpop.f32.mrf.mxu1  ;;  %v2227_v10 = vadd.f32 %v2080_v56, %v599_v62  ;;  %v57_v63 = vld [vmem:[%s2571_s2 + $0xb8] sm:$0xff] }
  0xca   :  { %1643 = vlog2.f32 %v912_v0  ;;  %535 = vmatmul.f32.gmra.mxu2 %v55_v1  ;;  %v276_v39 = vadd.f32 %v275_v8, %v162_v7  ;;  %v1102_v50 = vsub.f32 1.2819356, %v2197_v60  ;;  %v89_v8 = vld [vmem:[%s2573_s0 + $0xb8] sm:$0xff] }
  0xcb   :  { %v1166_v11 = vmul.f32 1.442695, %v1134_v3  ;;  %v1007_v12 = vadd.f32 %v945_v6, %v751_v5  ;;  %648 = vmatmul.f32.gmra.mxu3 %v413_v2  ;;  %v786_v13 = vand.u32 2147483647, %v2227_v10  ;;  %v753_v3 = vmax.f32 %v2167_v46, 0.0 }
  0xcc   :  { %209 = vmatmul.f32.gmra.mxu0 %v55_v1  ;;  %322 = vmatmul.f32.gmra.mxu1 %v87_v9  ;;  %v2311_v52 = vadd.f32 %v2063_v48, %v276_v39  ;;  %v1231_v1 = vmul.f32 %v2100_v4, %v2100_v4 }
  0xcd   :  { %1645 = vpow2.f32 %v1166_v11  ;;  %v1039_v14 = vmul.f32 0.9, %v1007_v12  ;;  %v818_v15 = vsub.f32 0.0, %v786_v13  ;;  %v488_v16 = vpop.f32.mrf.mxu2 }
  0xce   :  { %v601_v17 = vpop.f32.mrf.mxu3  ;;  %723 = vst [vmem:[%s2576_s9 + $0x28] sm:$0xff] %v2311_v52 }
  0xcf   :  { %v1642_v19 = vpop.eup %1641  ;;  %v2250_v20 = vadd.f32 0.1, %v1039_v14  ;;  %v602_v22 = vadd.f32 %v601_v17, %v488_v16  ;;  %v854_v27 = vmul.f32 1.442695, %v818_v15 }
  0xd0   :  { %v1644_v23 = vpop.eup %1643  ;;  %v913_v26 = vadd.f32 1.0, %v1642_v19 }
  0xd1   :  { %v1135_v32 = vmul.f32 2.0, %v2250_v20  ;;  %v947_v33 = vmul.f32 0.6931472, %v1644_v23  ;;  %v2273_v30 = vadd.f32 %v2080_v56, %v602_v22  ;;  %v165_v35 = vpop.f32.mrf.mxu0  ;;  %v278_v36 = vpop.f32.mrf.mxu1  ;;  %v1103_v19 = vsub.f32 1.2819356, %v2250_v20 }
  0xd2   :  { %1647 = vlog2.f32 %v913_v26  ;;  %v279_v42 = vadd.f32 %v278_v36, %v165_v35  ;;  %538 = vmatmul.f32.gmra.mxu2 %v56_v31 }
  0xd3   :  { %v1646_v40 = vpop.eup %1645  ;;  %v1168_v56 = vmul.f32 1.442695, %v1135_v32  ;;  %v1008_v41 = vadd.f32 %v947_v33, %v752_v21  ;;  %1649 = vpow2.f32 %v854_v27  ;;  %651 = vmatmul.f32.gmra.mxu3 %v414_v28  ;;  %v787_v45 = vand.u32 2147483647, %v2273_v30  ;;  %v58_v27 = vld [vmem:[%s2571_s2 + $0xc0] sm:$0xff] }
  0xd4   :  { %v1262_v55 = vadd.f32 %v1646_v40, %v1230_v38  ;;  %212 = vmatmul.f32.gmra.mxu0 %v56_v31  ;;  %325 = vmatmul.f32.gmra.mxu1 %v88_v37  ;;  %v366_v59 = vadd.f32 %v2063_v48, %v279_v42  ;;  %v416_v31 = vld [vmem:[%s2572_s1 + $0xc0] sm:$0xff]  ;;  %v1232_v37 = vmul.f32 %v2120_v18, %v2120_v18 }
  0xd5   :  { %1651 = vpow2.f32 %v1168_v56  ;;  %v1040_v47 = vmul.f32 0.9, %v1008_v41  ;;  %v819_v53 = vsub.f32 0.0, %v787_v45  ;;  %v491_v54 = vpop.f32.mrf.mxu2  ;;  %v754_v56 = vmax.f32 %v2227_v10, 0.0 }
  0xd6   :  { %v1294_v51 = vmul.f32 0.038503036, %v1262_v55  ;;  %v604_v57 = vpop.f32.mrf.mxu3  ;;  %724 = vst [vmem:[%s2576_s9 + $0x30] sm:$0xff] %v366_v59  ;;  %v417_v59 = vld [vmem:[%s2572_s1 + $0xc8] sm:$0xff] }
  0xd7   :  { %v2317_v58 = vadd.f32 0.1, %v1040_v47  ;;  %v856_v62 = vmul.f32 1.442695, %v819_v53  ;;  %v59_v57 = vld [vmem:[%s2571_s2 + $0xc8] sm:$0xff] }
  0xd8   :  { %v1648_v60 = vpop.eup %1647  ;;  %v1326_v61 = vadd.f32 %v1294_v51, %v1102_v50 }
  0xd9   :  { %v1650_v0 = vpop.eup %1649  ;;  %v1136_v2 = vmul.f32 2.0, %v2317_v58  ;;  %v949_v5 = vmul.f32 0.6931472, %v1648_v60  ;;  %v168_v6 = vpop.f32.mrf.mxu0  ;;  %1653 = vpow2.f32 %v856_v62  ;;  %v1104_v10 = vsub.f32 1.2819356, %v2317_v58 }
  0xda   :  { %v281_v7 = vpop.f32.mrf.mxu1  ;;  %v1596_v9 = vadd.f32 -0.5, %v1326_v61  ;;  %v914_v11 = vadd.f32 1.0, %v1650_v0  ;;  %541 = vmatmul.f32.gmra.mxu2 %v57_v63  ;;  %v1233_v58 = vmul.f32 %v2295_v44, %v2295_v44 }
  0xdb   :  { %v282_v4 = vadd.f32 %v281_v7, %v168_v6  ;;  %v1652_v46 = vpop.eup %1651  ;;  %v1170_v12 = vmul.f32 1.442695, %v1136_v2  ;;  %v1009_v13 = vadd.f32 %v949_v5, %v753_v3  ;;  %654 = vmatmul.f32.gmra.mxu3 %v415_v34  ;;  %v91_v34 = vld [vmem:[%s2573_s0 + $0xc8] sm:$0xff] }
  0xdc   :  { %v1524_v14 = vsel %vm1491_vm0, %v1596_v9, 0.0  ;;  %v1263_v15 = vadd.f32 %v1652_v46, %v1231_v1  ;;  %1655 = vlog2.f32 %v914_v11  ;;  %215 = vmatmul.f32.gmra.mxu0 %v57_v63  ;;  %328 = vmatmul.f32.gmra.mxu1 %v89_v8  ;;  %v755_v1 = vmax.f32 %v2273_v30, 0.0 }
  0xdd   :  { %v367_v16 = vadd.f32 %v2063_v48, %v282_v4  ;;  %1556 = vst [vmem:[%s2577_s10] sm:$0xff] %v1524_v14  ;;  %1657 = vpow2.f32 %v1170_v12  ;;  %v1041_v17 = vmul.f32 0.9, %v1009_v13  ;;  %v494_v22 = vpop.f32.mrf.mxu2 }
  0xde   :  { %v1295_v21 = vmul.f32 0.038503036, %v1263_v15  ;;  %v607_v23 = vpop.f32.mrf.mxu3  ;;  %v92_v22 = vld [vmem:[%s2573_s0 + $0xd0] sm:$0xff] }
  0xdf   :  { %725 = vst [vmem:[%s2576_s9 + $0x38] sm:$0xff] %v367_v16  ;;  %v2359_v24 = vadd.f32 0.1, %v1041_v17  ;;  %v1654_v25 = vpop.eup %1653  ;;  %v60_v16 = vld [vmem:[%s2571_s2 + $0xd0] sm:$0xff] }
  0xe0   :  { %v1327_v26 = vadd.f32 %v1295_v21, %v1103_v19  ;;  %v915_v28 = vadd.f32 1.0, %v1654_v25  ;;  %v418_v17 = vld [vmem:[%s2572_s1 + $0xd0] sm:$0xff] }
  0xe1   :  { %v1137_v20 = vmul.f32 2.0, %v2359_v24  ;;  %v171_v32 = vpop.f32.mrf.mxu0  ;;  %v1105_v30 = vsub.f32 1.2819356, %v2359_v24 }
  0xe2   :  { %v284_v33 = vpop.f32.mrf.mxu1  ;;  %v1656_v35 = vpop.eup %1655  ;;  %v1597_v36 = vadd.f32 -0.5, %v1327_v26  ;;  %1659 = vlog2.f32 %v915_v28  ;;  %544 = vmatmul.f32.gmra.mxu2 %v58_v27 }
  0xe3   :  { %v285_v38 = vadd.f32 %v284_v33, %v171_v32  ;;  %v1658_v39 = vpop.eup %1657  ;;  %v1172_v40 = vmul.f32 1.442695, %v1137_v20  ;;  %v951_v41 = vmul.f32 0.6931472, %v1656_v35  ;;  %657 = vmatmul.f32.gmra.mxu3 %v416_v31 }
  0xe4   :  { %v1525_v42 = vsel %vm1491_vm0, %v1597_v36, 0.0  ;;  %v1264_v55 = vadd.f32 %v1658_v39, %v1232_v37  ;;  %218 = vmatmul.f32.gmra.mxu0 %v58_v27  ;;  %331 = vmatmul.f32.gmra.mxu1 %v90_v29  ;;  %v1234_v27 = vmul.f32 %v2303_v49, %v2303_v49  ;;  %v61_v36 = vld [vmem:[%s2571_s2 + $0xd8] sm:$0xff] }
  0xe5   :  { %v368_v45 = vadd.f32 %v2063_v48, %v285_v38  ;;  %1557 = vst [vmem:[%s2577_s10 + $0x8] sm:$0xff] %v1525_v42  ;;  %1661 = vpow2.f32 %v1172_v40  ;;  %v1010_v18 = vadd.f32 %v951_v41, %v754_v56  ;;  %v497_v50 = vpop.f32.mrf.mxu2  ;;  %v419_v37 = vld [vmem:[%s2572_s1 + $0xd8] sm:$0xff]  ;;  %v1235_v42 = vmul.f32 %v2311_v52, %v2311_v52 }
  0xe6   :  { %v1296_v47 = vmul.f32 0.038503036, %v1264_v55  ;;  %v610_v51 = vpop.f32.mrf.mxu3  ;;  %v93_v40 = vld [vmem:[%s2573_s0 + $0xd8] sm:$0xff] }
  0xe7   :  { %726 = vst [vmem:[%s2576_s9 + $0x40] sm:$0xff] %v368_v45  ;;  %v1042_v53 = vmul.f32 0.9, %v1010_v18 }
  0xe8   :  { %v1328_v54 = vadd.f32 %v1296_v47, %v1104_v10  ;;  %v1660_v60 = vpop.eup %1659 }
  0xe9   :  { %v1074_v61 = vadd.f32 0.1, %v1042_v53  ;;  %v174_v62 = vpop.f32.mrf.mxu0  ;;  %v953_v2 = vmul.f32 0.6931472, %v1660_v60 }
  0xea   :  { %v287_v63 = vpop.f32.mrf.mxu1  ;;  %v1598_v0 = vadd.f32 -0.5, %v1328_v54  ;;  %547 = vmatmul.f32.gmra.mxu2 %v59_v57  ;;  %v62_v54 = vld [vmem:[%s2571_s2 + $0xe0] sm:$0xff] }
  0xeb   :  { %v288_v3 = vadd.f32 %v287_v63, %v174_v62  ;;  %v1662_v5 = vpop.eup %1661  ;;  %v1138_v6 = vmul.f32 2.0, %v1074_v61  ;;  %660 = vmatmul.f32.gmra.mxu3 %v417_v59  ;;  %v1011_v8 = vadd.f32 %v953_v2, %v755_v1  ;;  %v1106_v35 = vsub.f32 1.2819356, %v1074_v61  ;;  %v94_v61 = vld [vmem:[%s2573_s0 + $0xe0] sm:$0xff] }
  0xec   :  { %v1526_v7 = vsel %vm1491_vm0, %v1598_v0, 0.0  ;;  %v1265_v44 = vadd.f32 %v1662_v5, %v1233_v58  ;;  %221 = vmatmul.f32.gmra.mxu0 %v59_v57  ;;  %334 = vmatmul.f32.gmra.mxu1 %v91_v34  ;;  %v420_v57 = vld [vmem:[%s2572_s1 + $0xe0] sm:$0xff]  ;;  %v421_v5 = vld [vmem:[%s2572_s1 + $0xe8] sm:$0xff] }
  0xed   :  { %v369_v9 = vadd.f32 %v2063_v48, %v288_v3  ;;  %1558 = vst [vmem:[%s2577_s10 + $0x10] sm:$0xff] %v1526_v7  ;;  %v1174_v11 = vmul.f32 1.442695, %v1138_v6  ;;  %v1043_v46 = vmul.f32 0.9, %v1011_v8  ;;  %v500_v12 = vpop.f32.mrf.mxu2  ;;  %v63_v3 = vld [vmem:[%s2571_s2 + $0xe8] sm:$0xff] }
  0xee   :  { %v1297_v4 = vmul.f32 0.038503036, %v1265_v44  ;;  %v613_v13 = vpop.f32.mrf.mxu3  ;;  %v95_v7 = vld [vmem:[%s2573_s0 + $0xe8] sm:$0xff] }
  0xef   :  { %727 = vst [vmem:[%s2576_s9 + $0x48] sm:$0xff] %v369_v9  ;;  %1663 = vpow2.f32 %v1174_v11  ;;  %v1075_v15 = vadd.f32 0.1, %v1043_v46  ;;  %v64_v11 = vld [vmem:[%s2571_s2 + $0xf0] sm:$0xff] }
  0xf0   :  { %v1329_v14 = vadd.f32 %v1297_v4, %v1105_v30  ;;  %v422_v4 = vld [vmem:[%s2572_s1 + $0xf0] sm:$0xff] }
  0xf1   :  { %v177_v19 = vpop.f32.mrf.mxu0  ;;  %v1139_v24 = vmul.f32 2.0, %v1075_v15  ;;  %v1107_v52 = vsub.f32 1.2819356, %v1075_v15  ;;  %v96_v13 = vld [vmem:[%s2573_s0 + $0xf0] sm:$0xff] }
  0xf2   :  { %v290_v21 = vpop.f32.mrf.mxu1  ;;  %v1599_v23 = vadd.f32 -0.5, %v1329_v14  ;;  %550 = vmatmul.f32.gmra.mxu2 %v60_v16 }
  0xf3   :  { %v291_v25 = vadd.f32 %v290_v21, %v177_v19  ;;  %663 = vmatmul.f32.gmra.mxu3 %v418_v17  ;;  %v1176_v31 = vmul.f32 1.442695, %v1139_v24  ;;  %v65_v19 = vld [vmem:[%s2571_s2 + $0xf8] sm:$0xff] }
  0xf4   :  { %v1527_v26 = vsel %vm1491_vm0, %v1599_v23, 0.0  ;;  %224 = vmatmul.f32.gmra.mxu0 %v60_v16  ;;  %337 = vmatmul.f32.gmra.mxu1 %v92_v22  ;;  %v423_v21 = vld [vmem:[%s2572_s1 + $0xf8] sm:$0xff] }
  0xf5   :  { %v370_v20 = vadd.f32 %v2063_v48, %v291_v25  ;;  %v1664_v28 = vpop.eup %1663  ;;  %1559 = vst [vmem:[%s2577_s10 + $0x18] sm:$0xff] %v1527_v26  ;;  %1665 = vpow2.f32 %v1176_v31  ;;  %v503_v33 = vpop.f32.mrf.mxu2  ;;  %v97_v24 = vld [vmem:[%s2573_s0 + $0xf8] sm:$0xff] }
  0xf6   :  { %v1266_v32 = vadd.f32 %v1664_v28, %v1234_v27  ;;  %v616_v29 = vpop.f32.mrf.mxu3 }
  0xf7   :  { %728 = vst [vmem:[%s2576_s9 + $0x50] sm:$0xff] %v370_v20 }
  0xf8   :  { %v1298_v49 = vmul.f32 0.038503036, %v1266_v32 }
  0xf9   :  { %v180_v38 = vpop.f32.mrf.mxu0 }
  0xfa   :  { %v293_v39 = vpop.f32.mrf.mxu1  ;;  %v1330_v56 = vadd.f32 %v1298_v49, %v1106_v35  ;;  %553 = vmatmul.f32.gmra.mxu2 %v61_v36 }
  0xfb   :  { %v294_v41 = vadd.f32 %v293_v39, %v180_v38  ;;  %666 = vmatmul.f32.gmra.mxu3 %v419_v37  ;;  %v1666_v55 = vpop.eup %1665 }
  0xfc   :  { %v1600_v45 = vadd.f32 -0.5, %v1330_v56  ;;  %227 = vmatmul.f32.gmra.mxu0 %v61_v36  ;;  %340 = vmatmul.f32.gmra.mxu1 %v93_v40  ;;  %v1267_v10 = vadd.f32 %v1666_v55, %v1235_v42 }
  0xfd   :  { %v371_v18 = vadd.f32 %v2063_v48, %v294_v41  ;;  %v506_v50 = vpop.f32.mrf.mxu2 }
  0xfe   :  { %v1528_v47 = vsel %vm1491_vm0, %v1600_v45, 0.0  ;;  %v619_v51 = vpop.f32.mrf.mxu3  ;;  %v1299_v53 = vmul.f32 0.038503036, %v1267_v10 }
  0xff   :  { %729 = vst [vmem:[%s2576_s9 + $0x58] sm:$0xff] %v371_v18 }
 0x100   :  { %1560 = vst [vmem:[%s2577_s10 + $0x20] sm:$0xff] %v1528_v47  ;;  %v1331_v59 = vadd.f32 %v1299_v53, %v1107_v52 }
 0x101   :  { %v183_v60 = vpop.f32.mrf.mxu0 }
 0x102   :  { %v296_v58 = vpop.f32.mrf.mxu1  ;;  %v1601_v63 = vadd.f32 -0.5, %v1331_v59  ;;  %556 = vmatmul.f32.gmra.mxu2 %v62_v54 }
 0x103   :  { %v297_v62 = vadd.f32 %v296_v58, %v183_v60  ;;  %669 = vmatmul.f32.gmra.mxu3 %v420_v57 }
 0x104   :  { %230 = vmatmul.f32.gmra.mxu0 %v62_v54  ;;  %343 = vmatmul.f32.gmra.mxu1 %v94_v61  ;;  %v1529_v0 = vsel %vm1491_vm0, %v1601_v63, 0.0 }
 0x105   :  { %v372_v34 = vadd.f32 %v2063_v48, %v297_v62  ;;  %1561 = vst [vmem:[%s2577_s10 + $0x28] sm:$0xff] %v1529_v0  ;;  %v509_v1 = vpop.f32.mrf.mxu2 }
 0x106   :  { %v622_v2 = vpop.f32.mrf.mxu3 }
 0x107   :  { %730 = vst [vmem:[%s2576_s9 + $0x60] sm:$0xff] %v372_v34 }
 0x109   :  { %v186_v43 = vpop.f32.mrf.mxu0 }
 0x10a   :  { %v299_v6 = vpop.f32.mrf.mxu1  ;;  %559 = vmatmul.f32.gmra.mxu2 %v63_v3 }
 0x10b   :  { %v300_v44 = vadd.f32 %v299_v6, %v186_v43  ;;  %672 = vmatmul.f32.gmra.mxu3 %v421_v5 }
 0x10c   :  { %233 = vmatmul.f32.gmra.mxu0 %v63_v3  ;;  %346 = vmatmul.f32.gmra.mxu1 %v95_v7 }
 0x10d   :  { %v373_v8 = vadd.f32 %v2063_v48, %v300_v44  ;;  %v512_v9 = vpop.f32.mrf.mxu2 }
 0x10e   :  { %v625_v30 = vpop.f32.mrf.mxu3 }
 0x10f   :  { %731 = vst [vmem:[%s2576_s9 + $0x68] sm:$0xff] %v373_v8 }
 0x111   :  { %v189_v46 = vpop.f32.mrf.mxu0 }
 0x112   :  { %v302_v12 = vpop.f32.mrf.mxu1  ;;  %562 = vmatmul.f32.gmra.mxu2 %v64_v11 }
 0x113   :  { %v303_v14 = vadd.f32 %v302_v12, %v189_v46  ;;  %675 = vmatmul.f32.gmra.mxu3 %v422_v4 }
 0x114   :  { %236 = vmatmul.f32.gmra.mxu0 %v64_v11  ;;  %349 = vmatmul.f32.gmra.mxu1 %v96_v13 }
 0x115   :  { %v374_v15 = vadd.f32 %v2063_v48, %v303_v14  ;;  %v515_v16 = vpop.f32.mrf.mxu2 }
 0x116   :  { %v628_v17 = vpop.f32.mrf.mxu3 }
 0x117   :  { %732 = vst [vmem:[%s2576_s9 + $0x70] sm:$0xff] %v374_v15 }
 0x119   :  { %v192_v22 = vpop.f32.mrf.mxu0 }
 0x11a   :  { %v305_v23 = vpop.f32.mrf.mxu1  ;;  %565 = vmatmul.f32.gmra.mxu2 %v65_v19 }
 0x11b   :  { %v306_v25 = vadd.f32 %v305_v23, %v192_v22  ;;  %678 = vmatmul.f32.gmra.mxu3 %v423_v21 }
 0x11c   :  { %239 = vmatmul.f32.gmra.mxu0 %v65_v19  ;;  %352 = vmatmul.f32.gmra.mxu1 %v97_v24 }
 0x11d   :  { %v375_v26 = vadd.f32 %v2063_v48, %v306_v25  ;;  %v518_v27 = vpop.f32.mrf.mxu2 }
 0x11e   :  { %v631_v31 = vpop.f32.mrf.mxu3 }
 0x11f   :  { %733 = vst [vmem:[%s2576_s9 + $0x78] sm:$0xff] %v375_v26 }
 0x121   :  { %v195_v20 = vpop.f32.mrf.mxu0 }
 0x122   :  { %v308_v28 = vpop.f32.mrf.mxu1 }
 0x123   :  { %v309_v32 = vadd.f32 %v308_v28, %v195_v20 }
 0x125   :  { %v376_v33 = vadd.f32 %v2063_v48, %v309_v32  ;;  %v521_v29 = vpop.f32.mrf.mxu2 }
 0x126   :  { %v634_v35 = vpop.f32.mrf.mxu3 }
 0x127   :  { %734 = vst [vmem:[%s2576_s9 + $0x80] sm:$0xff] %v376_v33 }
 0x129   :  { %v198_v49 = vpop.f32.mrf.mxu0 }
 0x12a   :  { %v311_v36 = vpop.f32.mrf.mxu1 }
 0x12b   :  { %v312_v37 = vadd.f32 %v311_v36, %v198_v49 }
 0x12d   :  { %v377_v38 = vadd.f32 %v2063_v48, %v312_v37  ;;  %v524_v39 = vpop.f32.mrf.mxu2 }
 0x12e   :  { %v637_v40 = vpop.f32.mrf.mxu3 }
 0x12f   :  { %735 = vst [vmem:[%s2576_s9 + $0x88] sm:$0xff] %v377_v38 }
 0x131   :  { %v201_v56 = vpop.f32.mrf.mxu0 }
 0x132   :  { %v314_v41 = vpop.f32.mrf.mxu1 }
 0x133   :  { %v315_v42 = vadd.f32 %v314_v41, %v201_v56 }
 0x135   :  { %v378_v55 = vadd.f32 %v2063_v48, %v315_v42  ;;  %v527_v45 = vpop.f32.mrf.mxu2 }
 0x136   :  { %v640_v18 = vpop.f32.mrf.mxu3 }
 0x137   :  { %736 = vst [vmem:[%s2576_s9 + $0x90] sm:$0xff] %v378_v55 }
 0x139   :  { %v204_v10 = vpop.f32.mrf.mxu0 }
 0x13a   :  { %v317_v47 = vpop.f32.mrf.mxu1 }
 0x13b   :  { %v318_v50 = vadd.f32 %v317_v47, %v204_v10  ;;  %v1667_v10 = vld [vmem:[%s2574_s5] ss:$0 sm:$0xff] }
 0x13d   :  { %v379_v51 = vadd.f32 %v2063_v48, %v318_v50  ;;  %v530_v52 = vpop.f32.mrf.mxu2 }
 0x13e   :  { %v643_v53 = vpop.f32.mrf.mxu3 }
 0x13f   :  { %737 = vst [vmem:[%s2576_s9 + $0x98] sm:$0xff] %v379_v51 }
 0x141   :  { %v207_v54 = vpop.f32.mrf.mxu0 }
 0x142   :  { %v320_v57 = vpop.f32.mrf.mxu1 }
 0x143   :  { %v321_v59 = vadd.f32 %v320_v57, %v207_v54 }
 0x145   :  { %v380_v60 = vadd.f32 %v2063_v48, %v321_v59  ;;  %v533_v58 = vpop.f32.mrf.mxu2 }
 0x146   :  { %v646_v61 = vpop.f32.mrf.mxu3 }
 0x147   :  { %738 = vst [vmem:[%s2576_s9 + $0xa0] sm:$0xff] %v380_v60 }
 0x149   :  { %v210_v62 = vpop.f32.mrf.mxu0 }
 0x14a   :  { %v323_v63 = vpop.f32.mrf.mxu1 }
 0x14b   :  { %v324_v34 = vadd.f32 %v323_v63, %v210_v62 }
 0x14d   :  { %v381_v0 = vadd.f32 %v2063_v48, %v324_v34  ;;  %v536_v1 = vpop.f32.mrf.mxu2 }
 0x14e   :  { %v649_v2 = vpop.f32.mrf.mxu3 }
 0x14f   :  { %739 = vst [vmem:[%s2576_s9 + $0xa8] sm:$0xff] %v381_v0 }
 0x151   :  { %v213_v3 = vpop.f32.mrf.mxu0 }
 0x152   :  { %v326_v5 = vpop.f32.mrf.mxu1 }
 0x153   :  { %v327_v43 = vadd.f32 %v326_v5, %v213_v3 }
 0x155   :  { %v382_v6 = vadd.f32 %v2063_v48, %v327_v43  ;;  %v539_v7 = vpop.f32.mrf.mxu2 }
 0x156   :  { %v652_v44 = vpop.f32.mrf.mxu3 }
 0x157   :  { %740 = vst [vmem:[%s2576_s9 + $0xb0] sm:$0xff] %v382_v6 }
 0x159   :  { %v216_v8 = vpop.f32.mrf.mxu0 }
 0x15a   :  { %v329_v9 = vpop.f32.mrf.mxu1 }
 0x15b   :  { %v330_v30 = vadd.f32 %v329_v9, %v216_v8 }
 0x15d   :  { %v383_v11 = vadd.f32 %v2063_v48, %v330_v30  ;;  %v542_v4 = vpop.f32.mrf.mxu2 }
 0x15e   :  { %v655_v46 = vpop.f32.mrf.mxu3 }
 0x15f   :  { %741 = vst [vmem:[%s2576_s9 + $0xb8] sm:$0xff] %v383_v11 }
 0x161   :  { %v219_v12 = vpop.f32.mrf.mxu0 }
 0x162   :  { %v332_v13 = vpop.f32.mrf.mxu1 }
 0x163   :  { %v333_v14 = vadd.f32 %v332_v13, %v219_v12 }
 0x165   :  { %v384_v15 = vadd.f32 %v2063_v48, %v333_v14  ;;  %v545_v16 = vpop.f32.mrf.mxu2 }
 0x166   :  { %v658_v17 = vpop.f32.mrf.mxu3 }
 0x167   :  { %742 = vst [vmem:[%s2576_s9 + $0xc0] sm:$0xff] %v384_v15 }
 0x169   :  { %v222_v19 = vpop.f32.mrf.mxu0 }
 0x16a   :  { %v335_v21 = vpop.f32.mrf.mxu1 }
 0x16b   :  { %v336_v22 = vadd.f32 %v335_v21, %v222_v19 }
 0x16d   :  { %v385_v23 = vadd.f32 %v2063_v48, %v336_v22  ;;  %v548_v24 = vpop.f32.mrf.mxu2 }
 0x16e   :  { %v661_v25 = vpop.f32.mrf.mxu3 }
 0x16f   :  { %743 = vst [vmem:[%s2576_s9 + $0xc8] sm:$0xff] %v385_v23 }
 0x171   :  { %v225_v26 = vpop.f32.mrf.mxu0 }
 0x172   :  { %v338_v27 = vpop.f32.mrf.mxu1 }
 0x173   :  { %v339_v31 = vadd.f32 %v338_v27, %v225_v26 }
 0x175   :  { %v386_v20 = vadd.f32 %v2063_v48, %v339_v31  ;;  %v551_v28 = vpop.f32.mrf.mxu2 }
 0x176   :  { %v664_v32 = vpop.f32.mrf.mxu3 }
 0x177   :  { %744 = vst [vmem:[%s2576_s9 + $0xd0] sm:$0xff] %v386_v20 }
 0x179   :  { %v228_v33 = vpop.f32.mrf.mxu0 }
 0x17a   :  { %v341_v29 = vpop.f32.mrf.mxu1 }
 0x17b   :  { %v342_v35 = vadd.f32 %v341_v29, %v228_v33 }
 0x17d   :  { %v387_v49 = vadd.f32 %v2063_v48, %v342_v35  ;;  %v554_v36 = vpop.f32.mrf.mxu2 }
 0x17e   :  { %v667_v37 = vpop.f32.mrf.mxu3 }
 0x17f   :  { %745 = vst [vmem:[%s2576_s9 + $0xd8] sm:$0xff] %v387_v49 }
 0x181   :  { %v231_v38 = vpop.f32.mrf.mxu0 }
 0x182   :  { %v344_v39 = vpop.f32.mrf.mxu1 }
 0x183   :  { %v345_v40 = vadd.f32 %v344_v39, %v231_v38 }
 0x185   :  { %v388_v56 = vadd.f32 %v2063_v48, %v345_v40  ;;  %v557_v41 = vpop.f32.mrf.mxu2 }
 0x186   :  { %v670_v42 = vpop.f32.mrf.mxu3 }
 0x187   :  { %746 = vst [vmem:[%s2576_s9 + $0xe0] sm:$0xff] %v388_v56 }
 0x189   :  { %v234_v55 = vpop.f32.mrf.mxu0 }
 0x18a   :  { %v347_v45 = vpop.f32.mrf.mxu1 }
 0x18b   :  { %v348_v18 = vadd.f32 %v347_v45, %v234_v55 }
 0x18d   :  { %v389_v47 = vadd.f32 %v1667_v10, %v348_v18  ;;  %v560_v50 = vpop.f32.mrf.mxu2 }
 0x18e   :  { %v673_v48 = vpop.f32.mrf.mxu3 }
 0x18f   :  { %747 = vst [vmem:[%s2576_s9 + $0xe8] sm:$0xff] %v389_v47 }
 0x191   :  { %v237_v51 = vpop.f32.mrf.mxu0 }
 0x192   :  { %v350_v52 = vpop.f32.mrf.mxu1 }
 0x193   :  { %v351_v53 = vadd.f32 %v350_v52, %v237_v51 }
 0x195   :  { %v390_v54 = vadd.f32 %v1667_v10, %v351_v53  ;;  %v563_v57 = vpop.f32.mrf.mxu2 }
 0x196   :  { %v676_v59 = vpop.f32.mrf.mxu3 }
 0x197   :  { %748 = vst [vmem:[%s2576_s9 + $0xf0] sm:$0xff] %v390_v54 }
 0x199   :  { %v240_v60 = vpop.f32.mrf.mxu0 }
 0x19a   :  { %v353_v58 = vpop.f32.mrf.mxu1 }
 0x19b   :  { %v354_v61 = vadd.f32 %v353_v58, %v240_v60 }
 0x19d   :  { %v391_v62 = vadd.f32 %v1667_v10, %v354_v61  ;;  %v566_v63 = vpop.f32.mrf.mxu2 }
 0x19e   :  { %v679_v34 = vpop.f32.mrf.mxu3 }
 0x19f   :  { %749 = vst [vmem:[%s2576_s9 + $0xf8] sm:$0xff] %v391_v62 }

// kernel: last_layer_single_forward.18
= control target key start
LH: loop header
LB: loop body
LE: loop exit
PB: predicated region body
PF: predicated region fallthrough
CT: control target
= control target key end

     0   :  { %s2612_s7 = inlined_call_operand.vmem [shape: f32[128,128], index: 7, kind: input, shape index: {}]   ;;  %s2613_s6 = inlined_call_operand.vmem [shape: f32[128,128], index: 6, kind: input, shape index: {}]   ;;  %s2614_s4 = inlined_call_operand.vmem [shape: f32[128,128], index: 4, kind: input, shape index: {}]   ;;  %s2615_s3 = inlined_call_operand.vmem [shape: f32[128,128], index: 3, kind: input, shape index: {}]   ;;  %s2616_s2 = inlined_call_operand.vmem [shape: f32[256,128], index: 2, kind: input, shape index: {}]   ;;  %s2617_s1 = inlined_call_operand.vmem [shape: f32[256,128], index: 1, kind: input, shape index: {}]   ;;  %s2618_s0 = inlined_call_operand.vmem [shape: f32[256,128], index: 0, kind: input, shape index: {}]   ;;  %s2619_s5 = inlined_call_operand.vmem [shape: f32[1,128], index: 5, kind: input, shape index: {}]   ;;  %s2620_s8 = inlined_call_operand.vmem [shape: f32[1,128], index: 8, kind: input, shape index: {}]   ;;  %s2621_s9 = inlined_call_operand.vmem [shape: f32[256,128], index: 9, kind: output, shape index: {0}]   ;;  %s2622_s10 = inlined_call_operand.vmem [shape: f32[256,128], index: 10, kind: output, shape index: {1}]  }
   0x1   :  { %v455_v0 = vld [vmem:[%s2612_s7 + $0x78] sm:$0xff]  ;;  %v454_v4 = vld [vmem:[%s2612_s7 + $0x70] sm:$0xff]  ;;  %v453_v8 = vld [vmem:[%s2612_s7 + $0x68] sm:$0xff] }
   0x2   :  { %v439_v1 = vld [vmem:[%s2613_s6 + $0x78] sm:$0xff]  ;;  %456 = vmatpush.msra.mxu2 %v455_v0  ;;  %v438_v5 = vld [vmem:[%s2613_s6 + $0x70] sm:$0xff]  ;;  %v437_v9 = vld [vmem:[%s2613_s6 + $0x68] sm:$0xff] }
   0x3   :  { %v129_v2 = vld [vmem:[%s2614_s4 + $0x78] sm:$0xff]  ;;  %569 = vmatpush.msra.mxu3 %v439_v1  ;;  %v128_v6 = vld [vmem:[%s2614_s4 + $0x70] sm:$0xff]  ;;  %v127_v10 = vld [vmem:[%s2614_s4 + $0x68] sm:$0xff] }
   0x4   :  { %v113_v3 = vld [vmem:[%s2615_s3 + $0x78] sm:$0xff]  ;;  %130 = vmatpush.msra.mxu0 %v129_v2  ;;  %v112_v7 = vld [vmem:[%s2615_s3 + $0x70] sm:$0xff]  ;;  %457 = vmatpush.msra.mxu2 %v454_v4  ;;  %v111_v11 = vld [vmem:[%s2615_s3 + $0x68] sm:$0xff] }
   0x5   :  { %243 = vmatpush.msra.mxu1 %v113_v3  ;;  %570 = vmatpush.msra.mxu3 %v438_v5  ;;  %v452_v12 = vld [vmem:[%s2612_s7 + $0x60] sm:$0xff]  ;;  %v451_v16 = vld [vmem:[%s2612_s7 + $0x58] sm:$0xff]  ;;  %v450_v20 = vld [vmem:[%s2612_s7 + $0x50] sm:$0xff] }
   0x6   :  { %131 = vmatpush.msra.mxu0 %v128_v6  ;;  %v436_v13 = vld [vmem:[%s2613_s6 + $0x60] sm:$0xff]  ;;  %458 = vmatpush.msra.mxu2 %v453_v8  ;;  %v435_v17 = vld [vmem:[%s2613_s6 + $0x58] sm:$0xff]  ;;  %v434_v21 = vld [vmem:[%s2613_s6 + $0x50] sm:$0xff] }
   0x7   :  { %244 = vmatpush.msra.mxu1 %v112_v7  ;;  %571 = vmatpush.msra.mxu3 %v437_v9  ;;  %v126_v14 = vld [vmem:[%s2614_s4 + $0x60] sm:$0xff]  ;;  %v125_v18 = vld [vmem:[%s2614_s4 + $0x58] sm:$0xff]  ;;  %v124_v22 = vld [vmem:[%s2614_s4 + $0x50] sm:$0xff] }
   0x8   :  { %v110_v15 = vld [vmem:[%s2615_s3 + $0x60] sm:$0xff]  ;;  %132 = vmatpush.msra.mxu0 %v127_v10  ;;  %459 = vmatpush.msra.mxu2 %v452_v12  ;;  %v109_v19 = vld [vmem:[%s2615_s3 + $0x58] sm:$0xff]  ;;  %v108_v23 = vld [vmem:[%s2615_s3 + $0x50] sm:$0xff] }
   0x9   :  { %245 = vmatpush.msra.mxu1 %v111_v11  ;;  %572 = vmatpush.msra.mxu3 %v436_v13  ;;  %v449_v24 = vld [vmem:[%s2612_s7 + $0x48] sm:$0xff]  ;;  %v448_v28 = vld [vmem:[%s2612_s7 + $0x40] sm:$0xff]  ;;  %v447_v32 = vld [vmem:[%s2612_s7 + $0x38] sm:$0xff] }
   0xa   :  { %133 = vmatpush.msra.mxu0 %v126_v14  ;;  %460 = vmatpush.msra.mxu2 %v451_v16  ;;  %v433_v25 = vld [vmem:[%s2613_s6 + $0x48] sm:$0xff]  ;;  %v432_v29 = vld [vmem:[%s2613_s6 + $0x40] sm:$0xff]  ;;  %v431_v33 = vld [vmem:[%s2613_s6 + $0x38] sm:$0xff] }
   0xb   :  { %246 = vmatpush.msra.mxu1 %v110_v15  ;;  %573 = vmatpush.msra.mxu3 %v435_v17  ;;  %v123_v26 = vld [vmem:[%s2614_s4 + $0x48] sm:$0xff]  ;;  %v122_v30 = vld [vmem:[%s2614_s4 + $0x40] sm:$0xff]  ;;  %v121_v34 = vld [vmem:[%s2614_s4 + $0x38] sm:$0xff] }
   0xc   :  { %134 = vmatpush.msra.mxu0 %v125_v18  ;;  %461 = vmatpush.msra.mxu2 %v450_v20  ;;  %v107_v27 = vld [vmem:[%s2615_s3 + $0x48] sm:$0xff]  ;;  %v106_v31 = vld [vmem:[%s2615_s3 + $0x40] sm:$0xff]  ;;  %v105_v35 = vld [vmem:[%s2615_s3 + $0x38] sm:$0xff] }
   0xd   :  { %247 = vmatpush.msra.mxu1 %v109_v19  ;;  %574 = vmatpush.msra.mxu3 %v434_v21  ;;  %v446_v36 = vld [vmem:[%s2612_s7 + $0x30] sm:$0xff]  ;;  %v445_v40 = vld [vmem:[%s2612_s7 + $0x28] sm:$0xff]  ;;  %v444_v44 = vld [vmem:[%s2612_s7 + $0x20] sm:$0xff] }
   0xe   :  { %135 = vmatpush.msra.mxu0 %v124_v22  ;;  %462 = vmatpush.msra.mxu2 %v449_v24  ;;  %v430_v37 = vld [vmem:[%s2613_s6 + $0x30] sm:$0xff]  ;;  %v429_v41 = vld [vmem:[%s2613_s6 + $0x28] sm:$0xff]  ;;  %v428_v45 = vld [vmem:[%s2613_s6 + $0x20] sm:$0xff] }
   0xf   :  { %248 = vmatpush.msra.mxu1 %v108_v23  ;;  %575 = vmatpush.msra.mxu3 %v433_v25  ;;  %v120_v38 = vld [vmem:[%s2614_s4 + $0x30] sm:$0xff]  ;;  %v119_v42 = vld [vmem:[%s2614_s4 + $0x28] sm:$0xff]  ;;  %v118_v46 = vld [vmem:[%s2614_s4 + $0x20] sm:$0xff] }
  0x10   :  { %136 = vmatpush.msra.mxu0 %v123_v26  ;;  %463 = vmatpush.msra.mxu2 %v448_v28  ;;  %v104_v39 = vld [vmem:[%s2615_s3 + $0x30] sm:$0xff]  ;;  %v103_v43 = vld [vmem:[%s2615_s3 + $0x28] sm:$0xff]  ;;  %v102_v47 = vld [vmem:[%s2615_s3 + $0x20] sm:$0xff] }
  0x11   :  { %249 = vmatpush.msra.mxu1 %v107_v27  ;;  %576 = vmatpush.msra.mxu3 %v432_v29  ;;  %v443_v48 = vld [vmem:[%s2612_s7 + $0x18] sm:$0xff]  ;;  %v442_v52 = vld [vmem:[%s2612_s7 + $0x10] sm:$0xff]  ;;  %v441_v56 = vld [vmem:[%s2612_s7 + $0x8] sm:$0xff] }
  0x12   :  { %137 = vmatpush.msra.mxu0 %v122_v30  ;;  %464 = vmatpush.msra.mxu2 %v447_v32  ;;  %v427_v49 = vld [vmem:[%s2613_s6 + $0x18] sm:$0xff]  ;;  %v426_v53 = vld [vmem:[%s2613_s6 + $0x10] sm:$0xff]  ;;  %v425_v57 = vld [vmem:[%s2613_s6 + $0x8] sm:$0xff] }
  0x13   :  { %250 = vmatpush.msra.mxu1 %v106_v31  ;;  %577 = vmatpush.msra.mxu3 %v431_v33  ;;  %v117_v50 = vld [vmem:[%s2614_s4 + $0x18] sm:$0xff]  ;;  %v116_v54 = vld [vmem:[%s2614_s4 + $0x10] sm:$0xff]  ;;  %v115_v58 = vld [vmem:[%s2614_s4 + $0x8] sm:$0xff] }
  0x14   :  { %138 = vmatpush.msra.mxu0 %v121_v34  ;;  %465 = vmatpush.msra.mxu2 %v446_v36  ;;  %v101_v51 = vld [vmem:[%s2615_s3 + $0x18] sm:$0xff]  ;;  %v100_v55 = vld [vmem:[%s2615_s3 + $0x10] sm:$0xff]  ;;  %v99_v59 = vld [vmem:[%s2615_s3 + $0x8] sm:$0xff] }
  0x15   :  { %251 = vmatpush.msra.mxu1 %v105_v35  ;;  %578 = vmatpush.msra.mxu3 %v430_v37  ;;  %v440_v60 = vld [vmem:[%s2612_s7] sm:$0xff]  ;;  %v35_v3 = vld [vmem:[%s2616_s2 + $0x8] sm:$0xff]  ;;  %v36_v6 = vld [vmem:[%s2616_s2 + $0x10] sm:$0xff] }
  0x16   :  { %139 = vmatpush.msra.mxu0 %v120_v38  ;;  %466 = vmatpush.msra.mxu2 %v445_v40  ;;  %v424_v61 = vld [vmem:[%s2613_s6] sm:$0xff]  ;;  %v393_v4 = vld [vmem:[%s2617_s1 + $0x8] sm:$0xff]  ;;  %v394_v7 = vld [vmem:[%s2617_s1 + $0x10] sm:$0xff] }
  0x17   :  { %252 = vmatpush.msra.mxu1 %v104_v39  ;;  %579 = vmatpush.msra.mxu3 %v429_v41  ;;  %v114_v62 = vld [vmem:[%s2614_s4] sm:$0xff]  ;;  %v67_v5 = vld [vmem:[%s2618_s0 + $0x8] sm:$0xff]  ;;  %v68_v8 = vld [vmem:[%s2618_s0 + $0x10] sm:$0xff] }
  0x18   :  { %140 = vmatpush.msra.mxu0 %v119_v42  ;;  %467 = vmatpush.msra.mxu2 %v444_v44  ;;  %v98_v63 = vld [vmem:[%s2615_s3] sm:$0xff]  ;;  %v37_v9 = vld [vmem:[%s2616_s2 + $0x18] sm:$0xff]  ;;  %v39_v15 = vld [vmem:[%s2616_s2 + $0x28] sm:$0xff] }
  0x19   :  { %253 = vmatpush.msra.mxu1 %v103_v43  ;;  %580 = vmatpush.msra.mxu3 %v428_v45  ;;  %v34_v0 = vld [vmem:[%s2616_s2] sm:$0xff]  ;;  %v395_v10 = vld [vmem:[%s2617_s1 + $0x18] sm:$0xff]  ;;  %v397_v16 = vld [vmem:[%s2617_s1 + $0x28] sm:$0xff] }
  0x1a   :  { %141 = vmatpush.msra.mxu0 %v118_v46  ;;  %468 = vmatpush.msra.mxu2 %v443_v48  ;;  %v392_v1 = vld [vmem:[%s2617_s1] sm:$0xff]  ;;  %v69_v11 = vld [vmem:[%s2618_s0 + $0x18] sm:$0xff]  ;;  %v71_v17 = vld [vmem:[%s2618_s0 + $0x28] sm:$0xff] }
  0x1b   :  { %254 = vmatpush.msra.mxu1 %v102_v47  ;;  %581 = vmatpush.msra.mxu3 %v427_v49  ;;  %v66_v2 = vld [vmem:[%s2618_s0] sm:$0xff]  ;;  %v40_v18 = vld [vmem:[%s2616_s2 + $0x30] sm:$0xff]  ;;  %v41_v21 = vld [vmem:[%s2616_s2 + $0x38] sm:$0xff] }
  0x1c   :  { %142 = vmatpush.msra.mxu0 %v117_v50  ;;  %469 = vmatpush.msra.mxu2 %v442_v52  ;;  %v38_v12 = vld [vmem:[%s2616_s2 + $0x20] sm:$0xff]  ;;  %v398_v19 = vld [vmem:[%s2617_s1 + $0x30] sm:$0xff]  ;;  %v399_v22 = vld [vmem:[%s2617_s1 + $0x38] sm:$0xff] }
  0x1d   :  { %255 = vmatpush.msra.mxu1 %v101_v51  ;;  %582 = vmatpush.msra.mxu3 %v426_v53  ;;  %v396_v13 = vld [vmem:[%s2617_s1 + $0x20] sm:$0xff]  ;;  %v72_v20 = vld [vmem:[%s2618_s0 + $0x30] sm:$0xff]  ;;  %v73_v23 = vld [vmem:[%s2618_s0 + $0x38] sm:$0xff] }
  0x1e   :  { %143 = vmatpush.msra.mxu0 %v116_v54  ;;  %470 = vmatpush.msra.mxu2 %v441_v56  ;;  %v70_v14 = vld [vmem:[%s2618_s0 + $0x20] sm:$0xff]  ;;  %v43_v27 = vld [vmem:[%s2616_s2 + $0x48] sm:$0xff]  ;;  %v44_v30 = vld [vmem:[%s2616_s2 + $0x50] sm:$0xff] }
  0x1f   :  { %256 = vmatpush.msra.mxu1 %v100_v55  ;;  %583 = vmatpush.msra.mxu3 %v425_v57  ;;  %v42_v24 = vld [vmem:[%s2616_s2 + $0x40] sm:$0xff]  ;;  %v401_v28 = vld [vmem:[%s2617_s1 + $0x48] sm:$0xff]  ;;  %v402_v31 = vld [vmem:[%s2617_s1 + $0x50] sm:$0xff] }
  0x20   :  { %144 = vmatpush.msra.mxu0 %v115_v58  ;;  %471 = vmatpush.msra.mxu2 %v440_v60  ;;  %v400_v25 = vld [vmem:[%s2617_s1 + $0x40] sm:$0xff]  ;;  %v75_v29 = vld [vmem:[%s2618_s0 + $0x48] sm:$0xff]  ;;  %v76_v32 = vld [vmem:[%s2618_s0 + $0x50] sm:$0xff] }
  0x21   :  { %257 = vmatpush.msra.mxu1 %v99_v59  ;;  %584 = vmatpush.msra.mxu3 %v424_v61  ;;  %v74_v26 = vld [vmem:[%s2618_s0 + $0x40] sm:$0xff]  ;;  %v45_v33 = vld [vmem:[%s2616_s2 + $0x58] sm:$0xff]  ;;  %v47_v39 = vld [vmem:[%s2616_s2 + $0x68] sm:$0xff] }
  0x22   :  { %145 = vmatpush.msra.mxu0 %v114_v62  ;;  %472 = vmatmul.f32.vlgmr.msra.gmra.mxu2 %v34_v0  ;;  %v403_v34 = vld [vmem:[%s2617_s1 + $0x58] sm:$0xff]  ;;  %v46_v36 = vld [vmem:[%s2616_s2 + $0x60] sm:$0xff]  ;;  %v405_v40 = vld [vmem:[%s2617_s1 + $0x68] sm:$0xff] }
  0x23   :  { %258 = vmatpush.msra.mxu1 %v98_v63  ;;  %585 = vmatmul.f32.vlgmr.msra.gmra.mxu3 %v392_v1  ;;  %v77_v35 = vld [vmem:[%s2618_s0 + $0x58] sm:$0xff]  ;;  %v404_v37 = vld [vmem:[%s2617_s1 + $0x60] sm:$0xff]  ;;  %v79_v41 = vld [vmem:[%s2618_s0 + $0x68] sm:$0xff] }
  0x24   :  { %146 = vmatmul.f32.vlgmr.msra.gmra.mxu0 %v34_v0  ;;  %259 = vmatmul.f32.vlgmr.msra.gmra.mxu1 %v66_v2  ;;  %v78_v38 = vld [vmem:[%s2618_s0 + $0x60] sm:$0xff]  ;;  %v48_v42 = vld [vmem:[%s2616_s2 + $0x70] sm:$0xff]  ;;  %v49_v45 = vld [vmem:[%s2616_s2 + $0x78] sm:$0xff] }
  0x25   :  { %v406_v43 = vld [vmem:[%s2617_s1 + $0x70] sm:$0xff]  ;;  %v407_v46 = vld [vmem:[%s2617_s1 + $0x78] sm:$0xff]  ;;  %v2075_v48 = vld [vmem:[%s2619_s5] ss:$0 sm:$0xff] }
  0x26   :  { %v80_v44 = vld [vmem:[%s2618_s0 + $0x70] sm:$0xff]  ;;  %v81_v47 = vld [vmem:[%s2618_s0 + $0x78] sm:$0xff]  ;;  %v50_v49 = vld [vmem:[%s2616_s2 + $0x80] sm:$0xff] }
  0x27   :  { %v408_v50 = vld [vmem:[%s2617_s1 + $0x80] sm:$0xff]  ;;  %v51_v60 = vld [vmem:[%s2616_s2 + $0x88] sm:$0xff] }
  0x28   :  { %v82_v53 = vld [vmem:[%s2618_s0 + $0x80] sm:$0xff]  ;;  %v409_v61 = vld [vmem:[%s2617_s1 + $0x88] sm:$0xff] }
  0x29   :  { %v2092_v56 = vld [vmem:[%s2620_s8] ss:$0 sm:$0xff]  ;;  %v83_v1 = vld [vmem:[%s2618_s0 + $0x88] sm:$0xff] }
  0x2a   :  { %475 = vmatmul.f32.gmra.mxu2 %v35_v3 }
  0x2b   :  { %588 = vmatmul.f32.gmra.mxu3 %v393_v4 }
  0x2c   :  { %149 = vmatmul.f32.gmra.mxu0 %v35_v3  ;;  %262 = vmatmul.f32.gmra.mxu1 %v67_v5 }
  0x32   :  { %478 = vmatmul.f32.gmra.mxu2 %v36_v6 }
  0x33   :  { %591 = vmatmul.f32.gmra.mxu3 %v394_v7 }
  0x34   :  { %152 = vmatmul.f32.gmra.mxu0 %v36_v6  ;;  %265 = vmatmul.f32.gmra.mxu1 %v68_v8 }
  0x3a   :  { %481 = vmatmul.f32.gmra.mxu2 %v37_v9 }
  0x3b   :  { %594 = vmatmul.f32.gmra.mxu3 %v395_v10  ;;  %v52_v10 = vld [vmem:[%s2616_s2 + $0x90] sm:$0xff] }
  0x3c   :  { %155 = vmatmul.f32.gmra.mxu0 %v37_v9  ;;  %268 = vmatmul.f32.gmra.mxu1 %v69_v11  ;;  %v410_v11 = vld [vmem:[%s2617_s1 + $0x90] sm:$0xff] }
  0x42   :  { %484 = vmatmul.f32.gmra.mxu2 %v38_v12 }
  0x43   :  { %597 = vmatmul.f32.gmra.mxu3 %v396_v13 }
  0x44   :  { %158 = vmatmul.f32.gmra.mxu0 %v38_v12  ;;  %271 = vmatmul.f32.gmra.mxu1 %v70_v14 }
  0x4a   :  { %487 = vmatmul.f32.gmra.mxu2 %v39_v15 }
  0x4b   :  { %600 = vmatmul.f32.gmra.mxu3 %v397_v16 }
  0x4c   :  { %161 = vmatmul.f32.gmra.mxu0 %v39_v15  ;;  %274 = vmatmul.f32.gmra.mxu1 %v71_v17  ;;  %v84_v15 = vld [vmem:[%s2618_s0 + $0x90] sm:$0xff] }
  0x52   :  { %490 = vmatmul.f32.gmra.mxu2 %v40_v18 }
  0x53   :  { %603 = vmatmul.f32.gmra.mxu3 %v398_v19 }
  0x54   :  { %164 = vmatmul.f32.gmra.mxu0 %v40_v18  ;;  %277 = vmatmul.f32.gmra.mxu1 %v72_v20 }
  0x5a   :  { %493 = vmatmul.f32.gmra.mxu2 %v41_v21 }
  0x5b   :  { %606 = vmatmul.f32.gmra.mxu3 %v399_v22 }
  0x5c   :  { %167 = vmatmul.f32.gmra.mxu0 %v41_v21  ;;  %280 = vmatmul.f32.gmra.mxu1 %v73_v23 }
  0x62   :  { %496 = vmatmul.f32.gmra.mxu2 %v42_v24 }
  0x63   :  { %609 = vmatmul.f32.gmra.mxu3 %v400_v25 }
  0x64   :  { %170 = vmatmul.f32.gmra.mxu0 %v42_v24  ;;  %283 = vmatmul.f32.gmra.mxu1 %v74_v26  ;;  %v53_v26 = vld [vmem:[%s2616_s2 + $0x98] sm:$0xff] }
  0x6a   :  { %499 = vmatmul.f32.gmra.mxu2 %v43_v27 }
  0x6b   :  { %612 = vmatmul.f32.gmra.mxu3 %v401_v28 }
  0x6c   :  { %173 = vmatmul.f32.gmra.mxu0 %v43_v27  ;;  %286 = vmatmul.f32.gmra.mxu1 %v75_v29  ;;  %v411_v27 = vld [vmem:[%s2617_s1 + $0x98] sm:$0xff] }
  0x72   :  { %502 = vmatmul.f32.gmra.mxu2 %v44_v30 }
  0x73   :  { %615 = vmatmul.f32.gmra.mxu3 %v402_v31  ;;  %v85_v31 = vld [vmem:[%s2618_s0 + $0x98] sm:$0xff] }
  0x74   :  { %176 = vmatmul.f32.gmra.mxu0 %v44_v30  ;;  %289 = vmatmul.f32.gmra.mxu1 %v76_v32 }
  0x7a   :  { %505 = vmatmul.f32.gmra.mxu2 %v45_v33 }
  0x7b   :  { %618 = vmatmul.f32.gmra.mxu3 %v403_v34  ;;  %v1680_v34 = vmov 0.0  }
  0x7c   :  { %179 = vmatmul.f32.gmra.mxu0 %v45_v33  ;;  %292 = vmatmul.f32.gmra.mxu1 %v77_v35  ;;  %1564 = vst [vmem:[%s2622_s10 + $0x40] sm:$0xff] %v1680_v34 }
  0x7d   :  { %1565 = vst [vmem:[%s2622_s10 + $0x48] sm:$0xff] %v1680_v34 }
  0x7e   :  { %1566 = vst [vmem:[%s2622_s10 + $0x50] sm:$0xff] %v1680_v34 }
  0x7f   :  { %1567 = vst [vmem:[%s2622_s10 + $0x58] sm:$0xff] %v1680_v34 }
  0x80   :  { %1568 = vst [vmem:[%s2622_s10 + $0x60] sm:$0xff] %v1680_v34 }
  0x81   :  { %1569 = vst [vmem:[%s2622_s10 + $0x68] sm:$0xff] %v1680_v34 }
  0x82   :  { %508 = vmatmul.f32.gmra.mxu2 %v46_v36  ;;  %1570 = vst [vmem:[%s2622_s10 + $0x70] sm:$0xff] %v1680_v34 }
  0x83   :  { %621 = vmatmul.f32.gmra.mxu3 %v404_v37  ;;  %1571 = vst [vmem:[%s2622_s10 + $0x78] sm:$0xff] %v1680_v34 }
  0x84   :  { %182 = vmatmul.f32.gmra.mxu0 %v46_v36  ;;  %295 = vmatmul.f32.gmra.mxu1 %v78_v38  ;;  %1572 = vst [vmem:[%s2622_s10 + $0x80] sm:$0xff] %v1680_v34 }
  0x85   :  { %1573 = vst [vmem:[%s2622_s10 + $0x88] sm:$0xff] %v1680_v34 }
  0x86   :  { %1574 = vst [vmem:[%s2622_s10 + $0x90] sm:$0xff] %v1680_v34 }
  0x87   :  { %1575 = vst [vmem:[%s2622_s10 + $0x98] sm:$0xff] %v1680_v34 }
  0x88   :  { %1576 = vst [vmem:[%s2622_s10 + $0xa0] sm:$0xff] %v1680_v34 }
  0x89   :  { %1577 = vst [vmem:[%s2622_s10 + $0xa8] sm:$0xff] %v1680_v34 }
  0x8a   :  { %511 = vmatmul.f32.gmra.mxu2 %v47_v39  ;;  %1578 = vst [vmem:[%s2622_s10 + $0xb0] sm:$0xff] %v1680_v34 }
  0x8b   :  { %624 = vmatmul.f32.gmra.mxu3 %v405_v40  ;;  %1579 = vst [vmem:[%s2622_s10 + $0xb8] sm:$0xff] %v1680_v34 }
  0x8c   :  { %185 = vmatmul.f32.gmra.mxu0 %v47_v39  ;;  %298 = vmatmul.f32.gmra.mxu1 %v79_v41  ;;  %1580 = vst [vmem:[%s2622_s10 + $0xc0] sm:$0xff] %v1680_v34 }
  0x8d   :  { %1581 = vst [vmem:[%s2622_s10 + $0xc8] sm:$0xff] %v1680_v34 }
  0x8e   :  { %1582 = vst [vmem:[%s2622_s10 + $0xd0] sm:$0xff] %v1680_v34 }
  0x8f   :  { %1583 = vst [vmem:[%s2622_s10 + $0xd8] sm:$0xff] %v1680_v34 }
  0x90   :  { %1584 = vst [vmem:[%s2622_s10 + $0xe0] sm:$0xff] %v1680_v34 }
  0x91   :  { %1585 = vst [vmem:[%s2622_s10 + $0xe8] sm:$0xff] %v1680_v34 }
  0x92   :  { %514 = vmatmul.f32.gmra.mxu2 %v48_v42  ;;  %1586 = vst [vmem:[%s2622_s10 + $0xf0] sm:$0xff] %v1680_v34 }
  0x93   :  { %627 = vmatmul.f32.gmra.mxu3 %v406_v43  ;;  %v412_v43 = vld [vmem:[%s2617_s1 + $0xa0] sm:$0xff]  ;;  %1587 = vst [vmem:[%s2622_s10 + $0xf8] sm:$0xff] %v1680_v34 }
  0x94   :  { %188 = vmatmul.f32.gmra.mxu0 %v48_v42  ;;  %301 = vmatmul.f32.gmra.mxu1 %v80_v44  ;;  %v54_v42 = vld [vmem:[%s2616_s2 + $0xa0] sm:$0xff] }
  0x9a   :  { %517 = vmatmul.f32.gmra.mxu2 %v49_v45 }
  0x9b   :  { %630 = vmatmul.f32.gmra.mxu3 %v407_v46 }
  0x9c   :  { %191 = vmatmul.f32.gmra.mxu0 %v49_v45  ;;  %304 = vmatmul.f32.gmra.mxu1 %v81_v47 }
  0xa1   :  { %v147_v51 = vpop.f32.mrf.mxu0  ;;  %v260_v52 = vpop.f32.mrf.mxu1 }
  0xa2   :  { %v261_v54 = vadd.f32 %v260_v52, %v147_v51  ;;  %520 = vmatmul.f32.gmra.mxu2 %v50_v49 }
  0xa3   :  { %633 = vmatmul.f32.gmra.mxu3 %v408_v50  ;;  %v86_v50 = vld [vmem:[%s2618_s0 + $0xa0] sm:$0xff] }
  0xa4   :  { %v2087_v55 = vadd.f32 %v2075_v48, %v261_v54  ;;  %194 = vmatmul.f32.gmra.mxu0 %v50_v49  ;;  %307 = vmatmul.f32.gmra.mxu1 %v82_v53 }
  0xa5   :  { %v473_v57 = vpop.f32.mrf.mxu2 }
  0xa6   :  { %718 = vst [vmem:[%s2621_s9] sm:$0xff] %v2087_v55  ;;  %v586_v58 = vpop.f32.mrf.mxu3 }
  0xa7   :  { %v587_v59 = vadd.f32 %v586_v58, %v473_v57 }
  0xa9   :  { %v2105_v62 = vadd.f32 %v2092_v56, %v587_v59  ;;  %v150_v63 = vpop.f32.mrf.mxu0  ;;  %v263_v0 = vpop.f32.mrf.mxu1 }
  0xaa   :  { %v264_v2 = vadd.f32 %v263_v0, %v150_v63  ;;  %523 = vmatmul.f32.gmra.mxu2 %v51_v60 }
  0xab   :  { %v782_v3 = vand.u32 2147483647, %v2105_v62  ;;  %636 = vmatmul.f32.gmra.mxu3 %v409_v61  ;;  %v750_v44 = vmax.f32 %v2105_v62, 0.0 }
  0xac   :  { %v2112_v4 = vadd.f32 %v2075_v48, %v264_v2  ;;  %197 = vmatmul.f32.gmra.mxu0 %v51_v60  ;;  %310 = vmatmul.f32.gmra.mxu1 %v83_v1  ;;  %v55_v1 = vld [vmem:[%s2616_s2 + $0xa8] sm:$0xff] }
  0xad   :  { %v814_v5 = vsub.f32 0.0, %v782_v3  ;;  %v476_v6 = vpop.f32.mrf.mxu2  ;;  %v413_v2 = vld [vmem:[%s2617_s1 + $0xa8] sm:$0xff] }
  0xae   :  { %719 = vst [vmem:[%s2621_s9 + $0x8] sm:$0xff] %v2112_v4  ;;  %v589_v7 = vpop.f32.mrf.mxu3 }
  0xaf   :  { %v846_v8 = vmul.f32 1.442695, %v814_v5  ;;  %v590_v9 = vadd.f32 %v589_v7, %v476_v6 }
  0xb1   :  { %1631 = vpow2.f32 %v846_v8  ;;  %v2125_v12 = vadd.f32 %v2092_v56, %v590_v9  ;;  %v153_v13 = vpop.f32.mrf.mxu0  ;;  %v266_v14 = vpop.f32.mrf.mxu1  ;;  %v87_v9 = vld [vmem:[%s2618_s0 + $0xa8] sm:$0xff] }
  0xb2   :  { %v267_v16 = vadd.f32 %v266_v14, %v153_v13  ;;  %526 = vmatmul.f32.gmra.mxu2 %v52_v10 }
  0xb3   :  { %v783_v17 = vand.u32 2147483647, %v2125_v12  ;;  %639 = vmatmul.f32.gmra.mxu3 %v410_v11  ;;  %v751_v5 = vmax.f32 %v2125_v12, 0.0 }
  0xb4   :  { %v2132_v18 = vadd.f32 %v2075_v48, %v267_v16  ;;  %200 = vmatmul.f32.gmra.mxu0 %v52_v10  ;;  %313 = vmatmul.f32.gmra.mxu1 %v84_v15 }
  0xb5   :  { %v815_v19 = vsub.f32 0.0, %v783_v17  ;;  %v479_v20 = vpop.f32.mrf.mxu2 }
  0xb6   :  { %720 = vst [vmem:[%s2621_s9 + $0x10] sm:$0xff] %v2132_v18  ;;  %v592_v21 = vpop.f32.mrf.mxu3 }
  0xb7   :  { %v1632_v22 = vpop.eup %1631  ;;  %v848_v23 = vmul.f32 1.442695, %v815_v19  ;;  %v593_v24 = vadd.f32 %v592_v21, %v479_v20 }
  0xb8   :  { %v910_v25 = vadd.f32 1.0, %v1632_v22 }
  0xb9   :  { %1633 = vpow2.f32 %v848_v23  ;;  %v2145_v28 = vadd.f32 %v2092_v56, %v593_v24  ;;  %v2147_v29 = vpop.f32.mrf.mxu0  ;;  %v2149_v30 = vpop.f32.mrf.mxu1 }
  0xba   :  { %1635 = vlog2.f32 %v910_v25  ;;  %529 = vmatmul.f32.gmra.mxu2 %v53_v26  ;;  %v270_v15 = vadd.f32 %v2149_v30, %v2147_v29  ;;  %v1457_v25 = vlaneseq  ;;  %v56_v30 = vld [vmem:[%s2616_s2 + $0xb0] sm:$0xff] }
  0xbb   :  { %v784_v32 = vand.u32 2147483647, %v2145_v28  ;;  %642 = vmatmul.f32.gmra.mxu3 %v411_v27 }
  0xbc   :  { %203 = vmatmul.f32.gmra.mxu0 %v53_v26  ;;  %316 = vmatmul.f32.gmra.mxu1 %v85_v31  ;;  %v414_v31 = vld [vmem:[%s2617_s1 + $0xb0] sm:$0xff] }
  0xbd   :  { %v816_v33 = vsub.f32 0.0, %v784_v32  ;;  %v482_v35 = vpop.f32.mrf.mxu2 }
  0xbe   :  { %v595_v36 = vpop.f32.mrf.mxu3 }
  0xbf   :  { %v1634_v37 = vpop.eup %1633  ;;  %v850_v38 = vmul.f32 1.442695, %v816_v33  ;;  %v596_v39 = vadd.f32 %v595_v36, %v482_v35  ;;  %v752_v33 = vmax.f32 %v2145_v28, 0.0  ;;  %v2291_v28 = vadd.f32 %v2075_v48, %v270_v15 }
  0xc0   :  { %v1636_v40 = vpop.eup %1635  ;;  %v911_v41 = vadd.f32 1.0, %v1634_v37 }
  0xc1   :  { %v943_v45 = vmul.f32 0.6931472, %v1636_v40  ;;  %1637 = vpow2.f32 %v850_v38  ;;  %v2179_v46 = vadd.f32 %v2092_v56, %v596_v39  ;;  %v159_v47 = vpop.f32.mrf.mxu0  ;;  %v272_v49 = vpop.f32.mrf.mxu1  ;;  %v88_v39 = vld [vmem:[%s2618_s0 + $0xb0] sm:$0xff]  ;;  %v1230_v40 = vmul.f32 %v2087_v55, %v2087_v55  ;;  %721 = vst [vmem:[%s2621_s9 + $0x18] sm:$0xff] %v2291_v28 }
  0xc2   :  { %1639 = vlog2.f32 %v911_v41  ;;  %532 = vmatmul.f32.gmra.mxu2 %v54_v42  ;;  %v273_v22 = vadd.f32 %v272_v49, %v159_v47  ;;  %v2300_v47 = vand.u32 127, %v1457_v25 }
  0xc3   :  { %v1006_v51 = vadd.f32 %v943_v45, %v750_v44  ;;  %v785_v52 = vand.u32 2147483647, %v2179_v46  ;;  %645 = vmatmul.f32.gmra.mxu3 %v412_v43 }
  0xc4   :  { %206 = vmatmul.f32.gmra.mxu0 %v54_v42  ;;  %319 = vmatmul.f32.gmra.mxu1 %v86_v50  ;;  %v2298_v55 = vadd.f32 %v2075_v48, %v273_v22  ;;  %vm1491_vm0 = vcmp.lt.s32.totalorder %v2300_v47, 32 }
  0xc5   :  { %v1038_v53 = vmul.f32 0.9, %v1006_v51  ;;  %v817_v54 = vsub.f32 0.0, %v785_v52  ;;  %v485_v57 = vpop.f32.mrf.mxu2 }
  0xc6   :  { %v598_v58 = vpop.f32.mrf.mxu3  ;;  %722 = vst [vmem:[%s2621_s9 + $0x20] sm:$0xff] %v2298_v55 }
  0xc7   :  { %v1638_v59 = vpop.eup %1637  ;;  %v2205_v60 = vadd.f32 0.1, %v1038_v53  ;;  %v852_v61 = vmul.f32 1.442695, %v817_v54  ;;  %v599_v62 = vadd.f32 %v598_v58, %v485_v57 }
  0xc8   :  { %v1640_v63 = vpop.eup %1639  ;;  %v912_v0 = vadd.f32 1.0, %v1638_v59 }
  0xc9   :  { %v1134_v3 = vmul.f32 2.0, %v2205_v60  ;;  %v945_v6 = vmul.f32 0.6931472, %v1640_v63  ;;  %1641 = vpow2.f32 %v852_v61  ;;  %v162_v7 = vpop.f32.mrf.mxu0  ;;  %v275_v8 = vpop.f32.mrf.mxu1  ;;  %v2235_v10 = vadd.f32 %v2092_v56, %v599_v62 }
  0xca   :  { %1643 = vlog2.f32 %v912_v0  ;;  %535 = vmatmul.f32.gmra.mxu2 %v55_v1  ;;  %v276_v29 = vadd.f32 %v275_v8, %v162_v7  ;;  %v1102_v53 = vsub.f32 1.2819356, %v2205_v60  ;;  %v1231_v60 = vmul.f32 %v2112_v4, %v2112_v4 }
  0xcb   :  { %v1166_v11 = vmul.f32 1.442695, %v1134_v3  ;;  %v1007_v12 = vadd.f32 %v945_v6, %v751_v5  ;;  %648 = vmatmul.f32.gmra.mxu3 %v413_v2  ;;  %v786_v13 = vand.u32 2147483647, %v2235_v10  ;;  %v415_v2 = vld [vmem:[%s2617_s1 + $0xb8] sm:$0xff]  ;;  %v753_v6 = vmax.f32 %v2179_v46, 0.0 }
  0xcc   :  { %209 = vmatmul.f32.gmra.mxu0 %v55_v1  ;;  %322 = vmatmul.f32.gmra.mxu1 %v87_v9  ;;  %v2307_v49 = vadd.f32 %v2075_v48, %v276_v29  ;;  %v57_v1 = vld [vmem:[%s2616_s2 + $0xb8] sm:$0xff] }
  0xcd   :  { %1645 = vpow2.f32 %v1166_v11  ;;  %v1039_v14 = vmul.f32 0.9, %v1007_v12  ;;  %v818_v16 = vsub.f32 0.0, %v786_v13  ;;  %v488_v17 = vpop.f32.mrf.mxu2  ;;  %v89_v11 = vld [vmem:[%s2618_s0 + $0xb8] sm:$0xff] }
  0xce   :  { %v601_v19 = vpop.f32.mrf.mxu3  ;;  %723 = vst [vmem:[%s2621_s9 + $0x28] sm:$0xff] %v2307_v49 }
  0xcf   :  { %v1642_v20 = vpop.eup %1641  ;;  %v2260_v21 = vadd.f32 0.1, %v1039_v14  ;;  %v602_v23 = vadd.f32 %v601_v19, %v488_v17  ;;  %v854_v27 = vmul.f32 1.442695, %v818_v16 }
  0xd0   :  { %v1644_v24 = vpop.eup %1643  ;;  %v913_v26 = vadd.f32 1.0, %v1642_v20 }
  0xd1   :  { %v1135_v32 = vmul.f32 2.0, %v2260_v21  ;;  %v947_v35 = vmul.f32 0.6931472, %v1644_v24  ;;  %v2279_v36 = vadd.f32 %v2092_v56, %v602_v23  ;;  %v165_v37 = vpop.f32.mrf.mxu0  ;;  %v278_v38 = vpop.f32.mrf.mxu1  ;;  %v1103_v25 = vsub.f32 1.2819356, %v2260_v21  ;;  %v416_v21 = vld [vmem:[%s2617_s1 + $0xc0] sm:$0xff] }
  0xd2   :  { %1647 = vlog2.f32 %v913_v26  ;;  %v279_v41 = vadd.f32 %v278_v38, %v165_v37  ;;  %538 = vmatmul.f32.gmra.mxu2 %v56_v30  ;;  %v58_v37 = vld [vmem:[%s2616_s2 + $0xc0] sm:$0xff] }
  0xd3   :  { %v1646_v42 = vpop.eup %1645  ;;  %v1168_v43 = vmul.f32 1.442695, %v1135_v32  ;;  %v1008_v44 = vadd.f32 %v947_v35, %v752_v33  ;;  %1649 = vpow2.f32 %v854_v27  ;;  %651 = vmatmul.f32.gmra.mxu3 %v414_v31  ;;  %v787_v50 = vand.u32 2147483647, %v2279_v36 }
  0xd4   :  { %v1262_v45 = vadd.f32 %v1646_v42, %v1230_v40  ;;  %212 = vmatmul.f32.gmra.mxu0 %v56_v30  ;;  %325 = vmatmul.f32.gmra.mxu1 %v88_v39  ;;  %v2315_v52 = vadd.f32 %v2075_v48, %v279_v41  ;;  %v90_v42 = vld [vmem:[%s2618_s0 + $0xc0] sm:$0xff] }
  0xd5   :  { %1651 = vpow2.f32 %v1168_v43  ;;  %v1040_v51 = vmul.f32 0.9, %v1008_v44  ;;  %v819_v57 = vsub.f32 0.0, %v787_v50  ;;  %v491_v58 = vpop.f32.mrf.mxu2 }
  0xd6   :  { %v1294_v54 = vmul.f32 0.038503036, %v1262_v45  ;;  %v604_v59 = vpop.f32.mrf.mxu3  ;;  %724 = vst [vmem:[%s2621_s9 + $0x30] sm:$0xff] %v2315_v52  ;;  %v1232_v45 = vmul.f32 %v2132_v18, %v2132_v18 }
  0xd7   :  { %v2322_v61 = vadd.f32 0.1, %v1040_v51  ;;  %v605_v34 = vadd.f32 %v604_v59, %v491_v58  ;;  %v856_v0 = vmul.f32 1.442695, %v819_v57  ;;  %v754_v57 = vmax.f32 %v2235_v10, 0.0 }
  0xd8   :  { %v1648_v62 = vpop.eup %1647  ;;  %v1326_v63 = vadd.f32 %v1294_v54, %v1102_v53 }
  0xd9   :  { %v1650_v3 = vpop.eup %1649  ;;  %v1136_v5 = vmul.f32 2.0, %v2322_v61  ;;  %v949_v4 = vmul.f32 0.6931472, %v1648_v62  ;;  %v2348_v7 = vadd.f32 %v2092_v56, %v605_v34  ;;  %v168_v8 = vpop.f32.mrf.mxu0  ;;  %1653 = vpow2.f32 %v856_v0 }
  0xda   :  { %v281_v9 = vpop.f32.mrf.mxu1  ;;  %v1596_v12 = vadd.f32 -0.5, %v1326_v63  ;;  %v914_v13 = vadd.f32 1.0, %v1650_v3  ;;  %541 = vmatmul.f32.gmra.mxu2 %v57_v1  ;;  %v1104_v10 = vsub.f32 1.2819356, %v2322_v61  ;;  %v417_v61 = vld [vmem:[%s2617_s1 + $0xc8] sm:$0xff] }
  0xdb   :  { %v282_v14 = vadd.f32 %v281_v9, %v168_v8  ;;  %v1652_v46 = vpop.eup %1651  ;;  %v1170_v15 = vmul.f32 1.442695, %v1136_v5  ;;  %v1009_v16 = vadd.f32 %v949_v4, %v753_v6  ;;  %v788_v17 = vand.u32 2147483647, %v2348_v7  ;;  %654 = vmatmul.f32.gmra.mxu3 %v415_v2  ;;  %v59_v8 = vld [vmem:[%s2616_s2 + $0xc8] sm:$0xff] }
  0xdc   :  { %v1524_v19 = vsel %vm1491_vm0, %v1596_v12, 0.0  ;;  %v1263_v20 = vadd.f32 %v1652_v46, %v1231_v60  ;;  %1655 = vlog2.f32 %v914_v13  ;;  %215 = vmatmul.f32.gmra.mxu0 %v57_v1  ;;  %328 = vmatmul.f32.gmra.mxu1 %v89_v11  ;;  %v1233_v11 = vmul.f32 %v2291_v28, %v2291_v28 }
  0xdd   :  { %v2357_v22 = vadd.f32 %v2075_v48, %v282_v14  ;;  %1556 = vst [vmem:[%s2622_s10] sm:$0xff] %v1524_v19  ;;  %1657 = vpow2.f32 %v1170_v15  ;;  %v1041_v23 = vmul.f32 0.9, %v1009_v16  ;;  %v820_v24 = vsub.f32 0.0, %v788_v17  ;;  %v494_v27 = vpop.f32.mrf.mxu2  ;;  %v91_v15 = vld [vmem:[%s2618_s0 + $0xc8] sm:$0xff] }
  0xde   :  { %v1295_v26 = vmul.f32 0.038503036, %v1263_v20  ;;  %v607_v29 = vpop.f32.mrf.mxu3  ;;  %v755_v13 = vmax.f32 %v2279_v36, 0.0 }
  0xdf   :  { %725 = vst [vmem:[%s2621_s9 + $0x38] sm:$0xff] %v2357_v22  ;;  %v2367_v30 = vadd.f32 0.1, %v1041_v23  ;;  %v858_v31 = vmul.f32 1.442695, %v820_v24  ;;  %v608_v32 = vadd.f32 %v607_v29, %v494_v27  ;;  %v1654_v33 = vpop.eup %1653 }
  0xe0   :  { %v1327_v35 = vadd.f32 %v1295_v26, %v1103_v25  ;;  %v915_v39 = vadd.f32 1.0, %v1654_v33 }
  0xe1   :  { %v1137_v38 = vmul.f32 2.0, %v2367_v30  ;;  %1659 = vpow2.f32 %v858_v31  ;;  %v171_v40 = vpop.f32.mrf.mxu0  ;;  %v2382_v50 = vadd.f32 %v2092_v56, %v608_v32  ;;  %v1105_v26 = vsub.f32 1.2819356, %v2367_v30  ;;  %v418_v30 = vld [vmem:[%s2617_s1 + $0xd0] sm:$0xff] }
  0xe2   :  { %v284_v41 = vpop.f32.mrf.mxu1  ;;  %v1656_v43 = vpop.eup %1655  ;;  %v1597_v44 = vadd.f32 -0.5, %v1327_v35  ;;  %1661 = vlog2.f32 %v915_v39  ;;  %544 = vmatmul.f32.gmra.mxu2 %v58_v37 }
  0xe3   :  { %v285_v51 = vadd.f32 %v284_v41, %v171_v40  ;;  %v1658_v53 = vpop.eup %1657  ;;  %v1172_v54 = vmul.f32 1.442695, %v1137_v38  ;;  %v951_v58 = vmul.f32 0.6931472, %v1656_v43  ;;  %657 = vmatmul.f32.gmra.mxu3 %v416_v21  ;;  %v789_v62 = vand.u32 2147483647, %v2382_v50 }
  0xe4   :  { %v1525_v59 = vsel %vm1491_vm0, %v1597_v44, 0.0  ;;  %v1264_v34 = vadd.f32 %v1658_v53, %v1232_v45  ;;  %218 = vmatmul.f32.gmra.mxu0 %v58_v37  ;;  %331 = vmatmul.f32.gmra.mxu1 %v90_v42  ;;  %v60_v38 = vld [vmem:[%s2616_s2 + $0xd0] sm:$0xff]  ;;  %v756_v40 = vmax.f32 %v2348_v7, 0.0  ;;  %v1234_v7 = vmul.f32 %v2298_v55, %v2298_v55 }
  0xe5   :  { %1557 = vst [vmem:[%s2622_s10 + $0x8] sm:$0xff] %v1525_v59  ;;  %1663 = vpow2.f32 %v1172_v54  ;;  %v1010_v56 = vadd.f32 %v951_v58, %v754_v57  ;;  %v368_v18 = vadd.f32 %v2075_v48, %v285_v51  ;;  %v821_v60 = vsub.f32 0.0, %v789_v62  ;;  %v497_v0 = vpop.f32.mrf.mxu2  ;;  %v92_v44 = vld [vmem:[%s2618_s0 + $0xd0] sm:$0xff] }
  0xe6   :  { %v1296_v63 = vmul.f32 0.038503036, %v1264_v34  ;;  %v610_v1 = vpop.f32.mrf.mxu3 }
  0xe7   :  { %v1660_v2 = vpop.eup %1659  ;;  %v1042_v3 = vmul.f32 0.9, %v1010_v56  ;;  %726 = vst [vmem:[%s2621_s9 + $0x40] sm:$0xff] %v368_v18  ;;  %v860_v4 = vmul.f32 1.442695, %v821_v60  ;;  %v61_v1 = vld [vmem:[%s2616_s2 + $0xd8] sm:$0xff] }
  0xe8   :  { %v1328_v5 = vadd.f32 %v1296_v63, %v1104_v10  ;;  %v916_v6 = vadd.f32 1.0, %v1660_v2  ;;  %v1662_v9 = vpop.eup %1661  ;;  %v419_v2 = vld [vmem:[%s2617_s1 + $0xd8] sm:$0xff] }
  0xe9   :  { %v2404_v12 = vadd.f32 0.1, %v1042_v3  ;;  %v174_v14 = vpop.f32.mrf.mxu0  ;;  %v953_v17 = vmul.f32 0.6931472, %v1662_v9 }
  0xea   :  { %v287_v46 = vpop.f32.mrf.mxu1  ;;  %v1598_v16 = vadd.f32 -0.5, %v1328_v5  ;;  %1665 = vlog2.f32 %v916_v6  ;;  %547 = vmatmul.f32.gmra.mxu2 %v59_v8 }
  0xeb   :  { %v288_v19 = vadd.f32 %v287_v46, %v174_v14  ;;  %v1664_v20 = vpop.eup %1663  ;;  %v1138_v23 = vmul.f32 2.0, %v2404_v12  ;;  %1667 = vpow2.f32 %v860_v4  ;;  %660 = vmatmul.f32.gmra.mxu3 %v417_v61  ;;  %v1011_v24 = vadd.f32 %v953_v17, %v755_v13  ;;  %v93_v4 = vld [vmem:[%s2618_s0 + $0xd8] sm:$0xff] }
  0xec   :  { %v1526_v28 = vsel %vm1491_vm0, %v1598_v16, 0.0  ;;  %v1265_v36 = vadd.f32 %v1664_v20, %v1233_v11  ;;  %221 = vmatmul.f32.gmra.mxu0 %v59_v8  ;;  %334 = vmatmul.f32.gmra.mxu1 %v91_v15  ;;  %v1106_v55 = vsub.f32 1.2819356, %v2404_v12  ;;  %v1235_v11 = vmul.f32 %v2307_v49, %v2307_v49 }
  0xed   :  { %v369_v25 = vadd.f32 %v2075_v48, %v288_v19  ;;  %1558 = vst [vmem:[%s2622_s10 + $0x10] sm:$0xff] %v1526_v28  ;;  %v1174_v27 = vmul.f32 1.442695, %v1138_v23  ;;  %v1043_v31 = vmul.f32 0.9, %v1011_v24  ;;  %v500_v32 = vpop.f32.mrf.mxu2  ;;  %v757_v13 = vmax.f32 %v2382_v50, 0.0 }
  0xee   :  { %v1297_v29 = vmul.f32 0.038503036, %v1265_v36  ;;  %v613_v33 = vpop.f32.mrf.mxu3  ;;  %v62_v24 = vld [vmem:[%s2616_s2 + $0xe0] sm:$0xff] }
  0xef   :  { %727 = vst [vmem:[%s2621_s9 + $0x48] sm:$0xff] %v369_v25  ;;  %1669 = vpow2.f32 %v1174_v27  ;;  %v2421_v21 = vadd.f32 0.1, %v1043_v31  ;;  %v420_v25 = vld [vmem:[%s2617_s1 + $0xe0] sm:$0xff]  ;;  %v1236_v33 = vmul.f32 %v2315_v52, %v2315_v52 }
  0xf0   :  { %v1666_v35 = vpop.eup %1665  ;;  %v1329_v37 = vadd.f32 %v1297_v29, %v1105_v26  ;;  %v94_v32 = vld [vmem:[%s2618_s0 + $0xe0] sm:$0xff] }
  0xf1   :  { %v1668_v39 = vpop.eup %1667  ;;  %v955_v41 = vmul.f32 0.6931472, %v1666_v35  ;;  %v177_v42 = vpop.f32.mrf.mxu0  ;;  %v1139_v51 = vmul.f32 2.0, %v2421_v21  ;;  %v1107_v49 = vsub.f32 1.2819356, %v2421_v21 }
  0xf2   :  { %v290_v43 = vpop.f32.mrf.mxu1  ;;  %v1599_v45 = vadd.f32 -0.5, %v1329_v37  ;;  %v917_v53 = vadd.f32 1.0, %v1668_v39  ;;  %550 = vmatmul.f32.gmra.mxu2 %v60_v38 }
  0xf3   :  { %v1012_v54 = vadd.f32 %v955_v41, %v756_v40  ;;  %v291_v57 = vadd.f32 %v290_v43, %v177_v42  ;;  %663 = vmatmul.f32.gmra.mxu3 %v418_v30  ;;  %v1176_v59 = vmul.f32 1.442695, %v1139_v51  ;;  %v63_v51 = vld [vmem:[%s2616_s2 + $0xe8] sm:$0xff] }
  0xf4   :  { %v1527_v58 = vsel %vm1491_vm0, %v1599_v45, 0.0  ;;  %1671 = vlog2.f32 %v917_v53  ;;  %224 = vmatmul.f32.gmra.mxu0 %v60_v38  ;;  %337 = vmatmul.f32.gmra.mxu1 %v92_v44  ;;  %v421_v53 = vld [vmem:[%s2617_s1 + $0xe8] sm:$0xff] }
  0xf5   :  { %v1670_v34 = vpop.eup %1669  ;;  %1559 = vst [vmem:[%s2622_s10 + $0x18] sm:$0xff] %v1527_v58  ;;  %v1044_v62 = vmul.f32 0.9, %v1012_v54  ;;  %v370_v56 = vadd.f32 %v2075_v48, %v291_v57  ;;  %1673 = vpow2.f32 %v1176_v59  ;;  %v503_v10 = vpop.f32.mrf.mxu2  ;;  %v95_v58 = vld [vmem:[%s2618_s0 + $0xe8] sm:$0xff] }
  0xf6   :  { %v1266_v18 = vadd.f32 %v1670_v34, %v1234_v7  ;;  %v616_v63 = vpop.f32.mrf.mxu3 }
  0xf7   :  { %v2442_v60 = vadd.f32 0.1, %v1044_v62  ;;  %728 = vst [vmem:[%s2621_s9 + $0x50] sm:$0xff] %v370_v56  ;;  %v1237_v62 = vmul.f32 %v2357_v22, %v2357_v22  ;;  %v64_v22 = vld [vmem:[%s2616_s2 + $0xf0] sm:$0xff] }
  0xf8   :  { %v1298_v0 = vmul.f32 0.038503036, %v1266_v18 }
  0xf9   :  { %v1140_v3 = vmul.f32 2.0, %v2442_v60  ;;  %v180_v5 = vpop.f32.mrf.mxu0  ;;  %v1108_v52 = vsub.f32 1.2819356, %v2442_v60 }
  0xfa   :  { %v293_v6 = vpop.f32.mrf.mxu1  ;;  %v1672_v8 = vpop.eup %1671  ;;  %v1330_v61 = vadd.f32 %v1298_v0, %v1106_v55  ;;  %553 = vmatmul.f32.gmra.mxu2 %v61_v1 }
  0xfb   :  { %v294_v9 = vadd.f32 %v293_v6, %v180_v5  ;;  %v1178_v12 = vmul.f32 1.442695, %v1140_v3  ;;  %v957_v14 = vmul.f32 0.6931472, %v1672_v8  ;;  %666 = vmatmul.f32.gmra.mxu3 %v419_v2  ;;  %v1674_v46 = vpop.eup %1673  ;;  %v96_v5 = vld [vmem:[%s2618_s0 + $0xf0] sm:$0xff] }
  0xfc   :  { %v1600_v15 = vadd.f32 -0.5, %v1330_v61  ;;  %227 = vmatmul.f32.gmra.mxu0 %v61_v1  ;;  %340 = vmatmul.f32.gmra.mxu1 %v93_v4  ;;  %v1267_v17 = vadd.f32 %v1674_v46, %v1235_v11  ;;  %v422_v1 = vld [vmem:[%s2617_s1 + $0xf0] sm:$0xff] }
  0xfd   :  { %v371_v16 = vadd.f32 %v2075_v48, %v294_v9  ;;  %1675 = vpow2.f32 %v1178_v12  ;;  %v1013_v19 = vadd.f32 %v957_v14, %v757_v13  ;;  %v506_v50 = vpop.f32.mrf.mxu2  ;;  %v65_v13 = vld [vmem:[%s2616_s2 + $0xf8] sm:$0xff] }
  0xfe   :  { %v1528_v20 = vsel %vm1491_vm0, %v1600_v15, 0.0  ;;  %v619_v23 = vpop.f32.mrf.mxu3  ;;  %v1299_v28 = vmul.f32 0.038503036, %v1267_v17  ;;  %v423_v14 = vld [vmem:[%s2617_s1 + $0xf8] sm:$0xff] }
  0xff   :  { %729 = vst [vmem:[%s2621_s9 + $0x58] sm:$0xff] %v371_v16  ;;  %v1045_v36 = vmul.f32 0.9, %v1013_v19  ;;  %v97_v15 = vld [vmem:[%s2618_s0 + $0xf8] sm:$0xff] }
 0x100   :  { %1560 = vst [vmem:[%s2622_s10 + $0x20] sm:$0xff] %v1528_v20  ;;  %v1331_v26 = vadd.f32 %v1299_v28, %v1107_v49 }
 0x101   :  { %v1077_v27 = vadd.f32 0.1, %v1045_v36  ;;  %v183_v29 = vpop.f32.mrf.mxu0 }
 0x102   :  { %v296_v31 = vpop.f32.mrf.mxu1  ;;  %v1601_v21 = vadd.f32 -0.5, %v1331_v26  ;;  %556 = vmatmul.f32.gmra.mxu2 %v62_v24 }
 0x103   :  { %v297_v35 = vadd.f32 %v296_v31, %v183_v29  ;;  %v1676_v37 = vpop.eup %1675  ;;  %v1141_v38 = vmul.f32 2.0, %v1077_v27  ;;  %669 = vmatmul.f32.gmra.mxu3 %v420_v25  ;;  %v1109_v55 = vsub.f32 1.2819356, %v1077_v27 }
 0x104   :  { %v1268_v30 = vadd.f32 %v1676_v37, %v1236_v33  ;;  %230 = vmatmul.f32.gmra.mxu0 %v62_v24  ;;  %343 = vmatmul.f32.gmra.mxu1 %v94_v32  ;;  %v1529_v40 = vsel %vm1491_vm0, %v1601_v21, 0.0 }
 0x105   :  { %v372_v39 = vadd.f32 %v2075_v48, %v297_v35  ;;  %v1180_v41 = vmul.f32 1.442695, %v1141_v38  ;;  %1561 = vst [vmem:[%s2622_s10 + $0x28] sm:$0xff] %v1529_v40  ;;  %v509_v43 = vpop.f32.mrf.mxu2 }
 0x106   :  { %v1300_v42 = vmul.f32 0.038503036, %v1268_v30  ;;  %v622_v44 = vpop.f32.mrf.mxu3 }
 0x107   :  { %1677 = vpow2.f32 %v1180_v41  ;;  %730 = vst [vmem:[%s2621_s9 + $0x60] sm:$0xff] %v372_v39 }
 0x108   :  { %v1332_v45 = vadd.f32 %v1300_v42, %v1108_v52 }
 0x109   :  { %v186_v54 = vpop.f32.mrf.mxu0 }
 0x10a   :  { %v299_v57 = vpop.f32.mrf.mxu1  ;;  %v1602_v7 = vadd.f32 -0.5, %v1332_v45  ;;  %559 = vmatmul.f32.gmra.mxu2 %v63_v51 }
 0x10b   :  { %v300_v59 = vadd.f32 %v299_v57, %v186_v54  ;;  %672 = vmatmul.f32.gmra.mxu3 %v421_v53 }
 0x10c   :  { %v1530_v34 = vsel %vm1491_vm0, %v1602_v7, 0.0  ;;  %233 = vmatmul.f32.gmra.mxu0 %v63_v51  ;;  %346 = vmatmul.f32.gmra.mxu1 %v95_v58 }
 0x10d   :  { %v373_v56 = vadd.f32 %v2075_v48, %v300_v59  ;;  %v1678_v18 = vpop.eup %1677  ;;  %1562 = vst [vmem:[%s2622_s10 + $0x30] sm:$0xff] %v1530_v34  ;;  %v512_v63 = vpop.f32.mrf.mxu2 }
 0x10e   :  { %v1269_v10 = vadd.f32 %v1678_v18, %v1237_v62  ;;  %v625_v60 = vpop.f32.mrf.mxu3 }
 0x10f   :  { %731 = vst [vmem:[%s2621_s9 + $0x68] sm:$0xff] %v373_v56  ;;  %v2570_v60 = vld [vmem:[%s2619_s5] ss:$0 sm:$0xff] }
 0x110   :  { %v1301_v0 = vmul.f32 0.038503036, %v1269_v10 }
 0x111   :  { %v189_v2 = vpop.f32.mrf.mxu0 }
 0x112   :  { %v302_v3 = vpop.f32.mrf.mxu1  ;;  %v1333_v6 = vadd.f32 %v1301_v0, %v1109_v55  ;;  %562 = vmatmul.f32.gmra.mxu2 %v64_v22 }
 0x113   :  { %v303_v4 = vadd.f32 %v302_v3, %v189_v2  ;;  %675 = vmatmul.f32.gmra.mxu3 %v422_v1 }
 0x114   :  { %v1603_v8 = vadd.f32 -0.5, %v1333_v6  ;;  %236 = vmatmul.f32.gmra.mxu0 %v64_v22  ;;  %349 = vmatmul.f32.gmra.mxu1 %v96_v5 }
 0x115   :  { %v374_v61 = vadd.f32 %v2075_v48, %v303_v4  ;;  %v515_v11 = vpop.f32.mrf.mxu2 }
 0x116   :  { %v1531_v9 = vsel %vm1491_vm0, %v1603_v8, 0.0  ;;  %v628_v12 = vpop.f32.mrf.mxu3 }
 0x117   :  { %732 = vst [vmem:[%s2621_s9 + $0x70] sm:$0xff] %v374_v61 }
 0x118   :  { %1563 = vst [vmem:[%s2622_s10 + $0x38] sm:$0xff] %v1531_v9 }
 0x119   :  { %v192_v47 = vpop.f32.mrf.mxu0 }
 0x11a   :  { %v305_v46 = vpop.f32.mrf.mxu1  ;;  %565 = vmatmul.f32.gmra.mxu2 %v65_v13 }
 0x11b   :  { %v306_v16 = vadd.f32 %v305_v46, %v192_v47  ;;  %678 = vmatmul.f32.gmra.mxu3 %v423_v14 }
 0x11c   :  { %239 = vmatmul.f32.gmra.mxu0 %v65_v13  ;;  %352 = vmatmul.f32.gmra.mxu1 %v97_v15 }
 0x11d   :  { %v375_v17 = vadd.f32 %v2075_v48, %v306_v16  ;;  %v518_v19 = vpop.f32.mrf.mxu2 }
 0x11e   :  { %v631_v20 = vpop.f32.mrf.mxu3 }
 0x11f   :  { %733 = vst [vmem:[%s2621_s9 + $0x78] sm:$0xff] %v375_v17 }
 0x121   :  { %v195_v49 = vpop.f32.mrf.mxu0 }
 0x122   :  { %v308_v50 = vpop.f32.mrf.mxu1 }
 0x123   :  { %v309_v23 = vadd.f32 %v308_v50, %v195_v49 }
 0x125   :  { %v376_v28 = vadd.f32 %v2075_v48, %v309_v23  ;;  %v521_v36 = vpop.f32.mrf.mxu2 }
 0x126   :  { %v634_v24 = vpop.f32.mrf.mxu3 }
 0x127   :  { %734 = vst [vmem:[%s2621_s9 + $0x80] sm:$0xff] %v376_v28 }
 0x129   :  { %v198_v25 = vpop.f32.mrf.mxu0 }
 0x12a   :  { %v311_v26 = vpop.f32.mrf.mxu1 }
 0x12b   :  { %v312_v27 = vadd.f32 %v311_v26, %v198_v25 }
 0x12d   :  { %v377_v29 = vadd.f32 %v2075_v48, %v312_v27  ;;  %v524_v31 = vpop.f32.mrf.mxu2 }
 0x12e   :  { %v637_v32 = vpop.f32.mrf.mxu3 }
 0x12f   :  { %735 = vst [vmem:[%s2621_s9 + $0x88] sm:$0xff] %v377_v29 }
 0x131   :  { %v201_v33 = vpop.f32.mrf.mxu0 }
 0x132   :  { %v314_v35 = vpop.f32.mrf.mxu1 }
 0x133   :  { %v315_v37 = vadd.f32 %v314_v35, %v201_v33 }
 0x135   :  { %v378_v21 = vadd.f32 %v2075_v48, %v315_v37  ;;  %v527_v38 = vpop.f32.mrf.mxu2 }
 0x136   :  { %v640_v30 = vpop.f32.mrf.mxu3 }
 0x137   :  { %736 = vst [vmem:[%s2621_s9 + $0x90] sm:$0xff] %v378_v21 }
 0x139   :  { %v204_v39 = vpop.f32.mrf.mxu0 }
 0x13a   :  { %v317_v40 = vpop.f32.mrf.mxu1 }
 0x13b   :  { %v318_v41 = vadd.f32 %v317_v40, %v204_v39 }
 0x13d   :  { %v379_v52 = vadd.f32 %v2075_v48, %v318_v41  ;;  %v530_v42 = vpop.f32.mrf.mxu2 }
 0x13e   :  { %v643_v43 = vpop.f32.mrf.mxu3 }
 0x13f   :  { %737 = vst [vmem:[%s2621_s9 + $0x98] sm:$0xff] %v379_v52 }
 0x141   :  { %v207_v44 = vpop.f32.mrf.mxu0 }
 0x142   :  { %v320_v45 = vpop.f32.mrf.mxu1 }
 0x143   :  { %v321_v51 = vadd.f32 %v320_v45, %v207_v44 }
 0x145   :  { %v380_v53 = vadd.f32 %v2075_v48, %v321_v51  ;;  %v533_v54 = vpop.f32.mrf.mxu2 }
 0x146   :  { %v646_v57 = vpop.f32.mrf.mxu3 }
 0x147   :  { %738 = vst [vmem:[%s2621_s9 + $0xa0] sm:$0xff] %v380_v53 }
 0x149   :  { %v210_v58 = vpop.f32.mrf.mxu0 }
 0x14a   :  { %v323_v7 = vpop.f32.mrf.mxu1 }
 0x14b   :  { %v324_v59 = vadd.f32 %v323_v7, %v210_v58 }
 0x14d   :  { %v381_v34 = vadd.f32 %v2075_v48, %v324_v59  ;;  %v536_v62 = vpop.f32.mrf.mxu2 }
 0x14e   :  { %v649_v56 = vpop.f32.mrf.mxu3 }
 0x14f   :  { %739 = vst [vmem:[%s2621_s9 + $0xa8] sm:$0xff] %v381_v34 }
 0x151   :  { %v213_v18 = vpop.f32.mrf.mxu0 }
 0x152   :  { %v326_v10 = vpop.f32.mrf.mxu1 }
 0x153   :  { %v327_v63 = vadd.f32 %v326_v10, %v213_v18 }
 0x155   :  { %v382_v55 = vadd.f32 %v2570_v60, %v327_v63  ;;  %v539_v48 = vpop.f32.mrf.mxu2 }
 0x156   :  { %v652_v0 = vpop.f32.mrf.mxu3 }
 0x157   :  { %740 = vst [vmem:[%s2621_s9 + $0xb0] sm:$0xff] %v382_v55 }
 0x159   :  { %v216_v22 = vpop.f32.mrf.mxu0 }
 0x15a   :  { %v329_v1 = vpop.f32.mrf.mxu1 }
 0x15b   :  { %v330_v2 = vadd.f32 %v329_v1, %v216_v22 }
 0x15d   :  { %v383_v3 = vadd.f32 %v2570_v60, %v330_v2  ;;  %v542_v5 = vpop.f32.mrf.mxu2 }
 0x15e   :  { %v655_v6 = vpop.f32.mrf.mxu3 }
 0x15f   :  { %741 = vst [vmem:[%s2621_s9 + $0xb8] sm:$0xff] %v383_v3 }
 0x161   :  { %v219_v4 = vpop.f32.mrf.mxu0 }
 0x162   :  { %v332_v8 = vpop.f32.mrf.mxu1 }
 0x163   :  { %v333_v61 = vadd.f32 %v332_v8, %v219_v4 }
 0x165   :  { %v384_v9 = vadd.f32 %v2570_v60, %v333_v61  ;;  %v545_v11 = vpop.f32.mrf.mxu2 }
 0x166   :  { %v658_v12 = vpop.f32.mrf.mxu3 }
 0x167   :  { %742 = vst [vmem:[%s2621_s9 + $0xc0] sm:$0xff] %v384_v9 }
 0x169   :  { %v222_v13 = vpop.f32.mrf.mxu0 }
 0x16a   :  { %v335_v14 = vpop.f32.mrf.mxu1 }
 0x16b   :  { %v336_v47 = vadd.f32 %v335_v14, %v222_v13 }
 0x16d   :  { %v385_v46 = vadd.f32 %v2570_v60, %v336_v47  ;;  %v548_v15 = vpop.f32.mrf.mxu2 }
 0x16e   :  { %v661_v16 = vpop.f32.mrf.mxu3 }
 0x16f   :  { %743 = vst [vmem:[%s2621_s9 + $0xc8] sm:$0xff] %v385_v46 }
 0x171   :  { %v225_v17 = vpop.f32.mrf.mxu0 }
 0x172   :  { %v338_v19 = vpop.f32.mrf.mxu1 }
 0x173   :  { %v339_v20 = vadd.f32 %v338_v19, %v225_v17 }
 0x175   :  { %v386_v49 = vadd.f32 %v2570_v60, %v339_v20  ;;  %v551_v50 = vpop.f32.mrf.mxu2 }
 0x176   :  { %v664_v23 = vpop.f32.mrf.mxu3 }
 0x177   :  { %744 = vst [vmem:[%s2621_s9 + $0xd0] sm:$0xff] %v386_v49 }
 0x179   :  { %v228_v28 = vpop.f32.mrf.mxu0 }
 0x17a   :  { %v341_v36 = vpop.f32.mrf.mxu1 }
 0x17b   :  { %v342_v24 = vadd.f32 %v341_v36, %v228_v28 }
 0x17d   :  { %v387_v25 = vadd.f32 %v2570_v60, %v342_v24  ;;  %v554_v26 = vpop.f32.mrf.mxu2 }
 0x17e   :  { %v667_v27 = vpop.f32.mrf.mxu3 }
 0x17f   :  { %745 = vst [vmem:[%s2621_s9 + $0xd8] sm:$0xff] %v387_v25 }
 0x181   :  { %v231_v29 = vpop.f32.mrf.mxu0 }
 0x182   :  { %v344_v31 = vpop.f32.mrf.mxu1 }
 0x183   :  { %v345_v32 = vadd.f32 %v344_v31, %v231_v29 }
 0x185   :  { %v388_v33 = vadd.f32 %v2570_v60, %v345_v32  ;;  %v557_v35 = vpop.f32.mrf.mxu2 }
 0x186   :  { %v670_v37 = vpop.f32.mrf.mxu3 }
 0x187   :  { %746 = vst [vmem:[%s2621_s9 + $0xe0] sm:$0xff] %v388_v33 }
 0x189   :  { %v234_v21 = vpop.f32.mrf.mxu0 }
 0x18a   :  { %v347_v38 = vpop.f32.mrf.mxu1 }
 0x18b   :  { %v348_v30 = vadd.f32 %v347_v38, %v234_v21 }
 0x18d   :  { %v389_v39 = vadd.f32 %v2570_v60, %v348_v30  ;;  %v560_v40 = vpop.f32.mrf.mxu2 }
 0x18e   :  { %v673_v41 = vpop.f32.mrf.mxu3 }
 0x18f   :  { %747 = vst [vmem:[%s2621_s9 + $0xe8] sm:$0xff] %v389_v39 }
 0x191   :  { %v237_v52 = vpop.f32.mrf.mxu0 }
 0x192   :  { %v350_v42 = vpop.f32.mrf.mxu1 }
 0x193   :  { %v351_v43 = vadd.f32 %v350_v42, %v237_v52 }
 0x195   :  { %v390_v44 = vadd.f32 %v2570_v60, %v351_v43  ;;  %v563_v45 = vpop.f32.mrf.mxu2 }
 0x196   :  { %v676_v51 = vpop.f32.mrf.mxu3 }
 0x197   :  { %748 = vst [vmem:[%s2621_s9 + $0xf0] sm:$0xff] %v390_v44 }
 0x199   :  { %v240_v53 = vpop.f32.mrf.mxu0 }
 0x19a   :  { %v353_v54 = vpop.f32.mrf.mxu1 }
 0x19b   :  { %v354_v57 = vadd.f32 %v353_v54, %v240_v53 }
 0x19d   :  { %v391_v58 = vadd.f32 %v2570_v60, %v354_v57  ;;  %v566_v7 = vpop.f32.mrf.mxu2 }
 0x19e   :  { %v679_v59 = vpop.f32.mrf.mxu3 }
 0x19f   :  { %749 = vst [vmem:[%s2621_s9 + $0xf8] sm:$0xff] %v391_v58 }

</bundles_post_ra>
